<compile_context>
chip_gen: v6e
topology: v6e:2x2x1
jax: 0.10.0
libtpu: 0.0.40
codegen_flags: <defaults>
</compile_context>

<pallas_src>
import jax
import jax.numpy as jnp
from jax import lax
from jax.experimental import pallas as pl
from jax.experimental.pallas import tpu as pltpu

DILATIONS = (1, 6, 12, 18)
NUM_BRANCH = len(DILATIONS)
MAXPAD = max(DILATIONS)
KSIZE = 3
EPS = 1e-5


def _branch_conv(x_ref, w_ref, b, d, L):
    """Dilated k=3 conv of one branch over a (TB, C_in, Lp) block -> (TB, C_out, L) f32.

    x_ref : (TB, C_in, L + 2*MAXPAD) VMEM block (input zero-padded on L)
    w_ref : (NUM_BRANCH, C_out, 3*C_in) VMEM block, tap-major contraction layout
    b, d  : static Python ints (branch index, dilation)
    """
    TB, C_in, _ = x_ref.shape
    C_out = w_ref.shape[1]
    # The three dilated taps, each a static slice of the padded length.
    taps = [
        x_ref[:, :, MAXPAD + (k - 1) * d: MAXPAD + (k - 1) * d + L]
        for k in range(KSIZE)
    ]                                                   # 3 x (TB, C_in, L)
    w = w_ref[b]                                        # (C_out, 3*C_in)

    acc = jnp.zeros((TB, C_out, L), jnp.float32)
    if C_in >= 8:
        # MXU path: one accumulating dot per tap (no concat VMEM copy; on v7x
        # the MRB accumulates the three taps in place in the result buffer).
        for k in range(KSIZE):
            acc = acc + jnp.einsum(
                "oc,bcl->bol", w[:, k * C_in:(k + 1) * C_in], taps[k],
                preferred_element_type=jnp.float32)
        return acc

    # Tiny-C_in path (module default C_in=4): 3*C_in rank-1 FMAs on the VPU —
    # no 4-D broadcast temporary, no XLU cross-sublane reduce.
    for k in range(KSIZE):
        xk = taps[k]                                    # (TB, C_in, L)
        for ci in range(C_in):
            j = k * C_in + ci
            acc = acc + w[:, j:j + 1][None, :, :] * xk[:, ci:ci + 1, :]
    return acc


def _stats_kernel(x_ref, w_ref, sum_ref, ssq_ref):
    """Pass 1: accumulate exact per-channel sum / sum-of-squares over (N, L)."""
    n = pl.program_id(0)
    L = x_ref.shape[2] - 2 * MAXPAD

    @pl.when(n == 0)
    def _init():
        sum_ref[...] = jnp.zeros_like(sum_ref)
        ssq_ref[...] = jnp.zeros_like(ssq_ref)

    part_sum, part_ssq = [], []
    for b, d in enumerate(DILATIONS):
        y = _branch_conv(x_ref, w_ref, b, d, L)          # (TB, C_out, L) f32
        part_sum.append(jnp.sum(jnp.sum(y, axis=0), axis=1, keepdims=True))
        part_ssq.append(jnp.sum(jnp.sum(y * y, axis=0), axis=1, keepdims=True))
    # One full-block (4*C_out, 1) accumulator update per step (sublane-dense).
    sum_ref[...] += jnp.concatenate(part_sum, axis=0)
    ssq_ref[...] += jnp.concatenate(part_ssq, axis=0)


def _apply_kernel(x_ref, w_ref, scale_ref, shift_ref, o_ref):
    """Pass 2: conv -> folded BatchNorm (scale/shift) -> ReLU, concat layout."""
    L = x_ref.shape[2] - 2 * MAXPAD
    C_out = w_ref.shape[1]
    for b, d in enumerate(DILATIONS):
        y = _branch_conv(x_ref, w_ref, b, d, L)           # (TB, C_out, L) f32
        sl = slice(b * C_out, (b + 1) * C_out)
        sc = scale_ref[sl, :][None, :, :]                 # (1, C_out, 1)
        sh = shift_ref[sl, :][None, :, :]
        # Store straight into this branch's channel slice of the
        # (TB, 4*C_out, L) output block; HBM writeback is the full dense slab.
        o_ref[:, sl, :] = jnp.maximum(y * sc + sh, 0.0).astype(o_ref.dtype)


def _vmem_limit_bytes():
    """~3/4 of physical VMEM: ~48 MiB on v7x (64 MiB), ~96 MiB on v5e/v6e (128 MiB)."""
    try:
        cap = pltpu.get_tpu_info().vmem_capacity_bytes
    except Exception:
        cap = 64 * 1024 * 1024          # conservative (v7x) fallback
    return min((cap * 3) // 4, 100 * 1024 * 1024)


def _pick_batch_tile(N, C_in, C_out, L, Lp, in_itemsize, budget_bytes):
    """Largest batch tile that (double-buffered) fits the scoped VMEM budget."""
    def footprint(tb):
        x_blk = 2 * tb * C_in * Lp * in_itemsize          # double-buffered input
        o_blk = 2 * tb * NUM_BRANCH * C_out * L * 4       # double-buffered output
        tmp = 4 * tb * C_out * L * 4                      # conv temporaries (approx)
        return x_blk + o_blk + tmp

    best = 1
    for cand in range(1, N + 1):
        if N % cand == 0 and footprint(cand) <= budget_bytes:
            best = cand
    # Keep >= 2 grid steps when possible so v7x's two TensorCores both get
    # work on pass 2's "parallel" batch axis.
    if N >= 2 and best > N // 2:
        best = max(1, N // 2)
        while N % best:
            best -= 1
    return best


def aspp_block(x, weights, biases, gammas, betas, *, conv_dtype=jnp.float32):
    """x: (N, C_in, L); weights: (4, C_out, C_in, 3) (PyTorch Conv1d layout).

    Returns (N, 4*C_out, L) float32 with training-mode BatchNorm semantics.
    Set conv_dtype=jnp.bfloat16 for MXU-native rate on large shapes (loosen
    the test tolerance accordingly); stats / BN fold / output stay float32.
    """
    del biases   # exactly cancelled by training-mode BatchNorm mean subtraction
    # TODO(synk): BatchNorm1d running_mean/running_var momentum buffer updates
    # (training-time side effect) are not reproduced; they do not affect the
    # returned forward output.
    N, C_in, L = x.shape
    C_out = weights.shape[1]
    CC = NUM_BRANCH * C_out
    Lp = L + 2 * MAXPAD

    # Zero-pad once by the maximum dilation so every tap is a static slice.
    # TODO(synk): for very long L, tile the length axis with a 2*MAXPAD halo
    # (manual pl.ANY + make_async_copy windows) instead of materializing xpad
    # in HBM and holding a full padded row in each VMEM block.
    xpad = jnp.pad(x.astype(conv_dtype), ((0, 0), (0, 0), (MAXPAD, MAXPAD)))

    # (4, C_out, C_in, 3) -> (4, C_out, 3*C_in): tap-major contraction layout,
    # matching the tap slices taken inside the kernel.
    w2 = jnp.transpose(weights.astype(conv_dtype), (0, 1, 3, 2)).reshape(
        NUM_BRANCH, C_out, KSIZE * C_in)

    vmem_limit = _vmem_limit_bytes()
    TB = _pick_batch_tile(N, C_in, C_out, L, Lp,
                          jnp.dtype(conv_dtype).itemsize,
                          budget_bytes=vmem_limit // 2)
    grid = (N // TB,)

    x_spec = pl.BlockSpec((TB, C_in, Lp), lambda n: (n, 0, 0))
    w_spec = pl.BlockSpec((NUM_BRANCH, C_out, KSIZE * C_in), lambda n: (0, 0, 0))
    stat_spec = pl.BlockSpec((CC, 1), lambda n: (0, 0))

    # ---- pass 1: exact global per-(branch, channel) batch statistics --------
    sums, ssqs = pl.pallas_call(
        _stats_kernel,
        out_shape=(jax.ShapeDtypeStruct((CC, 1), jnp.float32),
                   jax.ShapeDtypeStruct((CC, 1), jnp.float32)),
        grid_spec=pltpu.PrefetchScalarGridSpec(
            num_scalar_prefetch=0,
            grid=grid,
            in_specs=[x_spec, w_spec],
            out_specs=[stat_spec, stat_spec]),
        compiler_params=pltpu.CompilerParams(
            dimension_semantics=("arbitrary",),   # batch axis is the BN reduction
            vmem_limit_bytes=vmem_limit),
    )(xpad, w2)

    # ---- BN fold: once, in plain JAX (not per grid step) --------------------
    # NOTE: variance is E[y^2] - E[y]^2 in f32 over N*L samples; this can lose
    # precision when |mean| >> std (very large N*L or a strong DC component).
    inv_count = 1.0 / float(N * L)
    mean = sums * inv_count                                   # (CC, 1)
    var = ssqs * inv_count - mean * mean                      # biased variance
    gamma2 = gammas.astype(jnp.float32).reshape(CC, 1)
    beta2 = betas.astype(jnp.float32).reshape(CC, 1)
    scale = gamma2 * lax.rsqrt(var + EPS)
    shift = beta2 - mean * scale

    # ---- pass 2: conv -> scale/shift -> ReLU, final concat layout -----------
    out = pl.pallas_call(
        _apply_kernel,
        out_shape=jax.ShapeDtypeStruct((N, CC, L), jnp.float32),
        grid_spec=pltpu.PrefetchScalarGridSpec(
            num_scalar_prefetch=0,
            grid=grid,
            in_specs=[x_spec, w_spec, stat_spec, stat_spec],
            out_specs=pl.BlockSpec((TB, CC, L), lambda n: (n, 0, 0))),
        compiler_params=pltpu.CompilerParams(
            dimension_semantics=("parallel",),
            vmem_limit_bytes=vmem_limit),
    )(xpad, w2, scale, shift)
    return out


def aspp_reference(x, weights, biases, gammas, betas):
    """Pure-JAX reference (lax conv, training-mode BN) for correctness checking."""
    outs = []
    for i, d in enumerate(DILATIONS):
        y = lax.conv_general_dilated(
            x, weights[i],
            window_strides=(1,), padding=[(d, d)], rhs_dilation=(d,),
            dimension_numbers=("NCH", "OIH", "NCH"),
            precision=lax.Precision.HIGHEST)
        y = y + biases[i][None, :, None]
        mean = jnp.mean(y, axis=(0, 2), keepdims=True)
        var = jnp.mean((y - mean) ** 2, axis=(0, 2), keepdims=True)
        y = (y - mean) * lax.rsqrt(var + EPS)
        y = y * gammas[i][None, :, None] + betas[i][None, :, None]
        outs.append(jnp.maximum(y, 0.0))
    return jnp.concatenate(outs, axis=1)


if __name__ == "__main__":
    N, C_in, C_out, L = 2, 4, 4, 256   # L multiple of 128 -> lane-dense stores

    key = jax.random.PRNGKey(0)
    kx, kw, kb = jax.random.split(key, 3)

    x = jax.random.normal(kx, (N, C_in, L), dtype=jnp.float32)

    bound = 1.0 / (C_in * KSIZE) ** 0.5      # PyTorch Conv1d init bound
    weights = jax.random.uniform(kw, (NUM_BRANCH, C_out, C_in, KSIZE),
                                 minval=-bound, maxval=bound, dtype=jnp.float32)
    biases = jax.random.uniform(kb, (NUM_BRANCH, C_out),
                                minval=-bound, maxval=bound, dtype=jnp.float32)
    gammas = jnp.ones((NUM_BRANCH, C_out), jnp.float32)   # BatchNorm1d defaults
    betas = jnp.zeros((NUM_BRANCH, C_out), jnp.float32)

    out = jax.block_until_ready(
        jax.jit(aspp_block)(x, weights, biases, gammas, betas))

    ref = aspp_reference(x, weights, biases, gammas, betas)
    assert out.shape == (N, NUM_BRANCH * C_out, L)
    assert jnp.allclose(out, ref, atol=1e-4, rtol=1e-4), "mismatch vs reference"

    print("KERNEL_OK")
</pallas_src>

<mosaic_0001>
module attributes {stable_mosaic.version = 11 : i64} {
  func.func @_stats_kernel(%arg0: i32, %arg1: memref<1x4x292xf32, #tpu.memory_space<vmem>>, %arg2: memref<4x4x12xf32, #tpu.memory_space<vmem>>, %arg3: memref<16x1xf32, #tpu.memory_space<vmem>>, %arg4: memref<16x1xf32, #tpu.memory_space<vmem>>) attributes {dimension_semantics = [#tpu.dimension_semantics<arbitrary>], iteration_bounds = array<i64: 2>, scalar_prefetch = 0 : i64, scratch_operands = 0 : i64, tpu.core_type = #tpu.core_type<tc>, window_params = [{transform_indices = @transform_0, window_bounds = array<i64: 1, 4, 292>}, {pipeline_mode = #tpu.pipeline_mode<synchronous>, transform_indices = @transform_1, window_bounds = array<i64: 4, 4, 12>}, {pipeline_mode = #tpu.pipeline_mode<synchronous>, transform_indices = @transform_2, window_bounds = array<i64: 16, 1>}, {pipeline_mode = #tpu.pipeline_mode<synchronous>, transform_indices = @transform_3, window_bounds = array<i64: 16, 1>}]} {
    %c0_i32 = arith.constant 0 : i32
    %0 = arith.cmpi eq, %arg0, %c0_i32 : i32
    %1 = arith.extui %0 : i1 to i32
    %c0_i32_0 = arith.constant 0 : i32
    %2 = arith.cmpi ne, %1, %c0_i32_0 : i32
    scf.if %2 {
      %cst_64 = arith.constant 0.000000e+00 : f32
      %399 = vector.broadcast %cst_64 : f32 to vector<16x1xf32>
      %c0_65 = arith.constant 0 : index
      %c0_66 = arith.constant 0 : index
      %400 = vector.load %arg3[%c0_65, %c0_66] : memref<16x1xf32, #tpu.memory_space<vmem>>, vector<16x1xf32>
      tpu.vector_store %arg3[%c0_65, %c0_66], %399 {strides = array<i32>} : memref<16x1xf32, #tpu.memory_space<vmem>>, vector<16x1xf32>,
      %cst_67 = arith.constant 0.000000e+00 : f32
      %401 = vector.broadcast %cst_67 : f32 to vector<16x1xf32>
      %c0_68 = arith.constant 0 : index
      %c0_69 = arith.constant 0 : index
      %402 = vector.load %arg4[%c0_68, %c0_69] : memref<16x1xf32, #tpu.memory_space<vmem>>, vector<16x1xf32>
      tpu.vector_store %arg4[%c0_68, %c0_69], %401 {strides = array<i32>} : memref<16x1xf32, #tpu.memory_space<vmem>>, vector<16x1xf32>,
    } else {
    }
    %c0 = arith.constant 0 : index
    %c0_1 = arith.constant 0 : index
    %c17 = arith.constant 17 : index
    %3 = vector.load %arg1[%c0, %c0_1, %c17] : memref<1x4x292xf32, #tpu.memory_space<vmem>>, vector<1x4x256xf32>
    %c0_2 = arith.constant 0 : index
    %c0_3 = arith.constant 0 : index
    %c18 = arith.constant 18 : index
    %4 = vector.load %arg1[%c0_2, %c0_3, %c18] : memref<1x4x292xf32, #tpu.memory_space<vmem>>, vector<1x4x256xf32>
    %c0_4 = arith.constant 0 : index
    %c0_5 = arith.constant 0 : index
    %c19 = arith.constant 19 : index
    %5 = vector.load %arg1[%c0_4, %c0_5, %c19] : memref<1x4x292xf32, #tpu.memory_space<vmem>>, vector<1x4x256xf32>
    %c0_6 = arith.constant 0 : index
    %c0_7 = arith.constant 0 : index
    %c0_8 = arith.constant 0 : index
    %6 = vector.load %arg2[%c0_6, %c0_7, %c0_8] : memref<4x4x12xf32, #tpu.memory_space<vmem>>, vector<1x4x12xf32>
    %7 = vector.shape_cast %6 : vector<1x4x12xf32> to vector<4x12xf32>
    %cst = arith.constant 0.000000e+00 : f32
    %8 = vector.broadcast %cst : f32 to vector<1x4x256xf32>
    %9 = vector.extract_strided_slice %7 {offsets = [0, 0], sizes = [4, 1], strides = [1, 1]} : vector<4x12xf32> to vector<4x1xf32>
    %10 = vector.shape_cast %9 : vector<4x1xf32> to vector<1x4x1xf32>
    %11 = vector.extract_strided_slice %3 {offsets = [0, 0, 0], sizes = [1, 1, 256], strides = [1, 1, 1]} : vector<1x4x256xf32> to vector<1x1x256xf32>
    %12 = vector.broadcast %10 : vector<1x4x1xf32> to vector<1x4x256xf32>
    %13 = vector.broadcast %11 : vector<1x1x256xf32> to vector<1x4x256xf32>
    %14 = arith.mulf %12, %13 : vector<1x4x256xf32>
    %15 = arith.addf %8, %14 : vector<1x4x256xf32>
    %16 = vector.extract_strided_slice %7 {offsets = [0, 1], sizes = [4, 1], strides = [1, 1]} : vector<4x12xf32> to vector<4x1xf32>
    %17 = vector.shape_cast %16 : vector<4x1xf32> to vector<1x4x1xf32>
    %18 = vector.extract_strided_slice %3 {offsets = [0, 1, 0], sizes = [1, 1, 256], strides = [1, 1, 1]} : vector<1x4x256xf32> to vector<1x1x256xf32>
    %19 = vector.broadcast %17 : vector<1x4x1xf32> to vector<1x4x256xf32>
    %20 = vector.broadcast %18 : vector<1x1x256xf32> to vector<1x4x256xf32>
    %21 = arith.mulf %19, %20 : vector<1x4x256xf32>
    %22 = arith.addf %15, %21 : vector<1x4x256xf32>
    %23 = vector.extract_strided_slice %7 {offsets = [0, 2], sizes = [4, 1], strides = [1, 1]} : vector<4x12xf32> to vector<4x1xf32>
    %24 = vector.shape_cast %23 : vector<4x1xf32> to vector<1x4x1xf32>
    %25 = vector.extract_strided_slice %3 {offsets = [0, 2, 0], sizes = [1, 1, 256], strides = [1, 1, 1]} : vector<1x4x256xf32> to vector<1x1x256xf32>
    %26 = vector.broadcast %24 : vector<1x4x1xf32> to vector<1x4x256xf32>
    %27 = vector.broadcast %25 : vector<1x1x256xf32> to vector<1x4x256xf32>
    %28 = arith.mulf %26, %27 : vector<1x4x256xf32>
    %29 = arith.addf %22, %28 : vector<1x4x256xf32>
    %30 = vector.extract_strided_slice %7 {offsets = [0, 3], sizes = [4, 1], strides = [1, 1]} : vector<4x12xf32> to vector<4x1xf32>
    %31 = vector.shape_cast %30 : vector<4x1xf32> to vector<1x4x1xf32>
    %32 = vector.extract_strided_slice %3 {offsets = [0, 3, 0], sizes = [1, 1, 256], strides = [1, 1, 1]} : vector<1x4x256xf32> to vector<1x1x256xf32>
    %33 = vector.broadcast %31 : vector<1x4x1xf32> to vector<1x4x256xf32>
    %34 = vector.broadcast %32 : vector<1x1x256xf32> to vector<1x4x256xf32>
    %35 = arith.mulf %33, %34 : vector<1x4x256xf32>
    %36 = arith.addf %29, %35 : vector<1x4x256xf32>
    %37 = vector.extract_strided_slice %7 {offsets = [0, 4], sizes = [4, 1], strides = [1, 1]} : vector<4x12xf32> to vector<4x1xf32>
    %38 = vector.shape_cast %37 : vector<4x1xf32> to vector<1x4x1xf32>
    %39 = vector.extract_strided_slice %4 {offsets = [0, 0, 0], sizes = [1, 1, 256], strides = [1, 1, 1]} : vector<1x4x256xf32> to vector<1x1x256xf32>
    %40 = vector.broadcast %38 : vector<1x4x1xf32> to vector<1x4x256xf32>
    %41 = vector.broadcast %39 : vector<1x1x256xf32> to vector<1x4x256xf32>
    %42 = arith.mulf %40, %41 : vector<1x4x256xf32>
    %43 = arith.addf %36, %42 : vector<1x4x256xf32>
    %44 = vector.extract_strided_slice %7 {offsets = [0, 5], sizes = [4, 1], strides = [1, 1]} : vector<4x12xf32> to vector<4x1xf32>
    %45 = vector.shape_cast %44 : vector<4x1xf32> to vector<1x4x1xf32>
    %46 = vector.extract_strided_slice %4 {offsets = [0, 1, 0], sizes = [1, 1, 256], strides = [1, 1, 1]} : vector<1x4x256xf32> to vector<1x1x256xf32>
    %47 = vector.broadcast %45 : vector<1x4x1xf32> to vector<1x4x256xf32>
    %48 = vector.broadcast %46 : vector<1x1x256xf32> to vector<1x4x256xf32>
    %49 = arith.mulf %47, %48 : vector<1x4x256xf32>
    %50 = arith.addf %43, %49 : vector<1x4x256xf32>
    %51 = vector.extract_strided_slice %7 {offsets = [0, 6], sizes = [4, 1], strides = [1, 1]} : vector<4x12xf32> to vector<4x1xf32>
    %52 = vector.shape_cast %51 : vector<4x1xf32> to vector<1x4x1xf32>
    %53 = vector.extract_strided_slice %4 {offsets = [0, 2, 0], sizes = [1, 1, 256], strides = [1, 1, 1]} : vector<1x4x256xf32> to vector<1x1x256xf32>
    %54 = vector.broadcast %52 : vector<1x4x1xf32> to vector<1x4x256xf32>
    %55 = vector.broadcast %53 : vector<1x1x256xf32> to vector<1x4x256xf32>
    %56 = arith.mulf %54, %55 : vector<1x4x256xf32>
    %57 = arith.addf %50, %56 : vector<1x4x256xf32>
    %58 = vector.extract_strided_slice %7 {offsets = [0, 7], sizes = [4, 1], strides = [1, 1]} : vector<4x12xf32> to vector<4x1xf32>
    %59 = vector.shape_cast %58 : vector<4x1xf32> to vector<1x4x1xf32>
    %60 = vector.extract_strided_slice %4 {offsets = [0, 3, 0], sizes = [1, 1, 256], strides = [1, 1, 1]} : vector<1x4x256xf32> to vector<1x1x256xf32>
    %61 = vector.broadcast %59 : vector<1x4x1xf32> to vector<1x4x256xf32>
    %62 = vector.broadcast %60 : vector<1x1x256xf32> to vector<1x4x256xf32>
    %63 = arith.mulf %61, %62 : vector<1x4x256xf32>
    %64 = arith.addf %57, %63 : vector<1x4x256xf32>
    %65 = vector.extract_strided_slice %7 {offsets = [0, 8], sizes = [4, 1], strides = [1, 1]} : vector<4x12xf32> to vector<4x1xf32>
    %66 = vector.shape_cast %65 : vector<4x1xf32> to vector<1x4x1xf32>
    %67 = vector.extract_strided_slice %5 {offsets = [0, 0, 0], sizes = [1, 1, 256], strides = [1, 1, 1]} : vector<1x4x256xf32> to vector<1x1x256xf32>
    %68 = vector.broadcast %66 : vector<1x4x1xf32> to vector<1x4x256xf32>
    %69 = vector.broadcast %67 : vector<1x1x256xf32> to vector<1x4x256xf32>
    %70 = arith.mulf %68, %69 : vector<1x4x256xf32>
    %71 = arith.addf %64, %70 : vector<1x4x256xf32>
    %72 = vector.extract_strided_slice %7 {offsets = [0, 9], sizes = [4, 1], strides = [1, 1]} : vector<4x12xf32> to vector<4x1xf32>
    %73 = vector.shape_cast %72 : vector<4x1xf32> to vector<1x4x1xf32>
    %74 = vector.extract_strided_slice %5 {offsets = [0, 1, 0], sizes = [1, 1, 256], strides = [1, 1, 1]} : vector<1x4x256xf32> to vector<1x1x256xf32>
    %75 = vector.broadcast %73 : vector<1x4x1xf32> to vector<1x4x256xf32>
    %76 = vector.broadcast %74 : vector<1x1x256xf32> to vector<1x4x256xf32>
    %77 = arith.mulf %75, %76 : vector<1x4x256xf32>
    %78 = arith.addf %71, %77 : vector<1x4x256xf32>
    %79 = vector.extract_strided_slice %7 {offsets = [0, 10], sizes = [4, 1], strides = [1, 1]} : vector<4x12xf32> to vector<4x1xf32>
    %80 = vector.shape_cast %79 : vector<4x1xf32> to vector<1x4x1xf32>
    %81 = vector.extract_strided_slice %5 {offsets = [0, 2, 0], sizes = [1, 1, 256], strides = [1, 1, 1]} : vector<1x4x256xf32> to vector<1x1x256xf32>
    %82 = vector.broadcast %80 : vector<1x4x1xf32> to vector<1x4x256xf32>
    %83 = vector.broadcast %81 : vector<1x1x256xf32> to vector<1x4x256xf32>
    %84 = arith.mulf %82, %83 : vector<1x4x256xf32>
    %85 = arith.addf %78, %84 : vector<1x4x256xf32>
    %86 = vector.extract_strided_slice %7 {offsets = [0, 11], sizes = [4, 1], strides = [1, 1]} : vector<4x12xf32> to vector<4x1xf32>
    %87 = vector.shape_cast %86 : vector<4x1xf32> to vector<1x4x1xf32>
    %88 = vector.extract_strided_slice %5 {offsets = [0, 3, 0], sizes = [1, 1, 256], strides = [1, 1, 1]} : vector<1x4x256xf32> to vector<1x1x256xf32>
    %89 = vector.broadcast %87 : vector<1x4x1xf32> to vector<1x4x256xf32>
    %90 = vector.broadcast %88 : vector<1x1x256xf32> to vector<1x4x256xf32>
    %91 = arith.mulf %89, %90 : vector<1x4x256xf32>
    %92 = arith.addf %85, %91 : vector<1x4x256xf32>
    %cst_9 = arith.constant dense<0.000000e+00> : vector<4x256xf32>
    %93 = vector.multi_reduction <add>, %92, %cst_9 [0] : vector<1x4x256xf32> to vector<4x256xf32>
    %cst_10 = arith.constant dense<0.000000e+00> : vector<4xf32>
    %94 = vector.multi_reduction <add>, %93, %cst_10 [1] : vector<4x256xf32> to vector<4xf32>
    %95 = vector.shape_cast %94 : vector<4xf32> to vector<4x1xf32>
    %96 = arith.mulf %92, %92 : vector<1x4x256xf32>
    %cst_11 = arith.constant dense<0.000000e+00> : vector<4x256xf32>
    %97 = vector.multi_reduction <add>, %96, %cst_11 [0] : vector<1x4x256xf32> to vector<4x256xf32>
    %cst_12 = arith.constant dense<0.000000e+00> : vector<4xf32>
    %98 = vector.multi_reduction <add>, %97, %cst_12 [1] : vector<4x256xf32> to vector<4xf32>
    %99 = vector.shape_cast %98 : vector<4xf32> to vector<4x1xf32>
    %c0_13 = arith.constant 0 : index
    %c0_14 = arith.constant 0 : index
    %c12 = arith.constant 12 : index
    %100 = vector.load %arg1[%c0_13, %c0_14, %c12] : memref<1x4x292xf32, #tpu.memory_space<vmem>>, vector<1x4x256xf32>
    %c0_15 = arith.constant 0 : index
    %c0_16 = arith.constant 0 : index
    %c18_17 = arith.constant 18 : index
    %101 = vector.load %arg1[%c0_15, %c0_16, %c18_17] : memref<1x4x292xf32, #tpu.memory_space<vmem>>, vector<1x4x256xf32>
    %c0_18 = arith.constant 0 : index
    %c0_19 = arith.constant 0 : index
    %c24 = arith.constant 24 : index
    %102 = vector.load %arg1[%c0_18, %c0_19, %c24] : memref<1x4x292xf32, #tpu.memory_space<vmem>>, vector<1x4x256xf32>
    %c1 = arith.constant 1 : index
    %c0_20 = arith.constant 0 : index
    %c0_21 = arith.constant 0 : index
    %103 = vector.load %arg2[%c1, %c0_20, %c0_21] : memref<4x4x12xf32, #tpu.memory_space<vmem>>, vector<1x4x12xf32>
    %104 = vector.shape_cast %103 : vector<1x4x12xf32> to vector<4x12xf32>
    %cst_22 = arith.constant 0.000000e+00 : f32
    %105 = vector.broadcast %cst_22 : f32 to vector<1x4x256xf32>
    %106 = vector.extract_strided_slice %104 {offsets = [0, 0], sizes = [4, 1], strides = [1, 1]} : vector<4x12xf32> to vector<4x1xf32>
    %107 = vector.shape_cast %106 : vector<4x1xf32> to vector<1x4x1xf32>
    %108 = vector.extract_strided_slice %100 {offsets = [0, 0, 0], sizes = [1, 1, 256], strides = [1, 1, 1]} : vector<1x4x256xf32> to vector<1x1x256xf32>
    %109 = vector.broadcast %107 : vector<1x4x1xf32> to vector<1x4x256xf32>
    %110 = vector.broadcast %108 : vector<1x1x256xf32> to vector<1x4x256xf32>
    %111 = arith.mulf %109, %110 : vector<1x4x256xf32>
    %112 = arith.addf %105, %111 : vector<1x4x256xf32>
    %113 = vector.extract_strided_slice %104 {offsets = [0, 1], sizes = [4, 1], strides = [1, 1]} : vector<4x12xf32> to vector<4x1xf32>
    %114 = vector.shape_cast %113 : vector<4x1xf32> to vector<1x4x1xf32>
    %115 = vector.extract_strided_slice %100 {offsets = [0, 1, 0], sizes = [1, 1, 256], strides = [1, 1, 1]} : vector<1x4x256xf32> to vector<1x1x256xf32>
    %116 = vector.broadcast %114 : vector<1x4x1xf32> to vector<1x4x256xf32>
    %117 = vector.broadcast %115 : vector<1x1x256xf32> to vector<1x4x256xf32>
    %118 = arith.mulf %116, %117 : vector<1x4x256xf32>
    %119 = arith.addf %112, %118 : vector<1x4x256xf32>
    %120 = vector.extract_strided_slice %104 {offsets = [0, 2], sizes = [4, 1], strides = [1, 1]} : vector<4x12xf32> to vector<4x1xf32>
    %121 = vector.shape_cast %120 : vector<4x1xf32> to vector<1x4x1xf32>
    %122 = vector.extract_strided_slice %100 {offsets = [0, 2, 0], sizes = [1, 1, 256], strides = [1, 1, 1]} : vector<1x4x256xf32> to vector<1x1x256xf32>
    %123 = vector.broadcast %121 : vector<1x4x1xf32> to vector<1x4x256xf32>
    %124 = vector.broadcast %122 : vector<1x1x256xf32> to vector<1x4x256xf32>
    %125 = arith.mulf %123, %124 : vector<1x4x256xf32>
    %126 = arith.addf %119, %125 : vector<1x4x256xf32>
    %127 = vector.extract_strided_slice %104 {offsets = [0, 3], sizes = [4, 1], strides = [1, 1]} : vector<4x12xf32> to vector<4x1xf32>
    %128 = vector.shape_cast %127 : vector<4x1xf32> to vector<1x4x1xf32>
    %129 = vector.extract_strided_slice %100 {offsets = [0, 3, 0], sizes = [1, 1, 256], strides = [1, 1, 1]} : vector<1x4x256xf32> to vector<1x1x256xf32>
    %130 = vector.broadcast %128 : vector<1x4x1xf32> to vector<1x4x256xf32>
    %131 = vector.broadcast %129 : vector<1x1x256xf32> to vector<1x4x256xf32>
    %132 = arith.mulf %130, %131 : vector<1x4x256xf32>
    %133 = arith.addf %126, %132 : vector<1x4x256xf32>
    %134 = vector.extract_strided_slice %104 {offsets = [0, 4], sizes = [4, 1], strides = [1, 1]} : vector<4x12xf32> to vector<4x1xf32>
    %135 = vector.shape_cast %134 : vector<4x1xf32> to vector<1x4x1xf32>
    %136 = vector.extract_strided_slice %101 {offsets = [0, 0, 0], sizes = [1, 1, 256], strides = [1, 1, 1]} : vector<1x4x256xf32> to vector<1x1x256xf32>
    %137 = vector.broadcast %135 : vector<1x4x1xf32> to vector<1x4x256xf32>
    %138 = vector.broadcast %136 : vector<1x1x256xf32> to vector<1x4x256xf32>
    %139 = arith.mulf %137, %138 : vector<1x4x256xf32>
    %140 = arith.addf %133, %139 : vector<1x4x256xf32>
    %141 = vector.extract_strided_slice %104 {offsets = [0, 5], sizes = [4, 1], strides = [1, 1]} : vector<4x12xf32> to vector<4x1xf32>
    %142 = vector.shape_cast %141 : vector<4x1xf32> to vector<1x4x1xf32>
    %143 = vector.extract_strided_slice %101 {offsets = [0, 1, 0], sizes = [1, 1, 256], strides = [1, 1, 1]} : vector<1x4x256xf32> to vector<1x1x256xf32>
    %144 = vector.broadcast %142 : vector<1x4x1xf32> to vector<1x4x256xf32>
    %145 = vector.broadcast %143 : vector<1x1x256xf32> to vector<1x4x256xf32>
    %146 = arith.mulf %144, %145 : vector<1x4x256xf32>
    %147 = arith.addf %140, %146 : vector<1x4x256xf32>
    %148 = vector.extract_strided_slice %104 {offsets = [0, 6], sizes = [4, 1], strides = [1, 1]} : vector<4x12xf32> to vector<4x1xf32>
    %149 = vector.shape_cast %148 : vector<4x1xf32> to vector<1x4x1xf32>
    %150 = vector.extract_strided_slice %101 {offsets = [0, 2, 0], sizes = [1, 1, 256], strides = [1, 1, 1]} : vector<1x4x256xf32> to vector<1x1x256xf32>
    %151 = vector.broadcast %149 : vector<1x4x1xf32> to vector<1x4x256xf32>
    %152 = vector.broadcast %150 : vector<1x1x256xf32> to vector<1x4x256xf32>
    %153 = arith.mulf %151, %152 : vector<1x4x256xf32>
    %154 = arith.addf %147, %153 : vector<1x4x256xf32>
    %155 = vector.extract_strided_slice %104 {offsets = [0, 7], sizes = [4, 1], strides = [1, 1]} : vector<4x12xf32> to vector<4x1xf32>
    %156 = vector.shape_cast %155 : vector<4x1xf32> to vector<1x4x1xf32>
    %157 = vector.extract_strided_slice %101 {offsets = [0, 3, 0], sizes = [1, 1, 256], strides = [1, 1, 1]} : vector<1x4x256xf32> to vector<1x1x256xf32>
    %158 = vector.broadcast %156 : vector<1x4x1xf32> to vector<1x4x256xf32>
    %159 = vector.broadcast %157 : vector<1x1x256xf32> to vector<1x4x256xf32>
    %160 = arith.mulf %158, %159 : vector<1x4x256xf32>
    %161 = arith.addf %154, %160 : vector<1x4x256xf32>
    %162 = vector.extract_strided_slice %104 {offsets = [0, 8], sizes = [4, 1], strides = [1, 1]} : vector<4x12xf32> to vector<4x1xf32>
    %163 = vector.shape_cast %162 : vector<4x1xf32> to vector<1x4x1xf32>
    %164 = vector.extract_strided_slice %102 {offsets = [0, 0, 0], sizes = [1, 1, 256], strides = [1, 1, 1]} : vector<1x4x256xf32> to vector<1x1x256xf32>
    %165 = vector.broadcast %163 : vector<1x4x1xf32> to vector<1x4x256xf32>
    %166 = vector.broadcast %164 : vector<1x1x256xf32> to vector<1x4x256xf32>
    %167 = arith.mulf %165, %166 : vector<1x4x256xf32>
    %168 = arith.addf %161, %167 : vector<1x4x256xf32>
    %169 = vector.extract_strided_slice %104 {offsets = [0, 9], sizes = [4, 1], strides = [1, 1]} : vector<4x12xf32> to vector<4x1xf32>
    %170 = vector.shape_cast %169 : vector<4x1xf32> to vector<1x4x1xf32>
    %171 = vector.extract_strided_slice %102 {offsets = [0, 1, 0], sizes = [1, 1, 256], strides = [1, 1, 1]} : vector<1x4x256xf32> to vector<1x1x256xf32>
    %172 = vector.broadcast %170 : vector<1x4x1xf32> to vector<1x4x256xf32>
    %173 = vector.broadcast %171 : vector<1x1x256xf32> to vector<1x4x256xf32>
    %174 = arith.mulf %172, %173 : vector<1x4x256xf32>
    %175 = arith.addf %168, %174 : vector<1x4x256xf32>
    %176 = vector.extract_strided_slice %104 {offsets = [0, 10], sizes = [4, 1], strides = [1, 1]} : vector<4x12xf32> to vector<4x1xf32>
    %177 = vector.shape_cast %176 : vector<4x1xf32> to vector<1x4x1xf32>
    %178 = vector.extract_strided_slice %102 {offsets = [0, 2, 0], sizes = [1, 1, 256], strides = [1, 1, 1]} : vector<1x4x256xf32> to vector<1x1x256xf32>
    %179 = vector.broadcast %177 : vector<1x4x1xf32> to vector<1x4x256xf32>
    %180 = vector.broadcast %178 : vector<1x1x256xf32> to vector<1x4x256xf32>
    %181 = arith.mulf %179, %180 : vector<1x4x256xf32>
    %182 = arith.addf %175, %181 : vector<1x4x256xf32>
    %183 = vector.extract_strided_slice %104 {offsets = [0, 11], sizes = [4, 1], strides = [1, 1]} : vector<4x12xf32> to vector<4x1xf32>
    %184 = vector.shape_cast %183 : vector<4x1xf32> to vector<1x4x1xf32>
    %185 = vector.extract_strided_slice %102 {offsets = [0, 3, 0], sizes = [1, 1, 256], strides = [1, 1, 1]} : vector<1x4x256xf32> to vector<1x1x256xf32>
    %186 = vector.broadcast %184 : vector<1x4x1xf32> to vector<1x4x256xf32>
    %187 = vector.broadcast %185 : vector<1x1x256xf32> to vector<1x4x256xf32>
    %188 = arith.mulf %186, %187 : vector<1x4x256xf32>
    %189 = arith.addf %182, %188 : vector<1x4x256xf32>
    %cst_23 = arith.constant dense<0.000000e+00> : vector<4x256xf32>
    %190 = vector.multi_reduction <add>, %189, %cst_23 [0] : vector<1x4x256xf32> to vector<4x256xf32>
    %cst_24 = arith.constant dense<0.000000e+00> : vector<4xf32>
    %191 = vector.multi_reduction <add>, %190, %cst_24 [1] : vector<4x256xf32> to vector<4xf32>
    %192 = vector.shape_cast %191 : vector<4xf32> to vector<4x1xf32>
    %193 = arith.mulf %189, %189 : vector<1x4x256xf32>
    %cst_25 = arith.constant dense<0.000000e+00> : vector<4x256xf32>
    %194 = vector.multi_reduction <add>, %193, %cst_25 [0] : vector<1x4x256xf32> to vector<4x256xf32>
    %cst_26 = arith.constant dense<0.000000e+00> : vector<4xf32>
    %195 = vector.multi_reduction <add>, %194, %cst_26 [1] : vector<4x256xf32> to vector<4xf32>
    %196 = vector.shape_cast %195 : vector<4xf32> to vector<4x1xf32>
    %c0_27 = arith.constant 0 : index
    %c0_28 = arith.constant 0 : index
    %c6 = arith.constant 6 : index
    %197 = vector.load %arg1[%c0_27, %c0_28, %c6] : memref<1x4x292xf32, #tpu.memory_space<vmem>>, vector<1x4x256xf32>
    %c0_29 = arith.constant 0 : index
    %c0_30 = arith.constant 0 : index
    %c18_31 = arith.constant 18 : index
    %198 = vector.load %arg1[%c0_29, %c0_30, %c18_31] : memref<1x4x292xf32, #tpu.memory_space<vmem>>, vector<1x4x256xf32>
    %c0_32 = arith.constant 0 : index
    %c0_33 = arith.constant 0 : index
    %c30 = arith.constant 30 : index
    %199 = vector.load %arg1[%c0_32, %c0_33, %c30] : memref<1x4x292xf32, #tpu.memory_space<vmem>>, vector<1x4x256xf32>
    %c2 = arith.constant 2 : index
    %c0_34 = arith.constant 0 : index
    %c0_35 = arith.constant 0 : index
    %200 = vector.load %arg2[%c2, %c0_34, %c0_35] : memref<4x4x12xf32, #tpu.memory_space<vmem>>, vector<1x4x12xf32>
    %201 = vector.shape_cast %200 : vector<1x4x12xf32> to vector<4x12xf32>
    %cst_36 = arith.constant 0.000000e+00 : f32
    %202 = vector.broadcast %cst_36 : f32 to vector<1x4x256xf32>
    %203 = vector.extract_strided_slice %201 {offsets = [0, 0], sizes = [4, 1], strides = [1, 1]} : vector<4x12xf32> to vector<4x1xf32>
    %204 = vector.shape_cast %203 : vector<4x1xf32> to vector<1x4x1xf32>
    %205 = vector.extract_strided_slice %197 {offsets = [0, 0, 0], sizes = [1, 1, 256], strides = [1, 1, 1]} : vector<1x4x256xf32> to vector<1x1x256xf32>
    %206 = vector.broadcast %204 : vector<1x4x1xf32> to vector<1x4x256xf32>
    %207 = vector.broadcast %205 : vector<1x1x256xf32> to vector<1x4x256xf32>
    %208 = arith.mulf %206, %207 : vector<1x4x256xf32>
    %209 = arith.addf %202, %208 : vector<1x4x256xf32>
    %210 = vector.extract_strided_slice %201 {offsets = [0, 1], sizes = [4, 1], strides = [1, 1]} : vector<4x12xf32> to vector<4x1xf32>
    %211 = vector.shape_cast %210 : vector<4x1xf32> to vector<1x4x1xf32>
    %212 = vector.extract_strided_slice %197 {offsets = [0, 1, 0], sizes = [1, 1, 256], strides = [1, 1, 1]} : vector<1x4x256xf32> to vector<1x1x256xf32>
    %213 = vector.broadcast %211 : vector<1x4x1xf32> to vector<1x4x256xf32>
    %214 = vector.broadcast %212 : vector<1x1x256xf32> to vector<1x4x256xf32>
    %215 = arith.mulf %213, %214 : vector<1x4x256xf32>
    %216 = arith.addf %209, %215 : vector<1x4x256xf32>
    %217 = vector.extract_strided_slice %201 {offsets = [0, 2], sizes = [4, 1], strides = [1, 1]} : vector<4x12xf32> to vector<4x1xf32>
    %218 = vector.shape_cast %217 : vector<4x1xf32> to vector<1x4x1xf32>
    %219 = vector.extract_strided_slice %197 {offsets = [0, 2, 0], sizes = [1, 1, 256], strides = [1, 1, 1]} : vector<1x4x256xf32> to vector<1x1x256xf32>
    %220 = vector.broadcast %218 : vector<1x4x1xf32> to vector<1x4x256xf32>
    %221 = vector.broadcast %219 : vector<1x1x256xf32> to vector<1x4x256xf32>
    %222 = arith.mulf %220, %221 : vector<1x4x256xf32>
    %223 = arith.addf %216, %222 : vector<1x4x256xf32>
    %224 = vector.extract_strided_slice %201 {offsets = [0, 3], sizes = [4, 1], strides = [1, 1]} : vector<4x12xf32> to vector<4x1xf32>
    %225 = vector.shape_cast %224 : vector<4x1xf32> to vector<1x4x1xf32>
    %226 = vector.extract_strided_slice %197 {offsets = [0, 3, 0], sizes = [1, 1, 256], strides = [1, 1, 1]} : vector<1x4x256xf32> to vector<1x1x256xf32>
    %227 = vector.broadcast %225 : vector<1x4x1xf32> to vector<1x4x256xf32>
    %228 = vector.broadcast %226 : vector<1x1x256xf32> to vector<1x4x256xf32>
    %229 = arith.mulf %227, %228 : vector<1x4x256xf32>
    %230 = arith.addf %223, %229 : vector<1x4x256xf32>
    %231 = vector.extract_strided_slice %201 {offsets = [0, 4], sizes = [4, 1], strides = [1, 1]} : vector<4x12xf32> to vector<4x1xf32>
    %232 = vector.shape_cast %231 : vector<4x1xf32> to vector<1x4x1xf32>
    %233 = vector.extract_strided_slice %198 {offsets = [0, 0, 0], sizes = [1, 1, 256], strides = [1, 1, 1]} : vector<1x4x256xf32> to vector<1x1x256xf32>
    %234 = vector.broadcast %232 : vector<1x4x1xf32> to vector<1x4x256xf32>
    %235 = vector.broadcast %233 : vector<1x1x256xf32> to vector<1x4x256xf32>
    %236 = arith.mulf %234, %235 : vector<1x4x256xf32>
    %237 = arith.addf %230, %236 : vector<1x4x256xf32>
    %238 = vector.extract_strided_slice %201 {offsets = [0, 5], sizes = [4, 1], strides = [1, 1]} : vector<4x12xf32> to vector<4x1xf32>
    %239 = vector.shape_cast %238 : vector<4x1xf32> to vector<1x4x1xf32>
    %240 = vector.extract_strided_slice %198 {offsets = [0, 1, 0], sizes = [1, 1, 256], strides = [1, 1, 1]} : vector<1x4x256xf32> to vector<1x1x256xf32>
    %241 = vector.broadcast %239 : vector<1x4x1xf32> to vector<1x4x256xf32>
    %242 = vector.broadcast %240 : vector<1x1x256xf32> to vector<1x4x256xf32>
    %243 = arith.mulf %241, %242 : vector<1x4x256xf32>
    %244 = arith.addf %237, %243 : vector<1x4x256xf32>
    %245 = vector.extract_strided_slice %201 {offsets = [0, 6], sizes = [4, 1], strides = [1, 1]} : vector<4x12xf32> to vector<4x1xf32>
    %246 = vector.shape_cast %245 : vector<4x1xf32> to vector<1x4x1xf32>
    %247 = vector.extract_strided_slice %198 {offsets = [0, 2, 0], sizes = [1, 1, 256], strides = [1, 1, 1]} : vector<1x4x256xf32> to vector<1x1x256xf32>
    %248 = vector.broadcast %246 : vector<1x4x1xf32> to vector<1x4x256xf32>
    %249 = vector.broadcast %247 : vector<1x1x256xf32> to vector<1x4x256xf32>
    %250 = arith.mulf %248, %249 : vector<1x4x256xf32>
    %251 = arith.addf %244, %250 : vector<1x4x256xf32>
    %252 = vector.extract_strided_slice %201 {offsets = [0, 7], sizes = [4, 1], strides = [1, 1]} : vector<4x12xf32> to vector<4x1xf32>
    %253 = vector.shape_cast %252 : vector<4x1xf32> to vector<1x4x1xf32>
    %254 = vector.extract_strided_slice %198 {offsets = [0, 3, 0], sizes = [1, 1, 256], strides = [1, 1, 1]} : vector<1x4x256xf32> to vector<1x1x256xf32>
    %255 = vector.broadcast %253 : vector<1x4x1xf32> to vector<1x4x256xf32>
    %256 = vector.broadcast %254 : vector<1x1x256xf32> to vector<1x4x256xf32>
    %257 = arith.mulf %255, %256 : vector<1x4x256xf32>
    %258 = arith.addf %251, %257 : vector<1x4x256xf32>
    %259 = vector.extract_strided_slice %201 {offsets = [0, 8], sizes = [4, 1], strides = [1, 1]} : vector<4x12xf32> to vector<4x1xf32>
    %260 = vector.shape_cast %259 : vector<4x1xf32> to vector<1x4x1xf32>
    %261 = vector.extract_strided_slice %199 {offsets = [0, 0, 0], sizes = [1, 1, 256], strides = [1, 1, 1]} : vector<1x4x256xf32> to vector<1x1x256xf32>
    %262 = vector.broadcast %260 : vector<1x4x1xf32> to vector<1x4x256xf32>
    %263 = vector.broadcast %261 : vector<1x1x256xf32> to vector<1x4x256xf32>
    %264 = arith.mulf %262, %263 : vector<1x4x256xf32>
    %265 = arith.addf %258, %264 : vector<1x4x256xf32>
    %266 = vector.extract_strided_slice %201 {offsets = [0, 9], sizes = [4, 1], strides = [1, 1]} : vector<4x12xf32> to vector<4x1xf32>
    %267 = vector.shape_cast %266 : vector<4x1xf32> to vector<1x4x1xf32>
    %268 = vector.extract_strided_slice %199 {offsets = [0, 1, 0], sizes = [1, 1, 256], strides = [1, 1, 1]} : vector<1x4x256xf32> to vector<1x1x256xf32>
    %269 = vector.broadcast %267 : vector<1x4x1xf32> to vector<1x4x256xf32>
    %270 = vector.broadcast %268 : vector<1x1x256xf32> to vector<1x4x256xf32>
    %271 = arith.mulf %269, %270 : vector<1x4x256xf32>
    %272 = arith.addf %265, %271 : vector<1x4x256xf32>
    %273 = vector.extract_strided_slice %201 {offsets = [0, 10], sizes = [4, 1], strides = [1, 1]} : vector<4x12xf32> to vector<4x1xf32>
    %274 = vector.shape_cast %273 : vector<4x1xf32> to vector<1x4x1xf32>
    %275 = vector.extract_strided_slice %199 {offsets = [0, 2, 0], sizes = [1, 1, 256], strides = [1, 1, 1]} : vector<1x4x256xf32> to vector<1x1x256xf32>
    %276 = vector.broadcast %274 : vector<1x4x1xf32> to vector<1x4x256xf32>
    %277 = vector.broadcast %275 : vector<1x1x256xf32> to vector<1x4x256xf32>
    %278 = arith.mulf %276, %277 : vector<1x4x256xf32>
    %279 = arith.addf %272, %278 : vector<1x4x256xf32>
    %280 = vector.extract_strided_slice %201 {offsets = [0, 11], sizes = [4, 1], strides = [1, 1]} : vector<4x12xf32> to vector<4x1xf32>
    %281 = vector.shape_cast %280 : vector<4x1xf32> to vector<1x4x1xf32>
    %282 = vector.extract_strided_slice %199 {offsets = [0, 3, 0], sizes = [1, 1, 256], strides = [1, 1, 1]} : vector<1x4x256xf32> to vector<1x1x256xf32>
    %283 = vector.broadcast %281 : vector<1x4x1xf32> to vector<1x4x256xf32>
    %284 = vector.broadcast %282 : vector<1x1x256xf32> to vector<1x4x256xf32>
    %285 = arith.mulf %283, %284 : vector<1x4x256xf32>
    %286 = arith.addf %279, %285 : vector<1x4x256xf32>
    %cst_37 = arith.constant dense<0.000000e+00> : vector<4x256xf32>
    %287 = vector.multi_reduction <add>, %286, %cst_37 [0] : vector<1x4x256xf32> to vector<4x256xf32>
    %cst_38 = arith.constant dense<0.000000e+00> : vector<4xf32>
    %288 = vector.multi_reduction <add>, %287, %cst_38 [1] : vector<4x256xf32> to vector<4xf32>
    %289 = vector.shape_cast %288 : vector<4xf32> to vector<4x1xf32>
    %290 = arith.mulf %286, %286 : vector<1x4x256xf32>
    %cst_39 = arith.constant dense<0.000000e+00> : vector<4x256xf32>
    %291 = vector.multi_reduction <add>, %290, %cst_39 [0] : vector<1x4x256xf32> to vector<4x256xf32>
    %cst_40 = arith.constant dense<0.000000e+00> : vector<4xf32>
    %292 = vector.multi_reduction <add>, %291, %cst_40 [1] : vector<4x256xf32> to vector<4xf32>
    %293 = vector.shape_cast %292 : vector<4xf32> to vector<4x1xf32>
    %c0_41 = arith.constant 0 : index
    %c0_42 = arith.constant 0 : index
    %c0_43 = arith.constant 0 : index
    %294 = vector.load %arg1[%c0_41, %c0_42, %c0_43] : memref<1x4x292xf32, #tpu.memory_space<vmem>>, vector<1x4x256xf32>
    %c0_44 = arith.constant 0 : index
    %c0_45 = arith.constant 0 : index
    %c18_46 = arith.constant 18 : index
    %295 = vector.load %arg1[%c0_44, %c0_45, %c18_46] : memref<1x4x292xf32, #tpu.memory_space<vmem>>, vector<1x4x256xf32>
    %c0_47 = arith.constant 0 : index
    %c0_48 = arith.constant 0 : index
    %c36 = arith.constant 36 : index
    %296 = vector.load %arg1[%c0_47, %c0_48, %c36] : memref<1x4x292xf32, #tpu.memory_space<vmem>>, vector<1x4x256xf32>
    %c3 = arith.constant 3 : index
    %c0_49 = arith.constant 0 : index
    %c0_50 = arith.constant 0 : index
    %297 = vector.load %arg2[%c3, %c0_49, %c0_50] : memref<4x4x12xf32, #tpu.memory_space<vmem>>, vector<1x4x12xf32>
    %298 = vector.shape_cast %297 : vector<1x4x12xf32> to vector<4x12xf32>
    %cst_51 = arith.constant 0.000000e+00 : f32
    %299 = vector.broadcast %cst_51 : f32 to vector<1x4x256xf32>
    %300 = vector.extract_strided_slice %298 {offsets = [0, 0], sizes = [4, 1], strides = [1, 1]} : vector<4x12xf32> to vector<4x1xf32>
    %301 = vector.shape_cast %300 : vector<4x1xf32> to vector<1x4x1xf32>
    %302 = vector.extract_strided_slice %294 {offsets = [0, 0, 0], sizes = [1, 1, 256], strides = [1, 1, 1]} : vector<1x4x256xf32> to vector<1x1x256xf32>
    %303 = vector.broadcast %301 : vector<1x4x1xf32> to vector<1x4x256xf32>
    %304 = vector.broadcast %302 : vector<1x1x256xf32> to vector<1x4x256xf32>
    %305 = arith.mulf %303, %304 : vector<1x4x256xf32>
    %306 = arith.addf %299, %305 : vector<1x4x256xf32>
    %307 = vector.extract_strided_slice %298 {offsets = [0, 1], sizes = [4, 1], strides = [1, 1]} : vector<4x12xf32> to vector<4x1xf32>
    %308 = vector.shape_cast %307 : vector<4x1xf32> to vector<1x4x1xf32>
    %309 = vector.extract_strided_slice %294 {offsets = [0, 1, 0], sizes = [1, 1, 256], strides = [1, 1, 1]} : vector<1x4x256xf32> to vector<1x1x256xf32>
    %310 = vector.broadcast %308 : vector<1x4x1xf32> to vector<1x4x256xf32>
    %311 = vector.broadcast %309 : vector<1x1x256xf32> to vector<1x4x256xf32>
    %312 = arith.mulf %310, %311 : vector<1x4x256xf32>
    %313 = arith.addf %306, %312 : vector<1x4x256xf32>
    %314 = vector.extract_strided_slice %298 {offsets = [0, 2], sizes = [4, 1], strides = [1, 1]} : vector<4x12xf32> to vector<4x1xf32>
    %315 = vector.shape_cast %314 : vector<4x1xf32> to vector<1x4x1xf32>
    %316 = vector.extract_strided_slice %294 {offsets = [0, 2, 0], sizes = [1, 1, 256], strides = [1, 1, 1]} : vector<1x4x256xf32> to vector<1x1x256xf32>
    %317 = vector.broadcast %315 : vector<1x4x1xf32> to vector<1x4x256xf32>
    %318 = vector.broadcast %316 : vector<1x1x256xf32> to vector<1x4x256xf32>
    %319 = arith.mulf %317, %318 : vector<1x4x256xf32>
    %320 = arith.addf %313, %319 : vector<1x4x256xf32>
    %321 = vector.extract_strided_slice %298 {offsets = [0, 3], sizes = [4, 1], strides = [1, 1]} : vector<4x12xf32> to vector<4x1xf32>
    %322 = vector.shape_cast %321 : vector<4x1xf32> to vector<1x4x1xf32>
    %323 = vector.extract_strided_slice %294 {offsets = [0, 3, 0], sizes = [1, 1, 256], strides = [1, 1, 1]} : vector<1x4x256xf32> to vector<1x1x256xf32>
    %324 = vector.broadcast %322 : vector<1x4x1xf32> to vector<1x4x256xf32>
    %325 = vector.broadcast %323 : vector<1x1x256xf32> to vector<1x4x256xf32>
    %326 = arith.mulf %324, %325 : vector<1x4x256xf32>
    %327 = arith.addf %320, %326 : vector<1x4x256xf32>
    %328 = vector.extract_strided_slice %298 {offsets = [0, 4], sizes = [4, 1], strides = [1, 1]} : vector<4x12xf32> to vector<4x1xf32>
    %329 = vector.shape_cast %328 : vector<4x1xf32> to vector<1x4x1xf32>
    %330 = vector.extract_strided_slice %295 {offsets = [0, 0, 0], sizes = [1, 1, 256], strides = [1, 1, 1]} : vector<1x4x256xf32> to vector<1x1x256xf32>
    %331 = vector.broadcast %329 : vector<1x4x1xf32> to vector<1x4x256xf32>
    %332 = vector.broadcast %330 : vector<1x1x256xf32> to vector<1x4x256xf32>
    %333 = arith.mulf %331, %332 : vector<1x4x256xf32>
    %334 = arith.addf %327, %333 : vector<1x4x256xf32>
    %335 = vector.extract_strided_slice %298 {offsets = [0, 5], sizes = [4, 1], strides = [1, 1]} : vector<4x12xf32> to vector<4x1xf32>
    %336 = vector.shape_cast %335 : vector<4x1xf32> to vector<1x4x1xf32>
    %337 = vector.extract_strided_slice %295 {offsets = [0, 1, 0], sizes = [1, 1, 256], strides = [1, 1, 1]} : vector<1x4x256xf32> to vector<1x1x256xf32>
    %338 = vector.broadcast %336 : vector<1x4x1xf32> to vector<1x4x256xf32>
    %339 = vector.broadcast %337 : vector<1x1x256xf32> to vector<1x4x256xf32>
    %340 = arith.mulf %338, %339 : vector<1x4x256xf32>
    %341 = arith.addf %334, %340 : vector<1x4x256xf32>
    %342 = vector.extract_strided_slice %298 {offsets = [0, 6], sizes = [4, 1], strides = [1, 1]} : vector<4x12xf32> to vector<4x1xf32>
    %343 = vector.shape_cast %342 : vector<4x1xf32> to vector<1x4x1xf32>
    %344 = vector.extract_strided_slice %295 {offsets = [0, 2, 0], sizes = [1, 1, 256], strides = [1, 1, 1]} : vector<1x4x256xf32> to vector<1x1x256xf32>
    %345 = vector.broadcast %343 : vector<1x4x1xf32> to vector<1x4x256xf32>
    %346 = vector.broadcast %344 : vector<1x1x256xf32> to vector<1x4x256xf32>
    %347 = arith.mulf %345, %346 : vector<1x4x256xf32>
    %348 = arith.addf %341, %347 : vector<1x4x256xf32>
    %349 = vector.extract_strided_slice %298 {offsets = [0, 7], sizes = [4, 1], strides = [1, 1]} : vector<4x12xf32> to vector<4x1xf32>
    %350 = vector.shape_cast %349 : vector<4x1xf32> to vector<1x4x1xf32>
    %351 = vector.extract_strided_slice %295 {offsets = [0, 3, 0], sizes = [1, 1, 256], strides = [1, 1, 1]} : vector<1x4x256xf32> to vector<1x1x256xf32>
    %352 = vector.broadcast %350 : vector<1x4x1xf32> to vector<1x4x256xf32>
    %353 = vector.broadcast %351 : vector<1x1x256xf32> to vector<1x4x256xf32>
    %354 = arith.mulf %352, %353 : vector<1x4x256xf32>
    %355 = arith.addf %348, %354 : vector<1x4x256xf32>
    %356 = vector.extract_strided_slice %298 {offsets = [0, 8], sizes = [4, 1], strides = [1, 1]} : vector<4x12xf32> to vector<4x1xf32>
    %357 = vector.shape_cast %356 : vector<4x1xf32> to vector<1x4x1xf32>
    %358 = vector.extract_strided_slice %296 {offsets = [0, 0, 0], sizes = [1, 1, 256], strides = [1, 1, 1]} : vector<1x4x256xf32> to vector<1x1x256xf32>
    %359 = vector.broadcast %357 : vector<1x4x1xf32> to vector<1x4x256xf32>
    %360 = vector.broadcast %358 : vector<1x1x256xf32> to vector<1x4x256xf32>
    %361 = arith.mulf %359, %360 : vector<1x4x256xf32>
    %362 = arith.addf %355, %361 : vector<1x4x256xf32>
    %363 = vector.extract_strided_slice %298 {offsets = [0, 9], sizes = [4, 1], strides = [1, 1]} : vector<4x12xf32> to vector<4x1xf32>
    %364 = vector.shape_cast %363 : vector<4x1xf32> to vector<1x4x1xf32>
    %365 = vector.extract_strided_slice %296 {offsets = [0, 1, 0], sizes = [1, 1, 256], strides = [1, 1, 1]} : vector<1x4x256xf32> to vector<1x1x256xf32>
    %366 = vector.broadcast %364 : vector<1x4x1xf32> to vector<1x4x256xf32>
    %367 = vector.broadcast %365 : vector<1x1x256xf32> to vector<1x4x256xf32>
    %368 = arith.mulf %366, %367 : vector<1x4x256xf32>
    %369 = arith.addf %362, %368 : vector<1x4x256xf32>
    %370 = vector.extract_strided_slice %298 {offsets = [0, 10], sizes = [4, 1], strides = [1, 1]} : vector<4x12xf32> to vector<4x1xf32>
    %371 = vector.shape_cast %370 : vector<4x1xf32> to vector<1x4x1xf32>
    %372 = vector.extract_strided_slice %296 {offsets = [0, 2, 0], sizes = [1, 1, 256], strides = [1, 1, 1]} : vector<1x4x256xf32> to vector<1x1x256xf32>
    %373 = vector.broadcast %371 : vector<1x4x1xf32> to vector<1x4x256xf32>
    %374 = vector.broadcast %372 : vector<1x1x256xf32> to vector<1x4x256xf32>
    %375 = arith.mulf %373, %374 : vector<1x4x256xf32>
    %376 = arith.addf %369, %375 : vector<1x4x256xf32>
    %377 = vector.extract_strided_slice %298 {offsets = [0, 11], sizes = [4, 1], strides = [1, 1]} : vector<4x12xf32> to vector<4x1xf32>
    %378 = vector.shape_cast %377 : vector<4x1xf32> to vector<1x4x1xf32>
    %379 = vector.extract_strided_slice %296 {offsets = [0, 3, 0], sizes = [1, 1, 256], strides = [1, 1, 1]} : vector<1x4x256xf32> to vector<1x1x256xf32>
    %380 = vector.broadcast %378 : vector<1x4x1xf32> to vector<1x4x256xf32>
    %381 = vector.broadcast %379 : vector<1x1x256xf32> to vector<1x4x256xf32>
    %382 = arith.mulf %380, %381 : vector<1x4x256xf32>
    %383 = arith.addf %376, %382 : vector<1x4x256xf32>
    %cst_52 = arith.constant dense<0.000000e+00> : vector<4x256xf32>
    %384 = vector.multi_reduction <add>, %383, %cst_52 [0] : vector<1x4x256xf32> to vector<4x256xf32>
    %cst_53 = arith.constant dense<0.000000e+00> : vector<4xf32>
    %385 = vector.multi_reduction <add>, %384, %cst_53 [1] : vector<4x256xf32> to vector<4xf32>
    %386 = vector.shape_cast %385 : vector<4xf32> to vector<4x1xf32>
    %387 = arith.mulf %383, %383 : vector<1x4x256xf32>
    %cst_54 = arith.constant dense<0.000000e+00> : vector<4x256xf32>
    %388 = vector.multi_reduction <add>, %387, %cst_54 [0] : vector<1x4x256xf32> to vector<4x256xf32>
    %cst_55 = arith.constant dense<0.000000e+00> : vector<4xf32>
    %389 = vector.multi_reduction <add>, %388, %cst_55 [1] : vector<4x256xf32> to vector<4xf32>
    %390 = vector.shape_cast %389 : vector<4xf32> to vector<4x1xf32>
    %c0_56 = arith.constant 0 : index
    %c0_57 = arith.constant 0 : index
    %391 = vector.load %arg3[%c0_56, %c0_57] : memref<16x1xf32, #tpu.memory_space<vmem>>, vector<16x1xf32>
    %392 = tpu.concatenate %95, %192, %289, %386 in 0 : vector<4x1xf32>, vector<4x1xf32>, vector<4x1xf32>, vector<4x1xf32> -> vector<16x1xf32>
    %393 = arith.addf %391, %392 : vector<16x1xf32>
    %c0_58 = arith.constant 0 : index
    %c0_59 = arith.constant 0 : index
    %394 = vector.load %arg3[%c0_58, %c0_59] : memref<16x1xf32, #tpu.memory_space<vmem>>, vector<16x1xf32>
    tpu.vector_store %arg3[%c0_58, %c0_59], %393 {strides = array<i32>} : memref<16x1xf32, #tpu.memory_space<vmem>>, vector<16x1xf32>,
    %c0_60 = arith.constant 0 : index
    %c0_61 = arith.constant 0 : index
    %395 = vector.load %arg4[%c0_60, %c0_61] : memref<16x1xf32, #tpu.memory_space<vmem>>, vector<16x1xf32>
    %396 = tpu.concatenate %99, %196, %293, %390 in 0 : vector<4x1xf32>, vector<4x1xf32>, vector<4x1xf32>, vector<4x1xf32> -> vector<16x1xf32>
    %397 = arith.addf %395, %396 : vector<16x1xf32>
    %c0_62 = arith.constant 0 : index
    %c0_63 = arith.constant 0 : index
    %398 = vector.load %arg4[%c0_62, %c0_63] : memref<16x1xf32, #tpu.memory_space<vmem>>, vector<16x1xf32>
    tpu.vector_store %arg4[%c0_62, %c0_63], %397 {strides = array<i32>} : memref<16x1xf32, #tpu.memory_space<vmem>>, vector<16x1xf32>,
    return
  }
  func.func @transform_0(%arg0: i32) -> (i32, i32, i32) {
    %c0_i32 = arith.constant 0 : i32
    %c0_i32_0 = arith.constant 0 : i32
    %c0_i32_1 = arith.constant 0 : i32
    return %arg0, %c0_i32, %c0_i32_0 : i32, i32, i32
  }
  func.func @transform_1(%arg0: i32) -> (i32, i32, i32) {
    %c0_i32 = arith.constant 0 : i32
    %c0_i32_0 = arith.constant 0 : i32
    %c0_i32_1 = arith.constant 0 : i32
    %c0_i32_2 = arith.constant 0 : i32
    return %c0_i32, %c0_i32_0, %c0_i32_1 : i32, i32, i32
  }
  func.func @transform_2(%arg0: i32) -> (i32, i32) {
    %c0_i32 = arith.constant 0 : i32
    %c0_i32_0 = arith.constant 0 : i32
    %c0_i32_1 = arith.constant 0 : i32
    return %c0_i32, %c0_i32_0 : i32, i32
  }
  func.func @transform_3(%arg0: i32) -> (i32, i32) {
    %c0_i32 = arith.constant 0 : i32
    %c0_i32_0 = arith.constant 0 : i32
    %c0_i32_1 = arith.constant 0 : i32
    return %c0_i32, %c0_i32_0 : i32, i32
  }
}

module attributes {stable_mosaic.version = 11 : i64} {
  func.func @_apply_kernel(%arg0: i32, %arg1: memref<1x4x292xf32, #tpu.memory_space<vmem>>, %arg2: memref<4x4x12xf32, #tpu.memory_space<vmem>>, %arg3: memref<16x1xf32, #tpu.memory_space<vmem>>, %arg4: memref<16x1xf32, #tpu.memory_space<vmem>>, %arg5: memref<1x16x256xf32, #tpu.memory_space<vmem>>) attributes {dimension_semantics = [#tpu.dimension_semantics<parallel>], iteration_bounds = array<i64: 2>, scalar_prefetch = 0 : i64, scratch_operands = 0 : i64, tpu.core_type = #tpu.core_type<tc>, window_params = [{transform_indices = @transform_0, window_bounds = array<i64: 1, 4, 292>}, {pipeline_mode = #tpu.pipeline_mode<synchronous>, transform_indices = @transform_1, window_bounds = array<i64: 4, 4, 12>}, {pipeline_mode = #tpu.pipeline_mode<synchronous>, transform_indices = @transform_2, window_bounds = array<i64: 16, 1>}, {pipeline_mode = #tpu.pipeline_mode<synchronous>, transform_indices = @transform_3, window_bounds = array<i64: 16, 1>}, {transform_indices = @transform_4, window_bounds = array<i64: 1, 16, 256>}]} {
    %c0 = arith.constant 0 : index
    %c0_0 = arith.constant 0 : index
    %c17 = arith.constant 17 : index
    %0 = vector.load %arg1[%c0, %c0_0, %c17] : memref<1x4x292xf32, #tpu.memory_space<vmem>>, vector<1x4x256xf32>
    %c0_1 = arith.constant 0 : index
    %c0_2 = arith.constant 0 : index
    %c18 = arith.constant 18 : index
    %1 = vector.load %arg1[%c0_1, %c0_2, %c18] : memref<1x4x292xf32, #tpu.memory_space<vmem>>, vector<1x4x256xf32>
    %c0_3 = arith.constant 0 : index
    %c0_4 = arith.constant 0 : index
    %c19 = arith.constant 19 : index
    %2 = vector.load %arg1[%c0_3, %c0_4, %c19] : memref<1x4x292xf32, #tpu.memory_space<vmem>>, vector<1x4x256xf32>
    %c0_5 = arith.constant 0 : index
    %c0_6 = arith.constant 0 : index
    %c0_7 = arith.constant 0 : index
    %3 = vector.load %arg2[%c0_5, %c0_6, %c0_7] : memref<4x4x12xf32, #tpu.memory_space<vmem>>, vector<1x4x12xf32>
    %4 = vector.shape_cast %3 : vector<1x4x12xf32> to vector<4x12xf32>
    %cst = arith.constant 0.000000e+00 : f32
    %5 = vector.broadcast %cst : f32 to vector<1x4x256xf32>
    %6 = vector.extract_strided_slice %4 {offsets = [0, 0], sizes = [4, 1], strides = [1, 1]} : vector<4x12xf32> to vector<4x1xf32>
    %7 = vector.shape_cast %6 : vector<4x1xf32> to vector<1x4x1xf32>
    %8 = vector.extract_strided_slice %0 {offsets = [0, 0, 0], sizes = [1, 1, 256], strides = [1, 1, 1]} : vector<1x4x256xf32> to vector<1x1x256xf32>
    %9 = vector.broadcast %7 : vector<1x4x1xf32> to vector<1x4x256xf32>
    %10 = vector.broadcast %8 : vector<1x1x256xf32> to vector<1x4x256xf32>
    %11 = arith.mulf %9, %10 : vector<1x4x256xf32>
    %12 = arith.addf %5, %11 : vector<1x4x256xf32>
    %13 = vector.extract_strided_slice %4 {offsets = [0, 1], sizes = [4, 1], strides = [1, 1]} : vector<4x12xf32> to vector<4x1xf32>
    %14 = vector.shape_cast %13 : vector<4x1xf32> to vector<1x4x1xf32>
    %15 = vector.extract_strided_slice %0 {offsets = [0, 1, 0], sizes = [1, 1, 256], strides = [1, 1, 1]} : vector<1x4x256xf32> to vector<1x1x256xf32>
    %16 = vector.broadcast %14 : vector<1x4x1xf32> to vector<1x4x256xf32>
    %17 = vector.broadcast %15 : vector<1x1x256xf32> to vector<1x4x256xf32>
    %18 = arith.mulf %16, %17 : vector<1x4x256xf32>
    %19 = arith.addf %12, %18 : vector<1x4x256xf32>
    %20 = vector.extract_strided_slice %4 {offsets = [0, 2], sizes = [4, 1], strides = [1, 1]} : vector<4x12xf32> to vector<4x1xf32>
    %21 = vector.shape_cast %20 : vector<4x1xf32> to vector<1x4x1xf32>
    %22 = vector.extract_strided_slice %0 {offsets = [0, 2, 0], sizes = [1, 1, 256], strides = [1, 1, 1]} : vector<1x4x256xf32> to vector<1x1x256xf32>
    %23 = vector.broadcast %21 : vector<1x4x1xf32> to vector<1x4x256xf32>
    %24 = vector.broadcast %22 : vector<1x1x256xf32> to vector<1x4x256xf32>
    %25 = arith.mulf %23, %24 : vector<1x4x256xf32>
    %26 = arith.addf %19, %25 : vector<1x4x256xf32>
    %27 = vector.extract_strided_slice %4 {offsets = [0, 3], sizes = [4, 1], strides = [1, 1]} : vector<4x12xf32> to vector<4x1xf32>
    %28 = vector.shape_cast %27 : vector<4x1xf32> to vector<1x4x1xf32>
    %29 = vector.extract_strided_slice %0 {offsets = [0, 3, 0], sizes = [1, 1, 256], strides = [1, 1, 1]} : vector<1x4x256xf32> to vector<1x1x256xf32>
    %30 = vector.broadcast %28 : vector<1x4x1xf32> to vector<1x4x256xf32>
    %31 = vector.broadcast %29 : vector<1x1x256xf32> to vector<1x4x256xf32>
    %32 = arith.mulf %30, %31 : vector<1x4x256xf32>
    %33 = arith.addf %26, %32 : vector<1x4x256xf32>
    %34 = vector.extract_strided_slice %4 {offsets = [0, 4], sizes = [4, 1], strides = [1, 1]} : vector<4x12xf32> to vector<4x1xf32>
    %35 = vector.shape_cast %34 : vector<4x1xf32> to vector<1x4x1xf32>
    %36 = vector.extract_strided_slice %1 {offsets = [0, 0, 0], sizes = [1, 1, 256], strides = [1, 1, 1]} : vector<1x4x256xf32> to vector<1x1x256xf32>
    %37 = vector.broadcast %35 : vector<1x4x1xf32> to vector<1x4x256xf32>
    %38 = vector.broadcast %36 : vector<1x1x256xf32> to vector<1x4x256xf32>
    %39 = arith.mulf %37, %38 : vector<1x4x256xf32>
    %40 = arith.addf %33, %39 : vector<1x4x256xf32>
    %41 = vector.extract_strided_slice %4 {offsets = [0, 5], sizes = [4, 1], strides = [1, 1]} : vector<4x12xf32> to vector<4x1xf32>
    %42 = vector.shape_cast %41 : vector<4x1xf32> to vector<1x4x1xf32>
    %43 = vector.extract_strided_slice %1 {offsets = [0, 1, 0], sizes = [1, 1, 256], strides = [1, 1, 1]} : vector<1x4x256xf32> to vector<1x1x256xf32>
    %44 = vector.broadcast %42 : vector<1x4x1xf32> to vector<1x4x256xf32>
    %45 = vector.broadcast %43 : vector<1x1x256xf32> to vector<1x4x256xf32>
    %46 = arith.mulf %44, %45 : vector<1x4x256xf32>
    %47 = arith.addf %40, %46 : vector<1x4x256xf32>
    %48 = vector.extract_strided_slice %4 {offsets = [0, 6], sizes = [4, 1], strides = [1, 1]} : vector<4x12xf32> to vector<4x1xf32>
    %49 = vector.shape_cast %48 : vector<4x1xf32> to vector<1x4x1xf32>
    %50 = vector.extract_strided_slice %1 {offsets = [0, 2, 0], sizes = [1, 1, 256], strides = [1, 1, 1]} : vector<1x4x256xf32> to vector<1x1x256xf32>
    %51 = vector.broadcast %49 : vector<1x4x1xf32> to vector<1x4x256xf32>
    %52 = vector.broadcast %50 : vector<1x1x256xf32> to vector<1x4x256xf32>
    %53 = arith.mulf %51, %52 : vector<1x4x256xf32>
    %54 = arith.addf %47, %53 : vector<1x4x256xf32>
    %55 = vector.extract_strided_slice %4 {offsets = [0, 7], sizes = [4, 1], strides = [1, 1]} : vector<4x12xf32> to vector<4x1xf32>
    %56 = vector.shape_cast %55 : vector<4x1xf32> to vector<1x4x1xf32>
    %57 = vector.extract_strided_slice %1 {offsets = [0, 3, 0], sizes = [1, 1, 256], strides = [1, 1, 1]} : vector<1x4x256xf32> to vector<1x1x256xf32>
    %58 = vector.broadcast %56 : vector<1x4x1xf32> to vector<1x4x256xf32>
    %59 = vector.broadcast %57 : vector<1x1x256xf32> to vector<1x4x256xf32>
    %60 = arith.mulf %58, %59 : vector<1x4x256xf32>
    %61 = arith.addf %54, %60 : vector<1x4x256xf32>
    %62 = vector.extract_strided_slice %4 {offsets = [0, 8], sizes = [4, 1], strides = [1, 1]} : vector<4x12xf32> to vector<4x1xf32>
    %63 = vector.shape_cast %62 : vector<4x1xf32> to vector<1x4x1xf32>
    %64 = vector.extract_strided_slice %2 {offsets = [0, 0, 0], sizes = [1, 1, 256], strides = [1, 1, 1]} : vector<1x4x256xf32> to vector<1x1x256xf32>
    %65 = vector.broadcast %63 : vector<1x4x1xf32> to vector<1x4x256xf32>
    %66 = vector.broadcast %64 : vector<1x1x256xf32> to vector<1x4x256xf32>
    %67 = arith.mulf %65, %66 : vector<1x4x256xf32>
    %68 = arith.addf %61, %67 : vector<1x4x256xf32>
    %69 = vector.extract_strided_slice %4 {offsets = [0, 9], sizes = [4, 1], strides = [1, 1]} : vector<4x12xf32> to vector<4x1xf32>
    %70 = vector.shape_cast %69 : vector<4x1xf32> to vector<1x4x1xf32>
    %71 = vector.extract_strided_slice %2 {offsets = [0, 1, 0], sizes = [1, 1, 256], strides = [1, 1, 1]} : vector<1x4x256xf32> to vector<1x1x256xf32>
    %72 = vector.broadcast %70 : vector<1x4x1xf32> to vector<1x4x256xf32>
    %73 = vector.broadcast %71 : vector<1x1x256xf32> to vector<1x4x256xf32>
    %74 = arith.mulf %72, %73 : vector<1x4x256xf32>
    %75 = arith.addf %68, %74 : vector<1x4x256xf32>
    %76 = vector.extract_strided_slice %4 {offsets = [0, 10], sizes = [4, 1], strides = [1, 1]} : vector<4x12xf32> to vector<4x1xf32>
    %77 = vector.shape_cast %76 : vector<4x1xf32> to vector<1x4x1xf32>
    %78 = vector.extract_strided_slice %2 {offsets = [0, 2, 0], sizes = [1, 1, 256], strides = [1, 1, 1]} : vector<1x4x256xf32> to vector<1x1x256xf32>
    %79 = vector.broadcast %77 : vector<1x4x1xf32> to vector<1x4x256xf32>
    %80 = vector.broadcast %78 : vector<1x1x256xf32> to vector<1x4x256xf32>
    %81 = arith.mulf %79, %80 : vector<1x4x256xf32>
    %82 = arith.addf %75, %81 : vector<1x4x256xf32>
    %83 = vector.extract_strided_slice %4 {offsets = [0, 11], sizes = [4, 1], strides = [1, 1]} : vector<4x12xf32> to vector<4x1xf32>
    %84 = vector.shape_cast %83 : vector<4x1xf32> to vector<1x4x1xf32>
    %85 = vector.extract_strided_slice %2 {offsets = [0, 3, 0], sizes = [1, 1, 256], strides = [1, 1, 1]} : vector<1x4x256xf32> to vector<1x1x256xf32>
    %86 = vector.broadcast %84 : vector<1x4x1xf32> to vector<1x4x256xf32>
    %87 = vector.broadcast %85 : vector<1x1x256xf32> to vector<1x4x256xf32>
    %88 = arith.mulf %86, %87 : vector<1x4x256xf32>
    %89 = arith.addf %82, %88 : vector<1x4x256xf32>
    %c0_8 = arith.constant 0 : index
    %c0_9 = arith.constant 0 : index
    %90 = vector.load %arg3[%c0_8, %c0_9] : memref<16x1xf32, #tpu.memory_space<vmem>>, vector<4x1xf32>
    %91 = vector.shape_cast %90 : vector<4x1xf32> to vector<1x4x1xf32>
    %c0_10 = arith.constant 0 : index
    %c0_11 = arith.constant 0 : index
    %92 = vector.load %arg4[%c0_10, %c0_11] : memref<16x1xf32, #tpu.memory_space<vmem>>, vector<4x1xf32>
    %93 = vector.shape_cast %92 : vector<4x1xf32> to vector<1x4x1xf32>
    %94 = vector.broadcast %91 : vector<1x4x1xf32> to vector<1x4x256xf32>
    %95 = arith.mulf %89, %94 : vector<1x4x256xf32>
    %96 = vector.broadcast %93 : vector<1x4x1xf32> to vector<1x4x256xf32>
    %97 = arith.addf %95, %96 : vector<1x4x256xf32>
    %cst_12 = arith.constant 0.000000e+00 : f32
    %98 = vector.broadcast %cst_12 : f32 to vector<1x4x256xf32>
    %99 = arith.maximumf %97, %98 : vector<1x4x256xf32>
    %c0_13 = arith.constant 0 : index
    %c0_14 = arith.constant 0 : index
    %c0_15 = arith.constant 0 : index
    %100 = vector.load %arg5[%c0_13, %c0_14, %c0_15] : memref<1x16x256xf32, #tpu.memory_space<vmem>>, vector<1x4x256xf32>
    tpu.vector_store %arg5[%c0_13, %c0_14, %c0_15], %99 {strides = array<i32>} : memref<1x16x256xf32, #tpu.memory_space<vmem>>, vector<1x4x256xf32>,
    %c0_16 = arith.constant 0 : index
    %c0_17 = arith.constant 0 : index
    %c12 = arith.constant 12 : index
    %101 = vector.load %arg1[%c0_16, %c0_17, %c12] : memref<1x4x292xf32, #tpu.memory_space<vmem>>, vector<1x4x256xf32>
    %c0_18 = arith.constant 0 : index
    %c0_19 = arith.constant 0 : index
    %c18_20 = arith.constant 18 : index
    %102 = vector.load %arg1[%c0_18, %c0_19, %c18_20] : memref<1x4x292xf32, #tpu.memory_space<vmem>>, vector<1x4x256xf32>
    %c0_21 = arith.constant 0 : index
    %c0_22 = arith.constant 0 : index
    %c24 = arith.constant 24 : index
    %103 = vector.load %arg1[%c0_21, %c0_22, %c24] : memref<1x4x292xf32, #tpu.memory_space<vmem>>, vector<1x4x256xf32>
    %c1 = arith.constant 1 : index
    %c0_23 = arith.constant 0 : index
    %c0_24 = arith.constant 0 : index
    %104 = vector.load %arg2[%c1, %c0_23, %c0_24] : memref<4x4x12xf32, #tpu.memory_space<vmem>>, vector<1x4x12xf32>
    %105 = vector.shape_cast %104 : vector<1x4x12xf32> to vector<4x12xf32>
    %cst_25 = arith.constant 0.000000e+00 : f32
    %106 = vector.broadcast %cst_25 : f32 to vector<1x4x256xf32>
    %107 = vector.extract_strided_slice %105 {offsets = [0, 0], sizes = [4, 1], strides = [1, 1]} : vector<4x12xf32> to vector<4x1xf32>
    %108 = vector.shape_cast %107 : vector<4x1xf32> to vector<1x4x1xf32>
    %109 = vector.extract_strided_slice %101 {offsets = [0, 0, 0], sizes = [1, 1, 256], strides = [1, 1, 1]} : vector<1x4x256xf32> to vector<1x1x256xf32>
    %110 = vector.broadcast %108 : vector<1x4x1xf32> to vector<1x4x256xf32>
    %111 = vector.broadcast %109 : vector<1x1x256xf32> to vector<1x4x256xf32>
    %112 = arith.mulf %110, %111 : vector<1x4x256xf32>
    %113 = arith.addf %106, %112 : vector<1x4x256xf32>
    %114 = vector.extract_strided_slice %105 {offsets = [0, 1], sizes = [4, 1], strides = [1, 1]} : vector<4x12xf32> to vector<4x1xf32>
    %115 = vector.shape_cast %114 : vector<4x1xf32> to vector<1x4x1xf32>
    %116 = vector.extract_strided_slice %101 {offsets = [0, 1, 0], sizes = [1, 1, 256], strides = [1, 1, 1]} : vector<1x4x256xf32> to vector<1x1x256xf32>
    %117 = vector.broadcast %115 : vector<1x4x1xf32> to vector<1x4x256xf32>
    %118 = vector.broadcast %116 : vector<1x1x256xf32> to vector<1x4x256xf32>
    %119 = arith.mulf %117, %118 : vector<1x4x256xf32>
    %120 = arith.addf %113, %119 : vector<1x4x256xf32>
    %121 = vector.extract_strided_slice %105 {offsets = [0, 2], sizes = [4, 1], strides = [1, 1]} : vector<4x12xf32> to vector<4x1xf32>
    %122 = vector.shape_cast %121 : vector<4x1xf32> to vector<1x4x1xf32>
    %123 = vector.extract_strided_slice %101 {offsets = [0, 2, 0], sizes = [1, 1, 256], strides = [1, 1, 1]} : vector<1x4x256xf32> to vector<1x1x256xf32>
    %124 = vector.broadcast %122 : vector<1x4x1xf32> to vector<1x4x256xf32>
    %125 = vector.broadcast %123 : vector<1x1x256xf32> to vector<1x4x256xf32>
    %126 = arith.mulf %124, %125 : vector<1x4x256xf32>
    %127 = arith.addf %120, %126 : vector<1x4x256xf32>
    %128 = vector.extract_strided_slice %105 {offsets = [0, 3], sizes = [4, 1], strides = [1, 1]} : vector<4x12xf32> to vector<4x1xf32>
    %129 = vector.shape_cast %128 : vector<4x1xf32> to vector<1x4x1xf32>
    %130 = vector.extract_strided_slice %101 {offsets = [0, 3, 0], sizes = [1, 1, 256], strides = [1, 1, 1]} : vector<1x4x256xf32> to vector<1x1x256xf32>
    %131 = vector.broadcast %129 : vector<1x4x1xf32> to vector<1x4x256xf32>
    %132 = vector.broadcast %130 : vector<1x1x256xf32> to vector<1x4x256xf32>
    %133 = arith.mulf %131, %132 : vector<1x4x256xf32>
    %134 = arith.addf %127, %133 : vector<1x4x256xf32>
    %135 = vector.extract_strided_slice %105 {offsets = [0, 4], sizes = [4, 1], strides = [1, 1]} : vector<4x12xf32> to vector<4x1xf32>
    %136 = vector.shape_cast %135 : vector<4x1xf32> to vector<1x4x1xf32>
    %137 = vector.extract_strided_slice %102 {offsets = [0, 0, 0], sizes = [1, 1, 256], strides = [1, 1, 1]} : vector<1x4x256xf32> to vector<1x1x256xf32>
    %138 = vector.broadcast %136 : vector<1x4x1xf32> to vector<1x4x256xf32>
    %139 = vector.broadcast %137 : vector<1x1x256xf32> to vector<1x4x256xf32>
    %140 = arith.mulf %138, %139 : vector<1x4x256xf32>
    %141 = arith.addf %134, %140 : vector<1x4x256xf32>
    %142 = vector.extract_strided_slice %105 {offsets = [0, 5], sizes = [4, 1], strides = [1, 1]} : vector<4x12xf32> to vector<4x1xf32>
    %143 = vector.shape_cast %142 : vector<4x1xf32> to vector<1x4x1xf32>
    %144 = vector.extract_strided_slice %102 {offsets = [0, 1, 0], sizes = [1, 1, 256], strides = [1, 1, 1]} : vector<1x4x256xf32> to vector<1x1x256xf32>
    %145 = vector.broadcast %143 : vector<1x4x1xf32> to vector<1x4x256xf32>
    %146 = vector.broadcast %144 : vector<1x1x256xf32> to vector<1x4x256xf32>
    %147 = arith.mulf %145, %146 : vector<1x4x256xf32>
    %148 = arith.addf %141, %147 : vector<1x4x256xf32>
    %149 = vector.extract_strided_slice %105 {offsets = [0, 6], sizes = [4, 1], strides = [1, 1]} : vector<4x12xf32> to vector<4x1xf32>
    %150 = vector.shape_cast %149 : vector<4x1xf32> to vector<1x4x1xf32>
    %151 = vector.extract_strided_slice %102 {offsets = [0, 2, 0], sizes = [1, 1, 256], strides = [1, 1, 1]} : vector<1x4x256xf32> to vector<1x1x256xf32>
    %152 = vector.broadcast %150 : vector<1x4x1xf32> to vector<1x4x256xf32>
    %153 = vector.broadcast %151 : vector<1x1x256xf32> to vector<1x4x256xf32>
    %154 = arith.mulf %152, %153 : vector<1x4x256xf32>
    %155 = arith.addf %148, %154 : vector<1x4x256xf32>
    %156 = vector.extract_strided_slice %105 {offsets = [0, 7], sizes = [4, 1], strides = [1, 1]} : vector<4x12xf32> to vector<4x1xf32>
    %157 = vector.shape_cast %156 : vector<4x1xf32> to vector<1x4x1xf32>
    %158 = vector.extract_strided_slice %102 {offsets = [0, 3, 0], sizes = [1, 1, 256], strides = [1, 1, 1]} : vector<1x4x256xf32> to vector<1x1x256xf32>
    %159 = vector.broadcast %157 : vector<1x4x1xf32> to vector<1x4x256xf32>
    %160 = vector.broadcast %158 : vector<1x1x256xf32> to vector<1x4x256xf32>
    %161 = arith.mulf %159, %160 : vector<1x4x256xf32>
    %162 = arith.addf %155, %161 : vector<1x4x256xf32>
    %163 = vector.extract_strided_slice %105 {offsets = [0, 8], sizes = [4, 1], strides = [1, 1]} : vector<4x12xf32> to vector<4x1xf32>
    %164 = vector.shape_cast %163 : vector<4x1xf32> to vector<1x4x1xf32>
    %165 = vector.extract_strided_slice %103 {offsets = [0, 0, 0], sizes = [1, 1, 256], strides = [1, 1, 1]} : vector<1x4x256xf32> to vector<1x1x256xf32>
    %166 = vector.broadcast %164 : vector<1x4x1xf32> to vector<1x4x256xf32>
    %167 = vector.broadcast %165 : vector<1x1x256xf32> to vector<1x4x256xf32>
    %168 = arith.mulf %166, %167 : vector<1x4x256xf32>
    %169 = arith.addf %162, %168 : vector<1x4x256xf32>
    %170 = vector.extract_strided_slice %105 {offsets = [0, 9], sizes = [4, 1], strides = [1, 1]} : vector<4x12xf32> to vector<4x1xf32>
    %171 = vector.shape_cast %170 : vector<4x1xf32> to vector<1x4x1xf32>
    %172 = vector.extract_strided_slice %103 {offsets = [0, 1, 0], sizes = [1, 1, 256], strides = [1, 1, 1]} : vector<1x4x256xf32> to vector<1x1x256xf32>
    %173 = vector.broadcast %171 : vector<1x4x1xf32> to vector<1x4x256xf32>
    %174 = vector.broadcast %172 : vector<1x1x256xf32> to vector<1x4x256xf32>
    %175 = arith.mulf %173, %174 : vector<1x4x256xf32>
    %176 = arith.addf %169, %175 : vector<1x4x256xf32>
    %177 = vector.extract_strided_slice %105 {offsets = [0, 10], sizes = [4, 1], strides = [1, 1]} : vector<4x12xf32> to vector<4x1xf32>
    %178 = vector.shape_cast %177 : vector<4x1xf32> to vector<1x4x1xf32>
    %179 = vector.extract_strided_slice %103 {offsets = [0, 2, 0], sizes = [1, 1, 256], strides = [1, 1, 1]} : vector<1x4x256xf32> to vector<1x1x256xf32>
    %180 = vector.broadcast %178 : vector<1x4x1xf32> to vector<1x4x256xf32>
    %181 = vector.broadcast %179 : vector<1x1x256xf32> to vector<1x4x256xf32>
    %182 = arith.mulf %180, %181 : vector<1x4x256xf32>
    %183 = arith.addf %176, %182 : vector<1x4x256xf32>
    %184 = vector.extract_strided_slice %105 {offsets = [0, 11], sizes = [4, 1], strides = [1, 1]} : vector<4x12xf32> to vector<4x1xf32>
    %185 = vector.shape_cast %184 : vector<4x1xf32> to vector<1x4x1xf32>
    %186 = vector.extract_strided_slice %103 {offsets = [0, 3, 0], sizes = [1, 1, 256], strides = [1, 1, 1]} : vector<1x4x256xf32> to vector<1x1x256xf32>
    %187 = vector.broadcast %185 : vector<1x4x1xf32> to vector<1x4x256xf32>
    %188 = vector.broadcast %186 : vector<1x1x256xf32> to vector<1x4x256xf32>
    %189 = arith.mulf %187, %188 : vector<1x4x256xf32>
    %190 = arith.addf %183, %189 : vector<1x4x256xf32>
    %c4 = arith.constant 4 : index
    %c0_26 = arith.constant 0 : index
    %191 = vector.load %arg3[%c4, %c0_26] : memref<16x1xf32, #tpu.memory_space<vmem>>, vector<4x1xf32>
    %192 = vector.shape_cast %191 : vector<4x1xf32> to vector<1x4x1xf32>
    %c4_27 = arith.constant 4 : index
    %c0_28 = arith.constant 0 : index
    %193 = vector.load %arg4[%c4_27, %c0_28] : memref<16x1xf32, #tpu.memory_space<vmem>>, vector<4x1xf32>
    %194 = vector.shape_cast %193 : vector<4x1xf32> to vector<1x4x1xf32>
    %195 = vector.broadcast %192 : vector<1x4x1xf32> to vector<1x4x256xf32>
    %196 = arith.mulf %190, %195 : vector<1x4x256xf32>
    %197 = vector.broadcast %194 : vector<1x4x1xf32> to vector<1x4x256xf32>
    %198 = arith.addf %196, %197 : vector<1x4x256xf32>
    %cst_29 = arith.constant 0.000000e+00 : f32
    %199 = vector.broadcast %cst_29 : f32 to vector<1x4x256xf32>
    %200 = arith.maximumf %198, %199 : vector<1x4x256xf32>
    %c0_30 = arith.constant 0 : index
    %c4_31 = arith.constant 4 : index
    %c0_32 = arith.constant 0 : index
    %201 = vector.load %arg5[%c0_30, %c4_31, %c0_32] : memref<1x16x256xf32, #tpu.memory_space<vmem>>, vector<1x4x256xf32>
    tpu.vector_store %arg5[%c0_30, %c4_31, %c0_32], %200 {strides = array<i32>} : memref<1x16x256xf32, #tpu.memory_space<vmem>>, vector<1x4x256xf32>,
    %c0_33 = arith.constant 0 : index
    %c0_34 = arith.constant 0 : index
    %c6 = arith.constant 6 : index
    %202 = vector.load %arg1[%c0_33, %c0_34, %c6] : memref<1x4x292xf32, #tpu.memory_space<vmem>>, vector<1x4x256xf32>
    %c0_35 = arith.constant 0 : index
    %c0_36 = arith.constant 0 : index
    %c18_37 = arith.constant 18 : index
    %203 = vector.load %arg1[%c0_35, %c0_36, %c18_37] : memref<1x4x292xf32, #tpu.memory_space<vmem>>, vector<1x4x256xf32>
    %c0_38 = arith.constant 0 : index
    %c0_39 = arith.constant 0 : index
    %c30 = arith.constant 30 : index
    %204 = vector.load %arg1[%c0_38, %c0_39, %c30] : memref<1x4x292xf32, #tpu.memory_space<vmem>>, vector<1x4x256xf32>
    %c2 = arith.constant 2 : index
    %c0_40 = arith.constant 0 : index
    %c0_41 = arith.constant 0 : index
    %205 = vector.load %arg2[%c2, %c0_40, %c0_41] : memref<4x4x12xf32, #tpu.memory_space<vmem>>, vector<1x4x12xf32>
    %206 = vector.shape_cast %205 : vector<1x4x12xf32> to vector<4x12xf32>
    %cst_42 = arith.constant 0.000000e+00 : f32
    %207 = vector.broadcast %cst_42 : f32 to vector<1x4x256xf32>
    %208 = vector.extract_strided_slice %206 {offsets = [0, 0], sizes = [4, 1], strides = [1, 1]} : vector<4x12xf32> to vector<4x1xf32>
    %209 = vector.shape_cast %208 : vector<4x1xf32> to vector<1x4x1xf32>
    %210 = vector.extract_strided_slice %202 {offsets = [0, 0, 0], sizes = [1, 1, 256], strides = [1, 1, 1]} : vector<1x4x256xf32> to vector<1x1x256xf32>
    %211 = vector.broadcast %209 : vector<1x4x1xf32> to vector<1x4x256xf32>
    %212 = vector.broadcast %210 : vector<1x1x256xf32> to vector<1x4x256xf32>
    %213 = arith.mulf %211, %212 : vector<1x4x256xf32>
    %214 = arith.addf %207, %213 : vector<1x4x256xf32>
    %215 = vector.extract_strided_slice %206 {offsets = [0, 1], sizes = [4, 1], strides = [1, 1]} : vector<4x12xf32> to vector<4x1xf32>
    %216 = vector.shape_cast %215 : vector<4x1xf32> to vector<1x4x1xf32>
    %217 = vector.extract_strided_slice %202 {offsets = [0, 1, 0], sizes = [1, 1, 256], strides = [1, 1, 1]} : vector<1x4x256xf32> to vector<1x1x256xf32>
    %218 = vector.broadcast %216 : vector<1x4x1xf32> to vector<1x4x256xf32>
    %219 = vector.broadcast %217 : vector<1x1x256xf32> to vector<1x4x256xf32>
    %220 = arith.mulf %218, %219 : vector<1x4x256xf32>
    %221 = arith.addf %214, %220 : vector<1x4x256xf32>
    %222 = vector.extract_strided_slice %206 {offsets = [0, 2], sizes = [4, 1], strides = [1, 1]} : vector<4x12xf32> to vector<4x1xf32>
    %223 = vector.shape_cast %222 : vector<4x1xf32> to vector<1x4x1xf32>
    %224 = vector.extract_strided_slice %202 {offsets = [0, 2, 0], sizes = [1, 1, 256], strides = [1, 1, 1]} : vector<1x4x256xf32> to vector<1x1x256xf32>
    %225 = vector.broadcast %223 : vector<1x4x1xf32> to vector<1x4x256xf32>
    %226 = vector.broadcast %224 : vector<1x1x256xf32> to vector<1x4x256xf32>
    %227 = arith.mulf %225, %226 : vector<1x4x256xf32>
    %228 = arith.addf %221, %227 : vector<1x4x256xf32>
    %229 = vector.extract_strided_slice %206 {offsets = [0, 3], sizes = [4, 1], strides = [1, 1]} : vector<4x12xf32> to vector<4x1xf32>
    %230 = vector.shape_cast %229 : vector<4x1xf32> to vector<1x4x1xf32>
    %231 = vector.extract_strided_slice %202 {offsets = [0, 3, 0], sizes = [1, 1, 256], strides = [1, 1, 1]} : vector<1x4x256xf32> to vector<1x1x256xf32>
    %232 = vector.broadcast %230 : vector<1x4x1xf32> to vector<1x4x256xf32>
    %233 = vector.broadcast %231 : vector<1x1x256xf32> to vector<1x4x256xf32>
    %234 = arith.mulf %232, %233 : vector<1x4x256xf32>
    %235 = arith.addf %228, %234 : vector<1x4x256xf32>
    %236 = vector.extract_strided_slice %206 {offsets = [0, 4], sizes = [4, 1], strides = [1, 1]} : vector<4x12xf32> to vector<4x1xf32>
    %237 = vector.shape_cast %236 : vector<4x1xf32> to vector<1x4x1xf32>
    %238 = vector.extract_strided_slice %203 {offsets = [0, 0, 0], sizes = [1, 1, 256], strides = [1, 1, 1]} : vector<1x4x256xf32> to vector<1x1x256xf32>
    %239 = vector.broadcast %237 : vector<1x4x1xf32> to vector<1x4x256xf32>
    %240 = vector.broadcast %238 : vector<1x1x256xf32> to vector<1x4x256xf32>
    %241 = arith.mulf %239, %240 : vector<1x4x256xf32>
    %242 = arith.addf %235, %241 : vector<1x4x256xf32>
    %243 = vector.extract_strided_slice %206 {offsets = [0, 5], sizes = [4, 1], strides = [1, 1]} : vector<4x12xf32> to vector<4x1xf32>
    %244 = vector.shape_cast %243 : vector<4x1xf32> to vector<1x4x1xf32>
    %245 = vector.extract_strided_slice %203 {offsets = [0, 1, 0], sizes = [1, 1, 256], strides = [1, 1, 1]} : vector<1x4x256xf32> to vector<1x1x256xf32>
    %246 = vector.broadcast %244 : vector<1x4x1xf32> to vector<1x4x256xf32>
    %247 = vector.broadcast %245 : vector<1x1x256xf32> to vector<1x4x256xf32>
    %248 = arith.mulf %246, %247 : vector<1x4x256xf32>
    %249 = arith.addf %242, %248 : vector<1x4x256xf32>
    %250 = vector.extract_strided_slice %206 {offsets = [0, 6], sizes = [4, 1], strides = [1, 1]} : vector<4x12xf32> to vector<4x1xf32>
    %251 = vector.shape_cast %250 : vector<4x1xf32> to vector<1x4x1xf32>
    %252 = vector.extract_strided_slice %203 {offsets = [0, 2, 0], sizes = [1, 1, 256], strides = [1, 1, 1]} : vector<1x4x256xf32> to vector<1x1x256xf32>
    %253 = vector.broadcast %251 : vector<1x4x1xf32> to vector<1x4x256xf32>
    %254 = vector.broadcast %252 : vector<1x1x256xf32> to vector<1x4x256xf32>
    %255 = arith.mulf %253, %254 : vector<1x4x256xf32>
    %256 = arith.addf %249, %255 : vector<1x4x256xf32>
    %257 = vector.extract_strided_slice %206 {offsets = [0, 7], sizes = [4, 1], strides = [1, 1]} : vector<4x12xf32> to vector<4x1xf32>
    %258 = vector.shape_cast %257 : vector<4x1xf32> to vector<1x4x1xf32>
    %259 = vector.extract_strided_slice %203 {offsets = [0, 3, 0], sizes = [1, 1, 256], strides = [1, 1, 1]} : vector<1x4x256xf32> to vector<1x1x256xf32>
    %260 = vector.broadcast %258 : vector<1x4x1xf32> to vector<1x4x256xf32>
    %261 = vector.broadcast %259 : vector<1x1x256xf32> to vector<1x4x256xf32>
    %262 = arith.mulf %260, %261 : vector<1x4x256xf32>
    %263 = arith.addf %256, %262 : vector<1x4x256xf32>
    %264 = vector.extract_strided_slice %206 {offsets = [0, 8], sizes = [4, 1], strides = [1, 1]} : vector<4x12xf32> to vector<4x1xf32>
    %265 = vector.shape_cast %264 : vector<4x1xf32> to vector<1x4x1xf32>
    %266 = vector.extract_strided_slice %204 {offsets = [0, 0, 0], sizes = [1, 1, 256], strides = [1, 1, 1]} : vector<1x4x256xf32> to vector<1x1x256xf32>
    %267 = vector.broadcast %265 : vector<1x4x1xf32> to vector<1x4x256xf32>
    %268 = vector.broadcast %266 : vector<1x1x256xf32> to vector<1x4x256xf32>
    %269 = arith.mulf %267, %268 : vector<1x4x256xf32>
    %270 = arith.addf %263, %269 : vector<1x4x256xf32>
    %271 = vector.extract_strided_slice %206 {offsets = [0, 9], sizes = [4, 1], strides = [1, 1]} : vector<4x12xf32> to vector<4x1xf32>
    %272 = vector.shape_cast %271 : vector<4x1xf32> to vector<1x4x1xf32>
    %273 = vector.extract_strided_slice %204 {offsets = [0, 1, 0], sizes = [1, 1, 256], strides = [1, 1, 1]} : vector<1x4x256xf32> to vector<1x1x256xf32>
    %274 = vector.broadcast %272 : vector<1x4x1xf32> to vector<1x4x256xf32>
    %275 = vector.broadcast %273 : vector<1x1x256xf32> to vector<1x4x256xf32>
    %276 = arith.mulf %274, %275 : vector<1x4x256xf32>
    %277 = arith.addf %270, %276 : vector<1x4x256xf32>
    %278 = vector.extract_strided_slice %206 {offsets = [0, 10], sizes = [4, 1], strides = [1, 1]} : vector<4x12xf32> to vector<4x1xf32>
    %279 = vector.shape_cast %278 : vector<4x1xf32> to vector<1x4x1xf32>
    %280 = vector.extract_strided_slice %204 {offsets = [0, 2, 0], sizes = [1, 1, 256], strides = [1, 1, 1]} : vector<1x4x256xf32> to vector<1x1x256xf32>
    %281 = vector.broadcast %279 : vector<1x4x1xf32> to vector<1x4x256xf32>
    %282 = vector.broadcast %280 : vector<1x1x256xf32> to vector<1x4x256xf32>
    %283 = arith.mulf %281, %282 : vector<1x4x256xf32>
    %284 = arith.addf %277, %283 : vector<1x4x256xf32>
    %285 = vector.extract_strided_slice %206 {offsets = [0, 11], sizes = [4, 1], strides = [1, 1]} : vector<4x12xf32> to vector<4x1xf32>
    %286 = vector.shape_cast %285 : vector<4x1xf32> to vector<1x4x1xf32>
    %287 = vector.extract_strided_slice %204 {offsets = [0, 3, 0], sizes = [1, 1, 256], strides = [1, 1, 1]} : vector<1x4x256xf32> to vector<1x1x256xf32>
    %288 = vector.broadcast %286 : vector<1x4x1xf32> to vector<1x4x256xf32>
    %289 = vector.broadcast %287 : vector<1x1x256xf32> to vector<1x4x256xf32>
    %290 = arith.mulf %288, %289 : vector<1x4x256xf32>
    %291 = arith.addf %284, %290 : vector<1x4x256xf32>
    %c8 = arith.constant 8 : index
    %c0_43 = arith.constant 0 : index
    %292 = vector.load %arg3[%c8, %c0_43] : memref<16x1xf32, #tpu.memory_space<vmem>>, vector<4x1xf32>
    %293 = vector.shape_cast %292 : vector<4x1xf32> to vector<1x4x1xf32>
    %c8_44 = arith.constant 8 : index
    %c0_45 = arith.constant 0 : index
    %294 = vector.load %arg4[%c8_44, %c0_45] : memref<16x1xf32, #tpu.memory_space<vmem>>, vector<4x1xf32>
    %295 = vector.shape_cast %294 : vector<4x1xf32> to vector<1x4x1xf32>
    %296 = vector.broadcast %293 : vector<1x4x1xf32> to vector<1x4x256xf32>
    %297 = arith.mulf %291, %296 : vector<1x4x256xf32>
    %298 = vector.broadcast %295 : vector<1x4x1xf32> to vector<1x4x256xf32>
    %299 = arith.addf %297, %298 : vector<1x4x256xf32>
    %cst_46 = arith.constant 0.000000e+00 : f32
    %300 = vector.broadcast %cst_46 : f32 to vector<1x4x256xf32>
    %301 = arith.maximumf %299, %300 : vector<1x4x256xf32>
    %c0_47 = arith.constant 0 : index
    %c8_48 = arith.constant 8 : index
    %c0_49 = arith.constant 0 : index
    %302 = vector.load %arg5[%c0_47, %c8_48, %c0_49] : memref<1x16x256xf32, #tpu.memory_space<vmem>>, vector<1x4x256xf32>
    tpu.vector_store %arg5[%c0_47, %c8_48, %c0_49], %301 {strides = array<i32>} : memref<1x16x256xf32, #tpu.memory_space<vmem>>, vector<1x4x256xf32>,
    %c0_50 = arith.constant 0 : index
    %c0_51 = arith.constant 0 : index
    %c0_52 = arith.constant 0 : index
    %303 = vector.load %arg1[%c0_50, %c0_51, %c0_52] : memref<1x4x292xf32, #tpu.memory_space<vmem>>, vector<1x4x256xf32>
    %c0_53 = arith.constant 0 : index
    %c0_54 = arith.constant 0 : index
    %c18_55 = arith.constant 18 : index
    %304 = vector.load %arg1[%c0_53, %c0_54, %c18_55] : memref<1x4x292xf32, #tpu.memory_space<vmem>>, vector<1x4x256xf32>
    %c0_56 = arith.constant 0 : index
    %c0_57 = arith.constant 0 : index
    %c36 = arith.constant 36 : index
    %305 = vector.load %arg1[%c0_56, %c0_57, %c36] : memref<1x4x292xf32, #tpu.memory_space<vmem>>, vector<1x4x256xf32>
    %c3 = arith.constant 3 : index
    %c0_58 = arith.constant 0 : index
    %c0_59 = arith.constant 0 : index
    %306 = vector.load %arg2[%c3, %c0_58, %c0_59] : memref<4x4x12xf32, #tpu.memory_space<vmem>>, vector<1x4x12xf32>
    %307 = vector.shape_cast %306 : vector<1x4x12xf32> to vector<4x12xf32>
    %cst_60 = arith.constant 0.000000e+00 : f32
    %308 = vector.broadcast %cst_60 : f32 to vector<1x4x256xf32>
    %309 = vector.extract_strided_slice %307 {offsets = [0, 0], sizes = [4, 1], strides = [1, 1]} : vector<4x12xf32> to vector<4x1xf32>
    %310 = vector.shape_cast %309 : vector<4x1xf32> to vector<1x4x1xf32>
    %311 = vector.extract_strided_slice %303 {offsets = [0, 0, 0], sizes = [1, 1, 256], strides = [1, 1, 1]} : vector<1x4x256xf32> to vector<1x1x256xf32>
    %312 = vector.broadcast %310 : vector<1x4x1xf32> to vector<1x4x256xf32>
    %313 = vector.broadcast %311 : vector<1x1x256xf32> to vector<1x4x256xf32>
    %314 = arith.mulf %312, %313 : vector<1x4x256xf32>
    %315 = arith.addf %308, %314 : vector<1x4x256xf32>
    %316 = vector.extract_strided_slice %307 {offsets = [0, 1], sizes = [4, 1], strides = [1, 1]} : vector<4x12xf32> to vector<4x1xf32>
    %317 = vector.shape_cast %316 : vector<4x1xf32> to vector<1x4x1xf32>
    %318 = vector.extract_strided_slice %303 {offsets = [0, 1, 0], sizes = [1, 1, 256], strides = [1, 1, 1]} : vector<1x4x256xf32> to vector<1x1x256xf32>
    %319 = vector.broadcast %317 : vector<1x4x1xf32> to vector<1x4x256xf32>
    %320 = vector.broadcast %318 : vector<1x1x256xf32> to vector<1x4x256xf32>
    %321 = arith.mulf %319, %320 : vector<1x4x256xf32>
    %322 = arith.addf %315, %321 : vector<1x4x256xf32>
    %323 = vector.extract_strided_slice %307 {offsets = [0, 2], sizes = [4, 1], strides = [1, 1]} : vector<4x12xf32> to vector<4x1xf32>
    %324 = vector.shape_cast %323 : vector<4x1xf32> to vector<1x4x1xf32>
    %325 = vector.extract_strided_slice %303 {offsets = [0, 2, 0], sizes = [1, 1, 256], strides = [1, 1, 1]} : vector<1x4x256xf32> to vector<1x1x256xf32>
    %326 = vector.broadcast %324 : vector<1x4x1xf32> to vector<1x4x256xf32>
    %327 = vector.broadcast %325 : vector<1x1x256xf32> to vector<1x4x256xf32>
    %328 = arith.mulf %326, %327 : vector<1x4x256xf32>
    %329 = arith.addf %322, %328 : vector<1x4x256xf32>
    %330 = vector.extract_strided_slice %307 {offsets = [0, 3], sizes = [4, 1], strides = [1, 1]} : vector<4x12xf32> to vector<4x1xf32>
    %331 = vector.shape_cast %330 : vector<4x1xf32> to vector<1x4x1xf32>
    %332 = vector.extract_strided_slice %303 {offsets = [0, 3, 0], sizes = [1, 1, 256], strides = [1, 1, 1]} : vector<1x4x256xf32> to vector<1x1x256xf32>
    %333 = vector.broadcast %331 : vector<1x4x1xf32> to vector<1x4x256xf32>
    %334 = vector.broadcast %332 : vector<1x1x256xf32> to vector<1x4x256xf32>
    %335 = arith.mulf %333, %334 : vector<1x4x256xf32>
    %336 = arith.addf %329, %335 : vector<1x4x256xf32>
    %337 = vector.extract_strided_slice %307 {offsets = [0, 4], sizes = [4, 1], strides = [1, 1]} : vector<4x12xf32> to vector<4x1xf32>
    %338 = vector.shape_cast %337 : vector<4x1xf32> to vector<1x4x1xf32>
    %339 = vector.extract_strided_slice %304 {offsets = [0, 0, 0], sizes = [1, 1, 256], strides = [1, 1, 1]} : vector<1x4x256xf32> to vector<1x1x256xf32>
    %340 = vector.broadcast %338 : vector<1x4x1xf32> to vector<1x4x256xf32>
    %341 = vector.broadcast %339 : vector<1x1x256xf32> to vector<1x4x256xf32>
    %342 = arith.mulf %340, %341 : vector<1x4x256xf32>
    %343 = arith.addf %336, %342 : vector<1x4x256xf32>
    %344 = vector.extract_strided_slice %307 {offsets = [0, 5], sizes = [4, 1], strides = [1, 1]} : vector<4x12xf32> to vector<4x1xf32>
    %345 = vector.shape_cast %344 : vector<4x1xf32> to vector<1x4x1xf32>
    %346 = vector.extract_strided_slice %304 {offsets = [0, 1, 0], sizes = [1, 1, 256], strides = [1, 1, 1]} : vector<1x4x256xf32> to vector<1x1x256xf32>
    %347 = vector.broadcast %345 : vector<1x4x1xf32> to vector<1x4x256xf32>
    %348 = vector.broadcast %346 : vector<1x1x256xf32> to vector<1x4x256xf32>
    %349 = arith.mulf %347, %348 : vector<1x4x256xf32>
    %350 = arith.addf %343, %349 : vector<1x4x256xf32>
    %351 = vector.extract_strided_slice %307 {offsets = [0, 6], sizes = [4, 1], strides = [1, 1]} : vector<4x12xf32> to vector<4x1xf32>
    %352 = vector.shape_cast %351 : vector<4x1xf32> to vector<1x4x1xf32>
    %353 = vector.extract_strided_slice %304 {offsets = [0, 2, 0], sizes = [1, 1, 256], strides = [1, 1, 1]} : vector<1x4x256xf32> to vector<1x1x256xf32>
    %354 = vector.broadcast %352 : vector<1x4x1xf32> to vector<1x4x256xf32>
    %355 = vector.broadcast %353 : vector<1x1x256xf32> to vector<1x4x256xf32>
    %356 = arith.mulf %354, %355 : vector<1x4x256xf32>
    %357 = arith.addf %350, %356 : vector<1x4x256xf32>
    %358 = vector.extract_strided_slice %307 {offsets = [0, 7], sizes = [4, 1], strides = [1, 1]} : vector<4x12xf32> to vector<4x1xf32>
    %359 = vector.shape_cast %358 : vector<4x1xf32> to vector<1x4x1xf32>
    %360 = vector.extract_strided_slice %304 {offsets = [0, 3, 0], sizes = [1, 1, 256], strides = [1, 1, 1]} : vector<1x4x256xf32> to vector<1x1x256xf32>
    %361 = vector.broadcast %359 : vector<1x4x1xf32> to vector<1x4x256xf32>
    %362 = vector.broadcast %360 : vector<1x1x256xf32> to vector<1x4x256xf32>
    %363 = arith.mulf %361, %362 : vector<1x4x256xf32>
    %364 = arith.addf %357, %363 : vector<1x4x256xf32>
    %365 = vector.extract_strided_slice %307 {offsets = [0, 8], sizes = [4, 1], strides = [1, 1]} : vector<4x12xf32> to vector<4x1xf32>
    %366 = vector.shape_cast %365 : vector<4x1xf32> to vector<1x4x1xf32>
    %367 = vector.extract_strided_slice %305 {offsets = [0, 0, 0], sizes = [1, 1, 256], strides = [1, 1, 1]} : vector<1x4x256xf32> to vector<1x1x256xf32>
    %368 = vector.broadcast %366 : vector<1x4x1xf32> to vector<1x4x256xf32>
    %369 = vector.broadcast %367 : vector<1x1x256xf32> to vector<1x4x256xf32>
    %370 = arith.mulf %368, %369 : vector<1x4x256xf32>
    %371 = arith.addf %364, %370 : vector<1x4x256xf32>
    %372 = vector.extract_strided_slice %307 {offsets = [0, 9], sizes = [4, 1], strides = [1, 1]} : vector<4x12xf32> to vector<4x1xf32>
    %373 = vector.shape_cast %372 : vector<4x1xf32> to vector<1x4x1xf32>
    %374 = vector.extract_strided_slice %305 {offsets = [0, 1, 0], sizes = [1, 1, 256], strides = [1, 1, 1]} : vector<1x4x256xf32> to vector<1x1x256xf32>
    %375 = vector.broadcast %373 : vector<1x4x1xf32> to vector<1x4x256xf32>
    %376 = vector.broadcast %374 : vector<1x1x256xf32> to vector<1x4x256xf32>
    %377 = arith.mulf %375, %376 : vector<1x4x256xf32>
    %378 = arith.addf %371, %377 : vector<1x4x256xf32>
    %379 = vector.extract_strided_slice %307 {offsets = [0, 10], sizes = [4, 1], strides = [1, 1]} : vector<4x12xf32> to vector<4x1xf32>
    %380 = vector.shape_cast %379 : vector<4x1xf32> to vector<1x4x1xf32>
    %381 = vector.extract_strided_slice %305 {offsets = [0, 2, 0], sizes = [1, 1, 256], strides = [1, 1, 1]} : vector<1x4x256xf32> to vector<1x1x256xf32>
    %382 = vector.broadcast %380 : vector<1x4x1xf32> to vector<1x4x256xf32>
    %383 = vector.broadcast %381 : vector<1x1x256xf32> to vector<1x4x256xf32>
    %384 = arith.mulf %382, %383 : vector<1x4x256xf32>
    %385 = arith.addf %378, %384 : vector<1x4x256xf32>
    %386 = vector.extract_strided_slice %307 {offsets = [0, 11], sizes = [4, 1], strides = [1, 1]} : vector<4x12xf32> to vector<4x1xf32>
    %387 = vector.shape_cast %386 : vector<4x1xf32> to vector<1x4x1xf32>
    %388 = vector.extract_strided_slice %305 {offsets = [0, 3, 0], sizes = [1, 1, 256], strides = [1, 1, 1]} : vector<1x4x256xf32> to vector<1x1x256xf32>
    %389 = vector.broadcast %387 : vector<1x4x1xf32> to vector<1x4x256xf32>
    %390 = vector.broadcast %388 : vector<1x1x256xf32> to vector<1x4x256xf32>
    %391 = arith.mulf %389, %390 : vector<1x4x256xf32>
    %392 = arith.addf %385, %391 : vector<1x4x256xf32>
    %c12_61 = arith.constant 12 : index
    %c0_62 = arith.constant 0 : index
    %393 = vector.load %arg3[%c12_61, %c0_62] : memref<16x1xf32, #tpu.memory_space<vmem>>, vector<4x1xf32>
    %394 = vector.shape_cast %393 : vector<4x1xf32> to vector<1x4x1xf32>
    %c12_63 = arith.constant 12 : index
    %c0_64 = arith.constant 0 : index
    %395 = vector.load %arg4[%c12_63, %c0_64] : memref<16x1xf32, #tpu.memory_space<vmem>>, vector<4x1xf32>
    %396 = vector.shape_cast %395 : vector<4x1xf32> to vector<1x4x1xf32>
    %397 = vector.broadcast %394 : vector<1x4x1xf32> to vector<1x4x256xf32>
    %398 = arith.mulf %392, %397 : vector<1x4x256xf32>
    %399 = vector.broadcast %396 : vector<1x4x1xf32> to vector<1x4x256xf32>
    %400 = arith.addf %398, %399 : vector<1x4x256xf32>
    %cst_65 = arith.constant 0.000000e+00 : f32
    %401 = vector.broadcast %cst_65 : f32 to vector<1x4x256xf32>
    %402 = arith.maximumf %400, %401 : vector<1x4x256xf32>
    %c0_66 = arith.constant 0 : index
    %c12_67 = arith.constant 12 : index
    %c0_68 = arith.constant 0 : index
    %403 = vector.load %arg5[%c0_66, %c12_67, %c0_68] : memref<1x16x256xf32, #tpu.memory_space<vmem>>, vector<1x4x256xf32>
    tpu.vector_store %arg5[%c0_66, %c12_67, %c0_68], %402 {strides = array<i32>} : memref<1x16x256xf32, #tpu.memory_space<vmem>>, vector<1x4x256xf32>,
    return
  }
  func.func @transform_0(%arg0: i32) -> (i32, i32, i32) {
    %c0_i32 = arith.constant 0 : i32
    %c0_i32_0 = arith.constant 0 : i32
    %c0_i32_1 = arith.constant 0 : i32
    return %arg0, %c0_i32, %c0_i32_0 : i32, i32, i32
  }
  func.func @transform_1(%arg0: i32) -> (i32, i32, i32) {
    %c0_i32 = arith.constant 0 : i32
    %c0_i32_0 = arith.constant 0 : i32
    %c0_i32_1 = arith.constant 0 : i32
    %c0_i32_2 = arith.constant 0 : i32
    return %c0_i32, %c0_i32_0, %c0_i32_1 : i32, i32, i32
  }
  func.func @transform_2(%arg0: i32) -> (i32, i32) {
    %c0_i32 = arith.constant 0 : i32
    %c0_i32_0 = arith.constant 0 : i32
    %c0_i32_1 = arith.constant 0 : i32
    return %c0_i32, %c0_i32_0 : i32, i32
  }
  func.func @transform_3(%arg0: i32) -> (i32, i32) {
    %c0_i32 = arith.constant 0 : i32
    %c0_i32_0 = arith.constant 0 : i32
    %c0_i32_1 = arith.constant 0 : i32
    return %c0_i32, %c0_i32_0 : i32, i32
  }
  func.func @transform_4(%arg0: i32) -> (i32, i32, i32) {
    %c0_i32 = arith.constant 0 : i32
    %c0_i32_0 = arith.constant 0 : i32
    %c0_i32_1 = arith.constant 0 : i32
    return %arg0, %c0_i32, %c0_i32_0 : i32, i32, i32
  }
}

</mosaic_0001>

<bundles_post_ra>
// kernel: aspp_block.2
= control target key start
LH: loop header
LB: loop body
LE: loop exit
PB: predicated region body
PF: predicated region fallthrough
CT: control target
= control target key end

     0   :  { %s1621_s12 = smov 0   ;;  %s2557_s0 = inlined_call_operand.vmem [shape: f32[2,4,292], index: 0, kind: input, shape index: {}]   ;;  %s2558_s1 = inlined_call_operand.vmem [shape: f32[4,4,12], index: 1, kind: input, shape index: {}]   ;;  %s2559_s2 = inlined_call_operand.vmem [shape: f32[16,1], index: 2, kind: output, shape index: {0}]   ;;  %s2560_s3 = inlined_call_operand.vmem [shape: f32[16,1], index: 3, kind: output, shape index: {1}]  }
   0x1 LB: > { %s1487_s13 = sadd.s32 4294967295, %s1578_s12   ;;  %p1490_p0 = scmp.ge.s32.totalorder %s1578_s12, 1  ;;  %s1578_s12 = sphi %s1621_s12, %s14_s12  }
   0x2   : > { %p130_p1 = scmp.lt.s32.totalorder %s1578_s12, 3 }
   0x4   : > { %p131_p2 = pnand %p1490_p0, %p130_p1 }
   0x6   : > { %134 = sbr.rel (%p131_p2) target bundleno = 1581 (0x62d), region = 28 }
   0xb   : > { %p149_p3 = scmp.lt.s32.totalorder %s1487_s13, 1  ;;  %p1492_p4 = scmp.ne.s32.totalorder %s1487_s13, 0 }
   0xd   : > { %s150_s14 = scalar_select %p149_p3, %s1487_s13, 1 }
   0xe   : > { %157 = sbr.rel (%p1492_p4) target bundleno = 22 (0x16), region = 32 }
   0xf   : > { %s1498_s15 = smul.u32 12, %s150_s14 }
  0x11   : > { %s1632_s18 = scalar_lea.vmem %s2557_s0, %s1498_s15 }
  0x13   : > { %vm158_vm0 = vcmask 7168   ;;  %v1580_v0 = vmov 0.0  }
  0x14   : > { %159 = vst.msk [vmem:[%s2559_s2] sm:$0xff] %vm158_vm0, %v1580_v0  ;;  %160 = vst.msk [vmem:[%s2559_s2 + $0x8] sm:$0xff] %vm158_vm0, %v1580_v0 }
  0x15   : > { %161 = vst.msk [vmem:[%s2560_s3] sm:$0xff] %vm158_vm0, %v1580_v0  ;;  %162 = vst.msk [vmem:[%s2560_s3 + $0x8] sm:$0xff] %vm158_vm0, %v1580_v0 }
  0x16 PF: > { %v1649_v1 = vld [vmem:[%s2558_s1] sm:$0xf]  ;;  %v2576_v2 = vmov 2   ;;  %v2572_v3 = vmov 1   ;;  %v2567_v4 = vmov 3   ;;  %v2565_v5 = vmov 6  }
  0x17   : > { %1529 = vset.pattern.permute.xlu1 %v2576_v2  ;;  %1528 = vset.pattern.permute.xlu0 %v2572_v3  ;;  %v1585_v6 = vmov 4   ;;  %v1586_v7 = vmov 5   ;;  %v2573_v8 = vmov 7   ;;  %v2566_v9 = vmov 8   ;;  %v1677_v13 = vld [vmem:[%s2558_s1 + $0x4] sm:$0xf] }
  0x18   : > { %244 = vperm.xlu1 %1529, %v1649_v1   ;;  %207 = vperm.xlu0 %1528, %v1649_v1   ;;  %v2571_v10 = vmov 9   ;;  %v2570_v11 = vmov 10   ;;  %v2568_v12 = vmov 11   ;;  %v173_v14 = vlaneseq  ;;  %v163_v19 = vld [vmem:[%s1632_s18] sm:$0xff]  ;;  %v164_v24 = vld [vmem:[%s1632_s18 + $0x8] sm:$0xf] }
  0x19   : > { %s1592_s4 = smov 127   ;;  %s1593_s5 = smov 126   ;;  %vm714_vm1 = vcmask 949248   ;;  %vm333_vm2 = vcmask 1039360   ;;  %vm430_vm3 = vcmask 1031168   ;;  %vm617_vm4 = vcmask 998400  }
  0x1a   : > { %v1694_v15 = vshrl.u32 %v173_v14, 7  ;;  %s1594_s6 = smov 122   ;;  %s1595_s7 = smov 116   ;;  %vm523_vm5 = vcmask 908288   ;;  %vm528_vm6 = vcmask 1043456   ;;  %vm995_vm7 = vcmask 850944  }
  0x1b   : > { %s1597_s13 = smov 111   ;;  %s1598_s14 = smov 104   ;;  %vm1436_vm8 = vcmask 7168   ;;  %vm1246_vm9 = vcmask 900096   ;;  %vm1335_vm10 = vcmask 752640  }
  0x1c   : > { %1530 = vset.pattern.permute.xlu1 %v2567_v4  ;;  %1551 = vset.pattern.permute.xlu0 %v2565_v5  ;;  %2634 = vst [vmem:[#allocation2_spill] sm:$0xff] %v1694_v15  ;;  %v1697_v16 = vsub.s32 0, %v1694_v15  ;;  %v2563_v17 = vsub.s32 4, %v1694_v15  ;;  %v2564_v22 = vsub.s32 5, %v1694_v15  ;;  %v1718_v28 = vsub.s32 1, %v1694_v15  ;;  %s1599_s15 = smov 110  }
  0x1d   : > { %281 = vperm.xlu1 %1530, %v1649_v1   ;;  %v2562_v30 = vsub.s32 6, %v1694_v15  ;;  %v2561_v42 = vsub.s32 7, %v1694_v15  ;;  %v1744_v44 = vsub.s32 2, %v1694_v15  ;;  %v1761_v52 = vsub.s32 3, %v1694_v15  ;;  %s1600_s16 = smov 92  }
  0x1e   : > { %2635 = vst [vmem:[#allocation3_spill] sm:$0xff] %v1697_v16  ;;  %v180_v20 = vrot.slane %v163_v19, %v2563_v17  ;;  %v176_v21 = vrot.slane %v163_v19, %v1697_v16  ;;  %v184_v27 = vrot.slane %v164_v24, %v1697_v16  ;;  %2637 = vst [vmem:[#allocation5_spill] sm:$0xff] %v1718_v28 }
  0x1f   : > { %v217_v29 = vrot.slane %v163_v19, %v2564_v22  ;;  %v213_v35 = vrot.slane %v163_v19, %v1718_v28  ;;  %v254_v37 = vrot.slane %v163_v19, %v2562_v30  ;;  %v221_v41 = vrot.slane %v164_v24, %v1718_v28  ;;  %2640 = vst [vmem:[#allocation8_spill] sm:$0xff] %v1744_v44 }
  0x20   : > { %v1711_v25 = vrot.slane %v180_v20, %v1697_v16  ;;  %v1714_v26 = vrot.slane %v176_v21, %v1697_v16  ;;  %v1726_v34 = vrot.slane %v184_v27, %v1697_v16  ;;  %v291_v48 = vrot.slane %v163_v19, %v2561_v42  ;;  %2643 = vst [vmem:[#allocation11_spill] sm:$0xff] %v1761_v52 }
  0x21   : > { %1531 = vset.pattern.permute.xlu1 %v1585_v6  ;;  %v1730_v36 = vrot.slane %v217_v29, %v1718_v28  ;;  %v1738_v40 = vrot.slane %v213_v35, %v1718_v28  ;;  %v1749_v45 = vrot.slane %v254_v37, %v1744_v44  ;;  %v1753_v47 = vrot.slane %v221_v41, %v1718_v28 }
  0x22   : > { %318 = vperm.xlu1 %1531, %v1649_v1   ;;  %2636 = vst [vmem:[#allocation4_spill] sm:$0xff] %v1711_v25  ;;  %v250_v50 = vrot.slane %v163_v19, %v1744_v44  ;;  %v1766_v54 = vrot.slane %v291_v48, %v1761_v52  ;;  %v258_v55 = vrot.slane %v164_v24, %v1744_v44 }
  0x23   : > { %2638 = vst [vmem:[#allocation6_spill] sm:$0xff] %v1730_v36  ;;  %2639 = vst [vmem:[#allocation7_spill] sm:$0xff] %v1738_v40  ;;  %v287_v61 = vrot.slane %v163_v19, %v1761_v52  ;;  %v295_v14 = vrot.slane %v164_v24, %v1761_v52 }
  0x24   : > { %2641 = vst [vmem:[#allocation9_spill] sm:$0xff] %v1749_v45  ;;  %2642 = vst [vmem:[#allocation10_spill] sm:$0xff] %v1753_v47  ;;  %v1770_v56 = vrot.slane %v250_v50, %v1744_v44  ;;  %v1777_v60 = vrot.slane %v258_v55, %v1744_v44 }
  0x25   : > { %2644 = vst [vmem:[#allocation12_spill] sm:$0xff] %v1766_v54  ;;  %v1785_v20 = vrot.slane %v287_v61, %v1761_v52  ;;  %v1792_v29 = vrot.slane %v295_v14, %v1761_v52 }
  0x26   : > { %1532 = vset.pattern.permute.xlu1 %v1586_v7  ;;  %2645 = vst [vmem:[#allocation13_spill] sm:$0xff] %v1770_v56  ;;  %2646 = vst [vmem:[#allocation14_spill] sm:$0xff] %v1777_v60 }
  0x27   : > { %343 = vperm.xlu1 %1532, %v1649_v1   ;;  %2647 = vst [vmem:[#allocation15_spill] sm:$0xff] %v1785_v20  ;;  %2648 = vst [vmem:[#allocation16_spill] sm:$0xff] %v1792_v29 }
  0x2b   : > { %1533 = vset.pattern.permute.xlu1 %v2565_v5 }
  0x2c   : > { %367 = vperm.xlu1 %1533, %v1649_v1  }
  0x30   : > { %1534 = vset.pattern.permute.xlu1 %v2573_v8 }
  0x31   : > { %391 = vperm.xlu1 %1534, %v1649_v1  }
  0x35   : > { %1535 = vset.pattern.permute.xlu1 %v2566_v9 }
  0x36   : > { %415 = vperm.xlu1 %1535, %v1649_v1  }
  0x3a   : > { %1536 = vset.pattern.permute.xlu1 %v2571_v10 }
  0x3b   : > { %440 = vperm.xlu1 %1536, %v1649_v1  }
  0x3f   : > { %1537 = vset.pattern.permute.xlu1 %v2570_v11 }
  0x40   : > { %464 = vperm.xlu1 %1537, %v1649_v1  }
  0x44   : > { %1538 = vset.pattern.permute.xlu1 %v2568_v12 }
  0x45   : > { %488 = vperm.xlu1 %1538, %v1649_v1  }
  0x49   : > { %1539 = vset.pattern.permute.xlu1 %v2572_v3 }
  0x4a   : > { %572 = vperm.xlu1 %1539, %v1677_v13  }
  0x4e   : > { %1540 = vset.pattern.permute.xlu1 %v2576_v2 }
  0x4f   : > { %582 = vperm.xlu1 %1540, %v1677_v13  }
  0x53   : > { %1541 = vset.pattern.permute.xlu1 %v2567_v4 }
  0x54   : > { %592 = vperm.xlu1 %1541, %v1677_v13  }
  0x58   : > { %1542 = vset.pattern.permute.xlu1 %v1585_v6 }
  0x59   : > { %602 = vperm.xlu1 %1542, %v1677_v13  }
  0x5d   : > { %1543 = vset.pattern.permute.xlu1 %v1586_v7 }
  0x5e   : > { %627 = vperm.xlu1 %1543, %v1677_v13  }
  0x62   : > { %1544 = vset.pattern.permute.xlu1 %v2565_v5 }
  0x63   : > { %651 = vperm.xlu1 %1544, %v1677_v13  }
  0x67   : > { %1545 = vset.pattern.permute.xlu1 %v2573_v8 }
  0x68   : > { %675 = vperm.xlu1 %1545, %v1677_v13  }
  0x6c   : > { %1546 = vset.pattern.permute.xlu1 %v2566_v9  ;;  %v1934_v9 = vld [vmem:[%s2558_s1 + $0x8] sm:$0xf] }
  0x6d   : > { %2653 = vst [vmem:[#allocation21_spill] sm:$0xff] %v1934_v9 }
  0x93   : > { %v1700_v18 = vpop.permute.xlu1 %244 }
  0x98   : > { %v1707_v23 = vpop.permute.xlu1 %281 }
  0x9d   : > { %v319_v31 = vpop.permute.xlu1 %318 }
  0x9e   : > { %v322_v32 = vmul.f32 %v319_v31, %v1711_v25  ;;  %v321_v33 = vmul.f32 %v319_v31, %v1714_v26  ;;  %v323_v39 = vmul.f32 %v319_v31, %v1726_v34 }
  0xa0   : > { %329 = vrot.lane.b32.xlu1 %v322_v32, %s1592_s4  ;;  %327 = vrot.lane.b32.xlu0 %v321_v33, %s1592_s4 }
  0xa2   : > { %v344_v38 = vpop.permute.xlu1 %343 }
  0xa3   : > { %v347_v43 = vmul.f32 %v344_v38, %v1730_v36  ;;  %v346_v46 = vmul.f32 %v344_v38, %v1738_v40  ;;  %v348_v53 = vmul.f32 %v344_v38, %v1753_v47 }
  0xa4   : > { %331 = vrot.lane.b32.xlu0 %v323_v39, %s1592_s4 }
  0xa5   : > { %354 = vrot.lane.b32.xlu1 %v347_v43, %s1592_s4 }
  0xa7   : > { %v368_v49 = vpop.permute.xlu1 %367 }
  0xa8   : > { %352 = vrot.lane.b32.xlu0 %v346_v46, %s1592_s4  ;;  %v371_v51 = vmul.f32 %v368_v49, %v1749_v45  ;;  %v370_v59 = vmul.f32 %v368_v49, %v1770_v56  ;;  %v372_v0 = vmul.f32 %v368_v49, %v1777_v60 }
  0xaa   : > { %378 = vrot.lane.b32.xlu1 %v371_v51, %s1592_s4 }
  0xac   : > { %v392_v57 = vpop.permute.xlu1 %391  ;;  %356 = vrot.lane.b32.xlu0 %v348_v53, %s1592_s4 }
  0xad   : > { %v395_v58 = vmul.f32 %v392_v57, %v1766_v54  ;;  %v394_v19 = vmul.f32 %v392_v57, %v1785_v20  ;;  %v396_v24 = vmul.f32 %v392_v57, %v1792_v29 }
  0xaf   : > { %402 = vrot.lane.b32.xlu1 %v395_v58, %s1592_s4 }
  0xb0   : > { %376 = vrot.lane.b32.xlu0 %v370_v59, %s1592_s4 }
  0xb1   : > { %v416_v62 = vpop.permute.xlu1 %415 }
  0xb2   : > { %v419_v63 = vmul.f32 %v416_v62, %v1711_v25  ;;  %v418_v33 = vmul.f32 %v416_v62, %v1714_v26  ;;  %v420_v38 = vmul.f32 %v416_v62, %v1726_v34 }
  0xb4   : > { %426 = vrot.lane.b32.xlu1 %v419_v63, %s1593_s5  ;;  %380 = vrot.lane.b32.xlu0 %v372_v0, %s1592_s4 }
  0xb6   : > { %v441_v21 = vpop.permute.xlu1 %440 }
  0xb7   : > { %v444_v27 = vmul.f32 %v441_v21, %v1730_v36  ;;  %v443_v41 = vmul.f32 %v441_v21, %v1738_v40  ;;  %v445_v46 = vmul.f32 %v441_v21, %v1753_v47 }
  0xb8   : > { %400 = vrot.lane.b32.xlu0 %v394_v19, %s1592_s4 }
  0xb9   : > { %451 = vrot.lane.b32.xlu1 %v444_v27, %s1593_s5 }
  0xbb   : > { %v465_v31 = vpop.permute.xlu1 %464 }
  0xbc   : > { %404 = vrot.lane.b32.xlu0 %v396_v24, %s1592_s4  ;;  %v468_v32 = vmul.f32 %v465_v31, %v1749_v45  ;;  %v467_v48 = vmul.f32 %v465_v31, %v1770_v56  ;;  %v469_v50 = vmul.f32 %v465_v31, %v1777_v60 }
  0xbe   : > { %475 = vrot.lane.b32.xlu1 %v468_v32, %s1593_s5 }
  0xc0   : > { %v489_v35 = vpop.permute.xlu1 %488  ;;  %424 = vrot.lane.b32.xlu0 %v418_v33, %s1593_s5 }
  0xc1   : > { %v492_v37 = vmul.f32 %v489_v35, %v1766_v54  ;;  %v491_v55 = vmul.f32 %v489_v35, %v1785_v20  ;;  %v493_v59 = vmul.f32 %v489_v35, %v1792_v29 }
  0xc3   : > { %499 = vrot.lane.b32.xlu1 %v492_v37, %s1593_s5 }
  0xc4   : > { %428 = vrot.lane.b32.xlu0 %v420_v38, %s1593_s5 }
  0xc5   : > { %v1806_v39 = vpop.permute.xlu1 %572 }
  0xc8   : > { %449 = vrot.lane.b32.xlu0 %v443_v41, %s1593_s5 }
  0xca   : > { %v1810_v43 = vpop.permute.xlu1 %582 }
  0xcc   : > { %453 = vrot.lane.b32.xlu0 %v445_v46, %s1593_s5 }
  0xcf   : > { %v1815_v49 = vpop.permute.xlu1 %592 }
  0xd0   : > { %473 = vrot.lane.b32.xlu0 %v467_v48, %s1593_s5 }
  0xd4   : > { %v603_v51 = vpop.permute.xlu1 %602  ;;  %477 = vrot.lane.b32.xlu0 %v469_v50, %s1593_s5 }
  0xd5   : > { %v606_v53 = vmul.f32 %v603_v51, %v1711_v25  ;;  %v605_v62 = vmul.f32 %v603_v51, %v1714_v26  ;;  %v607_v0 = vmul.f32 %v603_v51, %v1726_v34 }
  0xd7   : > { %613 = vrot.lane.b32.xlu1 %v606_v53, %s1594_s6 }
  0xd8   : > { %497 = vrot.lane.b32.xlu0 %v491_v55, %s1593_s5 }
  0xd9   : > { %v628_v57 = vpop.permute.xlu1 %627 }
  0xda   : > { %v631_v58 = vmul.f32 %v628_v57, %v1730_v36  ;;  %v630_v19 = vmul.f32 %v628_v57, %v1738_v40  ;;  %v632_v27 = vmul.f32 %v628_v57, %v1753_v47 }
  0xdc   : > { %638 = vrot.lane.b32.xlu1 %v631_v58, %s1594_s6  ;;  %501 = vrot.lane.b32.xlu0 %v493_v59, %s1593_s5 }
  0xde   : > { %v652_v61 = vpop.permute.xlu1 %651 }
  0xdf   : > { %v655_v63 = vmul.f32 %v652_v61, %v1749_v45  ;;  %v654_v24 = vmul.f32 %v652_v61, %v1770_v56  ;;  %v656_v31 = vmul.f32 %v652_v61, %v1777_v60 }
  0xe0   : > { %611 = vrot.lane.b32.xlu0 %v605_v62, %s1594_s6 }
  0xe1   : > { %662 = vrot.lane.b32.xlu1 %v655_v63, %s1594_s6 }
  0xe3   : > { %v676_v14 = vpop.permute.xlu1 %675 }
  0xe4   : > { %615 = vrot.lane.b32.xlu0 %v607_v0, %s1594_s6  ;;  %v679_v21 = vmul.f32 %v676_v14, %v1766_v54  ;;  %v678_v32 = vmul.f32 %v676_v14, %v1785_v20  ;;  %v680_v33 = vmul.f32 %v676_v14, %v1792_v29 }
  0xe6   : > { %686 = vrot.lane.b32.xlu1 %v679_v21, %s1594_s6 }
  0xe8   : > { %636 = vrot.lane.b32.xlu0 %v630_v19, %s1594_s6 }
  0xea   : > { %699 = vperm.xlu1 %1546, %v1677_v13  }
  0xec   : > { %640 = vrot.lane.b32.xlu0 %v632_v27, %s1594_s6 }
  0xee   : > { %1547 = vset.pattern.permute.xlu1 %v2571_v10 }
  0xf0   : > { %660 = vrot.lane.b32.xlu0 %v654_v24, %s1594_s6 }
  0xf4   : > { %664 = vrot.lane.b32.xlu0 %v656_v31, %s1594_s6 }
  0xf8   : > { %684 = vrot.lane.b32.xlu0 %v678_v32, %s1594_s6 }
  0xfc   : > { %688 = vrot.lane.b32.xlu0 %v680_v33, %s1594_s6 }
 0x112   : > { %v1850_v35 = vpop.permute.xlu1 %329 }
 0x117   : > { %v1852_v37 = vpop.permute.xlu1 %354 }
 0x11c   : > { %v1854_v38 = vpop.permute.xlu1 %378 }
 0x121   : > { %v1856_v41 = vpop.permute.xlu1 %402 }
 0x126   : > { %v1858_v46 = vpop.permute.xlu1 %426 }
 0x12b   : > { %v1860_v48 = vpop.permute.xlu1 %451 }
 0x130   : > { %v1862_v50 = vpop.permute.xlu1 %475 }
 0x135   : > { %v1864_v51 = vpop.permute.xlu1 %499 }
 0x136   : > { %2649 = vst [vmem:[#allocation17_spill] sm:$0xff] %v1864_v51 }
 0x149   : > { %v1866_v53 = vpop.permute.xlu1 %613 }
 0x14e   : > { %v1868_v55 = vpop.permute.xlu1 %638 }
 0x153   : > { %v1870_v57 = vpop.permute.xlu1 %662 }
 0x158   : > { %v1872_v58 = vpop.permute.xlu1 %686 }
 0x165   : > { %v700_v59 = vpop.permute.xlu1 %699 }
 0x166   : > { %v703_v61 = vmul.f32 %v700_v59, %v1711_v25  ;;  %v702_v62 = vmul.f32 %v700_v59, %v1714_v26  ;;  %v704_v63 = vmul.f32 %v700_v59, %v1726_v34 }
 0x168   : > { %710 = vrot.lane.b32.xlu1 %v703_v61, %s1595_s7  ;;  %708 = vrot.lane.b32.xlu0 %v702_v62, %s1595_s7  ;;  %v1902_v61 = vpop.permute.xlu0 %207 }
 0x16c   : > { %724 = vperm.xlu1 %1547, %v1677_v13   ;;  %712 = vrot.lane.b32.xlu0 %v704_v63, %s1595_s7  ;;  %v1904_v62 = vpop.permute.xlu0 %327 }
 0x170   : > { %1548 = vset.pattern.permute.xlu1 %v2570_v11  ;;  %v1906_v63 = vpop.permute.xlu0 %331 }
 0x1da   : > { %v1882_v0 = vpop.permute.xlu1 %710 }
 0x1db   : > { %2650 = vst [vmem:[#allocation18_spill] sm:$0xff] %v1882_v0 }
 0x1e7   : > { %v725_v14 = vpop.permute.xlu1 %724 }
 0x1e8   : > { %v728_v21 = vmul.f32 %v725_v14, %v1730_v36  ;;  %v727_v19 = vmul.f32 %v725_v14, %v1738_v40  ;;  %v729_v27 = vmul.f32 %v725_v14, %v1753_v47  ;;  %v1908_v14 = vpop.permute.xlu0 %352 }
 0x1ea   : > { %735 = vrot.lane.b32.xlu1 %v728_v21, %s1595_s7  ;;  %733 = vrot.lane.b32.xlu0 %v727_v19, %s1595_s7 }
 0x1ec   : > { %v1910_v21 = vpop.permute.xlu0 %356 }
 0x1ee   : > { %748 = vperm.xlu1 %1548, %v1677_v13   ;;  %737 = vrot.lane.b32.xlu0 %v729_v27, %s1595_s7 }
 0x1f0   : > { %v1912_v19 = vpop.permute.xlu0 %376 }
 0x1f2   : > { %1549 = vset.pattern.permute.xlu1 %v2568_v12 }
 0x1f4   : > { %v1914_v27 = vpop.permute.xlu0 %380 }
 0x25c   : > { %v1892_v24 = vpop.permute.xlu1 %735 }
 0x25d   : > { %2651 = vst [vmem:[#allocation19_spill] sm:$0xff] %v1892_v24 }
 0x269   : > { %v749_v31 = vpop.permute.xlu1 %748 }
 0x26a   : > { %v752_v32 = vmul.f32 %v749_v31, %v1749_v45  ;;  %v751_v33 = vmul.f32 %v749_v31, %v1770_v56  ;;  %v753_v59 = vmul.f32 %v749_v31, %v1777_v60  ;;  %v1916_v31 = vpop.permute.xlu0 %400 }
 0x26c   : > { %759 = vrot.lane.b32.xlu1 %v752_v32, %s1595_s7  ;;  %757 = vrot.lane.b32.xlu0 %v751_v33, %s1595_s7 }
 0x26e   : > { %v1918_v32 = vpop.permute.xlu0 %404 }
 0x270   : > { %772 = vperm.xlu1 %1549, %v1677_v13   ;;  %761 = vrot.lane.b32.xlu0 %v753_v59, %s1595_s7 }
 0x272   : > { %v1922_v59 = vpop.permute.xlu0 %424 }
 0x274   : > { %1550 = vset.pattern.permute.xlu1 %v1585_v6 }
 0x276   : > { %v1929_v5 = vpop.permute.xlu0 %428 }
 0x2de   : > { %v1920_v33 = vpop.permute.xlu1 %759 }
 0x2df   : > { %2652 = vst [vmem:[#allocation20_spill] sm:$0xff] %v1920_v33 }
 0x2eb   : > { %v773_v42 = vpop.permute.xlu1 %772 }
 0x2ec   : > { %v776_v30 = vmul.f32 %v773_v42, %v1766_v54  ;;  %v775_v17 = vmul.f32 %v773_v42, %v1785_v20  ;;  %v777_v22 = vmul.f32 %v773_v42, %v1792_v29 }
 0x2ee   : > { %783 = vrot.lane.b32.xlu1 %v776_v30, %s1595_s7  ;;  %781 = vrot.lane.b32.xlu0 %v775_v17, %s1595_s7  ;;  %v1940_v30 = vpop.permute.xlu0 %449 }
 0x2f2   : > { %785 = vrot.lane.b32.xlu0 %v777_v22, %s1595_s7  ;;  %884 = vperm.xlu1 %1550, %v1934_v9   ;;  %v1947_v17 = vpop.permute.xlu0 %453 }
 0x2f6   : > { %932 = vperm.xlu0 %1551, %v1934_v9   ;;  %1552 = vset.pattern.permute.xlu1 %v2573_v8  ;;  %v1953_v22 = vpop.permute.xlu0 %473 }
 0x2f7   : > { %956 = vperm.xlu1 %1552, %v1934_v9   ;;  %2654 = vst [vmem:[#allocation22_spill] sm:$0xff] %v1953_v22 }
 0x2fa   : > { %1555 = vset.pattern.permute.xlu0 %v2568_v12  ;;  %v1959_v42 = vpop.permute.xlu0 %477 }
 0x2fb   : > { %1053 = vperm.xlu0 %1555, %v1934_v9   ;;  %1553 = vset.pattern.permute.xlu1 %v2571_v10 }
 0x2fc   : > { %1005 = vperm.xlu1 %1553, %v1934_v9  }
 0x2ff   : > { %1558 = vset.pattern.permute.xlu0 %v2567_v4  ;;  %v1963_v4 = vpop.permute.xlu0 %497 }
 0x300   : > { %874 = vperm.xlu0 %1558, %v1934_v9   ;;  %1554 = vset.pattern.permute.xlu1 %v2570_v11  ;;  %2655 = vst [vmem:[#allocation23_spill] sm:$0xff] %v1963_v4 }
 0x301   : > { %1029 = vperm.xlu1 %1554, %v1934_v9  }
 0x303   : > { %v1966_v12 = vpop.permute.xlu0 %501 }
 0x304   : > { %1559 = vset.pattern.permute.xlu0 %v1586_v7  ;;  %2656 = vst [vmem:[#allocation24_spill] sm:$0xff] %v1966_v12 }
 0x305   : > { %908 = vperm.xlu0 %1559, %v1934_v9   ;;  %1556 = vset.pattern.permute.xlu1 %v2572_v3 }
 0x306   : > { %854 = vperm.xlu1 %1556, %v1934_v9  }
 0x307   : > { %v1968_v11 = vpop.permute.xlu0 %611 }
 0x30a   : > { %1557 = vset.pattern.permute.xlu1 %v2576_v2 }
 0x30b   : > { %864 = vperm.xlu1 %1557, %v1934_v9   ;;  %v1970_v7 = vpop.permute.xlu0 %615 }
 0x30f   : > { %1560 = vset.pattern.permute.xlu1 %v1585_v6  ;;  %v1972_v10 = vpop.permute.xlu0 %636 }
 0x313   : > { %v1974_v3 = vpop.permute.xlu0 %640 }
 0x317   : > { %v1976_v8 = vpop.permute.xlu0 %660 }
 0x31b   : > { %v1978_v52 = vpop.permute.xlu0 %664 }
 0x31f   : > { %v1980_v2 = vpop.permute.xlu0 %684 }
 0x323   : > { %v1982_v44 = vpop.permute.xlu0 %688 }
 0x324   : > { %2657 = vst [vmem:[#allocation25_spill] sm:$0xff] %v1982_v44 }
 0x327   : > { %v1984_v15 = vpop.permute.xlu0 %708 }
 0x328   : > { %2658 = vst [vmem:[#allocation26_spill] sm:$0xff] %v1984_v15 }
 0x32b   : > { %v1986_v6 = vpop.permute.xlu0 %712 }
 0x32c   : > { %2659 = vst [vmem:[#allocation27_spill] sm:$0xff] %v1986_v6 }
 0x32f   : > { %v1988_v16 = vpop.permute.xlu0 %733 }
 0x330   : > { %2660 = vst [vmem:[#allocation28_spill] sm:$0xff] %v1988_v16 }
 0x333   : > { %v1990_v28 = vpop.permute.xlu0 %737 }
 0x334   : > { %2661 = vst [vmem:[#allocation29_spill] sm:$0xff] %v1990_v28 }
 0x337   : > { %v1992_v4 = vpop.permute.xlu0 %757 }
 0x338   : > { %2662 = vst [vmem:[#allocation30_spill] sm:$0xff] %v1992_v4 }
 0x33b   : > { %v1994_v22 = vpop.permute.xlu0 %761 }
 0x33c   : > { %2663 = vst [vmem:[#allocation31_spill] sm:$0xff] %v1994_v22 }
 0x360   : > { %v1996_v33 = vpop.permute.xlu0 %781  ;;  %v1998_v24 = vpop.permute.xlu1 %783 }
 0x361   : > { %2664 = vst [vmem:[#allocation32_spill] sm:$0xff] %v1996_v33  ;;  %2665 = vst [vmem:[#allocation33_spill] sm:$0xff] %v1998_v24 }
 0x364   : > { %v2000_v51 = vpop.permute.xlu0 %785 }
 0x365   : > { %2666 = vst [vmem:[#allocation34_spill] sm:$0xff] %v2000_v51 }
 0x36d   : > { %v885_v12 = vpop.permute.xlu1 %884 }
 0x36e   : > { %v887_v0 = vmul.f32 %v885_v12, %v1714_v26  ;;  %v889_v15 = vmul.f32 %v885_v12, %v1726_v34  ;;  %v888_v16 = vmul.f32 %v885_v12, %v1711_v25 }
 0x370   : > { %893 = vrot.lane.b32.xlu1 %v887_v0, %s1595_s7  ;;  %897 = vrot.lane.b32.xlu0 %v889_v15, %s1595_s7  ;;  %v2672_v0 = vmov 6  }
 0x371   : > { %v2007_v4 = vpop.permute.xlu0 %932 }
 0x372   : > { %2667 = vst [vmem:[#allocation35_spill] sm:$0xff] %v2007_v4  ;;  %v935_v12 = vmul.f32 %v2007_v4, %v1770_v56  ;;  %v585_v4 = vmul.f32 %v1810_v43, %v1770_v56 }
 0x374   : > { %895 = vrot.lane.b32.xlu1 %v888_v16, %s1595_s7  ;;  %v2026_v16 = vld [vmem:[%s2558_s1 + $0xc] sm:$0xf] }
 0x375   : > { %2670 = vst [vmem:[#allocation38_spill] sm:$0xff] %v2026_v16 }
 0x376   : > { %v2010_v33 = vpop.permute.xlu0 %1053 }
 0x377   : > { %2668 = vst [vmem:[#allocation36_spill] sm:$0xff] %v2010_v33 }
 0x37b   : > { %v2012_v24 = vpop.permute.xlu0 %874 }
 0x37c   : > { %2669 = vst [vmem:[#allocation37_spill] sm:$0xff] %v2012_v24 }
 0x380   : > { %v909_v51 = vpop.permute.xlu0 %908 }
 0x381   : > { %v911_v22 = vmul.f32 %v909_v51, %v1738_v40  ;;  %v912_v28 = vmul.f32 %v909_v51, %v1730_v36  ;;  %v913_v15 = vmul.f32 %v909_v51, %v1753_v47  ;;  %v2673_v51 = vmov 7  }
 0x383   : > { %919 = vrot.lane.b32.xlu0 %v912_v28, %s1595_s7  ;;  %917 = vrot.lane.b32.xlu1 %v911_v22, %s1595_s7  ;;  %v2671_v28 = vmov 8   ;;  %v1596_v22 = vmov 0  }
 0x387   : > { %941 = vrot.lane.b32.xlu0 %v935_v12, %s1595_s7  ;;  %921 = vrot.lane.b32.xlu1 %v913_v15, %s1595_s7  ;;  %v2674_v12 = vmov 9   ;;  %v2040_v15 = vpop.permute.xlu1 %956 }
 0x388   : > { %2675 = vst [vmem:[#allocation39_spill] sm:$0xff] %v2040_v15 }
 0x38b   : > { %1254 = vperm.xlu0 %1559, %v2026_v16   ;;  %1231 = vperm.xlu1 %1560, %v2026_v16  }
 0x38f   : > { %1561 = vset.pattern.permute.xlu0 %v2671_v28  ;;  %1562 = vset.pattern.permute.xlu1 %v2672_v0  ;;  %v2042_v28 = vpop.permute.xlu1 %1005 }
 0x390   : > { %980 = vperm.xlu0 %1561, %v1934_v9   ;;  %1276 = vperm.xlu1 %1562, %v2026_v16   ;;  %2676 = vst [vmem:[#allocation40_spill] sm:$0xff] %v2042_v28 }
 0x393   : > { %v2044_v0 = vpop.permute.xlu1 %1029 }
 0x394   : > { %1320 = vperm.xlu0 %1561, %v2026_v16   ;;  %1563 = vset.pattern.permute.xlu1 %v2673_v51  ;;  %2677 = vst [vmem:[#allocation41_spill] sm:$0xff] %v2044_v0 }
 0x395   : > { %1298 = vperm.xlu1 %1563, %v2026_v16  }
 0x397   : > { %v2046_v24 = vpop.permute.xlu1 %854 }
 0x398   : > { %1564 = vset.pattern.permute.xlu0 %v1596_v22  ;;  %2678 = vst [vmem:[#allocation42_spill] sm:$0xff] %v2046_v24 }
 0x399   : > { %168 = vperm.xlu0 %1564, %v1649_v1   ;;  %1565 = vset.pattern.permute.xlu1 %v2674_v12 }
 0x39b   : > { %v2048_v33 = vpop.permute.xlu1 %864 }
 0x39c   : > { %2679 = vst [vmem:[#allocation43_spill] sm:$0xff] %v2048_v33 }
 0x39d   : > { %562 = vperm.xlu0 %1564, %v1677_v13  }
 0x3e2   : > { %v894_v51 = vpop.permute.xlu1 %893  ;;  %v2056_v22 = vpop.permute.xlu0 %897 }
 0x3e3   : > { %2682 = vst [vmem:[#allocation46_spill] sm:$0xff] %v2056_v22  ;;  %v576_v22 = vmul.f32 %v1806_v39, %v1730_v36 }
 0x3e6   : > { %v2050_v16 = vpop.permute.xlu1 %895 }
 0x3e7   : > { %2680 = vst [vmem:[#allocation44_spill] sm:$0xff] %v2050_v16  ;;  %v2054_v1 = vsel %vm714_vm1, %v894_v51, %v2050_v16  ;;  %v274_v51 = vmul.f32 %v1770_v56, %v1700_v18  ;;  %v276_v16 = vmul.f32 %v1777_v60, %v1700_v18 }
 0x3e8   : > { %2681 = vst [vmem:[#allocation45_spill] sm:$0xff] %v2054_v1  ;;  %v275_v1 = vmul.f32 %v1749_v45, %v1700_v18  ;;  %v575_v18 = vmul.f32 %v1806_v39, %v1738_v40 }
 0x3f5   : > { %v918_v13 = vpop.permute.xlu1 %917  ;;  %v2058_v12 = vpop.permute.xlu0 %919 }
 0x3f6   : > { %2683 = vst [vmem:[#allocation47_spill] sm:$0xff] %v2058_v12  ;;  %v2062_v0 = vsel %vm714_vm1, %v918_v13, %v2058_v12  ;;  %v311_v13 = vmul.f32 %v1785_v20, %v1707_v23  ;;  %v313_v12 = vmul.f32 %v1792_v29, %v1707_v23 }
 0x3f7   : > { %2684 = vst [vmem:[#allocation48_spill] sm:$0xff] %v2062_v0  ;;  %v312_v0 = vmul.f32 %v1766_v54, %v1707_v23  ;;  %v587_v23 = vmul.f32 %v1810_v43, %v1777_v60 }
 0x3f9   : > { %v2064_v24 = vpop.permute.xlu0 %941 }
 0x3fa   : > { %2685 = vst [vmem:[#allocation49_spill] sm:$0xff] %v2064_v24  ;;  %v237_v24 = vmul.f32 %v1738_v40, %v1902_v61 }
 0x406   : > { %v2066_v33 = vpop.permute.xlu0 %1254 }
 0x407   : > { %2686 = vst [vmem:[#allocation50_spill] sm:$0xff] %v2066_v33  ;;  %v238_v33 = vmul.f32 %v1730_v36, %v1902_v61  ;;  %v595_v36 = vmul.f32 %v1815_v49, %v1785_v20  ;;  %v358_v20 = vsel %vm333_vm2, %v1908_v14, %v1852_v37  ;;  %v406_v14 = vsel %vm333_vm2, %v1916_v31, %v1856_v41 }
 0x40b   : > { %v2068_v28 = vpop.permute.xlu0 %980 }
 0x40c   : > { %2687 = vst [vmem:[#allocation51_spill] sm:$0xff] %v2068_v28  ;;  %v577_v28 = vmul.f32 %v1806_v39, %v1753_v47  ;;  %v596_v39 = vmul.f32 %v1815_v49, %v1766_v54  ;;  %v382_v54 = vsel %vm333_vm2, %v1912_v19, %v1854_v38 }
 0x40f   : > { %v2070_v15 = vpop.permute.xlu0 %1320 }
 0x410   : > { %2688 = vst [vmem:[#allocation52_spill] sm:$0xff] %v2070_v15  ;;  %v239_v15 = vmul.f32 %v1753_v47, %v1902_v61  ;;  %v586_v61 = vmul.f32 %v1810_v43, %v1749_v45  ;;  %v597_v47 = vmul.f32 %v1815_v49, %v1792_v29  ;;  %v334_v43 = vsel %vm333_vm2, %v1904_v62, %v1850_v35 }
 0x411   : > { %v359_v49 = vsel %vm333_vm2, %v1852_v37, %v1910_v21 }
 0x414   : > { %v169_v9 = vpop.permute.xlu0 %168 }
 0x415   : > { %v200_v6 = vmul.f32 %v1714_v26, %v169_v9  ;;  %v201_v40 = vmul.f32 %v1711_v25, %v169_v9  ;;  %v202_v44 = vmul.f32 %v1726_v34, %v169_v9  ;;  %v335_v9 = vsel %vm333_vm2, %v1850_v35, %v1906_v63 }
 0x416   : > { %v383_v35 = vsel %vm333_vm2, %v1854_v38, %v1914_v27 }
 0x417   : > { %v240_v45 = vadd.f32 %v237_v24, %v200_v6  ;;  %v241_v56 = vadd.f32 %v238_v33, %v201_v40  ;;  %v242_v60 = vadd.f32 %v239_v15, %v202_v44 }
 0x418   : > { %v563_v62 = vpop.permute.xlu0 %562 }
 0x419   : > { %v277_v24 = vadd.f32 %v274_v51, %v240_v45  ;;  %v278_v40 = vadd.f32 %v275_v1, %v241_v56  ;;  %v279_v44 = vadd.f32 %v276_v16, %v242_v60  ;;  %v565_v33 = vmul.f32 %v563_v62, %v1714_v26 }
 0x41a   : > { %v566_v37 = vmul.f32 %v563_v62, %v1711_v25  ;;  %v567_v6 = vmul.f32 %v563_v62, %v1726_v34  ;;  %v407_v56 = vsel %vm333_vm2, %v1856_v41, %v1918_v32  ;;  %v431_v60 = vsel %vm430_vm3, %v1922_v59, %v1858_v46 }
 0x41b   : > { %v314_v15 = vadd.f32 %v311_v13, %v277_v24  ;;  %v315_v19 = vadd.f32 %v312_v0, %v278_v40  ;;  %v316_v29 = vadd.f32 %v313_v12, %v279_v44  ;;  %v578_v45 = vadd.f32 %v575_v18, %v565_v33  ;;  %v2689_v24 = vld [vmem:[#allocation25_spill] sm:$0xff]  ;;  %v2690_v33 = vld [vmem:[#allocation18_spill] sm:$0xff] }
 0x41c   : > { %v579_v38 = vadd.f32 %v576_v22, %v566_v37  ;;  %v580_v16 = vadd.f32 %v577_v28, %v567_v6  ;;  %v432_v0 = vsel %vm430_vm3, %v1858_v46, %v1929_v5  ;;  %v455_v12 = vsel %vm430_vm3, %v1940_v30, %v1860_v48 }
 0x41d   : > { %v339_v1 = vadd.f32 %v334_v43, %v314_v15  ;;  %v340_v31 = vadd.f32 %v335_v9, %v315_v19  ;;  %v341_v51 = vadd.f32 %v1906_v63, %v316_v29  ;;  %v588_v25 = vadd.f32 %v585_v4, %v578_v45 }
 0x41e   : > { %v589_v41 = vadd.f32 %v586_v61, %v579_v38  ;;  %v590_v13 = vadd.f32 %v587_v23, %v580_v16  ;;  %v618_v29 = vsel %vm617_vm4, %v1968_v11, %v1866_v53  ;;  %v619_v4 = vsel %vm617_vm4, %v1866_v53, %v1970_v7  ;;  %v2695_v16 = vld [vmem:[#allocation19_spill] sm:$0xff] }
 0x41f   : > { %v363_v18 = vadd.f32 %v358_v20, %v339_v1  ;;  %v364_v62 = vadd.f32 %v359_v49, %v340_v31  ;;  %v365_v59 = vadd.f32 %v1910_v21, %v341_v51  ;;  %v598_v28 = vadd.f32 %v595_v36, %v588_v25  ;;  %v2696_v1 = vld [vmem:[#allocation28_spill] sm:$0xff] }
 0x420   : > { %v599_v46 = vadd.f32 %v596_v39, %v589_v41  ;;  %v600_v63 = vadd.f32 %v597_v47, %v590_v13  ;;  %v456_v20 = vsel %vm430_vm3, %v1860_v48, %v1947_v17  ;;  %v642_v25 = vsel %vm617_vm4, %v1972_v10, %v1868_v55 }
 0x421   : > { %v387_v22 = vadd.f32 %v382_v54, %v363_v18  ;;  %v389_v30 = vadd.f32 %v1914_v27, %v365_v59  ;;  %v623_v61 = vadd.f32 %v618_v29, %v598_v28  ;;  %v388_v23 = vadd.f32 %v383_v35, %v364_v62  ;;  %v2691_v35 = vld [vmem:[#allocation26_spill] sm:$0xff]  ;;  %v2698_v62 = vld [vmem:[#allocation20_spill] sm:$0xff] }
 0x422   : > { %v624_v11 = vadd.f32 %v619_v4, %v599_v46  ;;  %v625_v36 = vadd.f32 %v1970_v7, %v600_v63  ;;  %v643_v47 = vsel %vm617_vm4, %v1868_v55, %v1974_v3  ;;  %v666_v27 = vsel %vm617_vm4, %v1976_v8, %v1870_v57  ;;  %v2699_v59 = vld [vmem:[#allocation30_spill] sm:$0xff]  ;;  %v2700_v63 = vld [vmem:[#allocation31_spill] sm:$0xff] }
 0x423   : > { %v647_v54 = vadd.f32 %v642_v25, %v623_v61  ;;  %v413_v53 = vadd.f32 %v1918_v32, %v389_v30  ;;  %v412_v21 = vadd.f32 %v407_v56, %v388_v23  ;;  %v411_v43 = vadd.f32 %v406_v14, %v387_v22  ;;  %v2693_v56 = vld [vmem:[#allocation24_spill] sm:$0xff]  ;;  %v2701_v61 = vld [vmem:[#allocation33_spill] sm:$0xff] }
 0x424   : > { %v648_v48 = vadd.f32 %v643_v47, %v624_v11  ;;  %v649_v39 = vadd.f32 %v1974_v3, %v625_v36  ;;  %v667_v10 = vsel %vm617_vm4, %v1870_v57, %v1978_v52  ;;  %v480_v32 = vsel %vm430_vm3, %v1862_v50, %v1959_v42  ;;  %v2702_v23 = vld [vmem:[#allocation32_spill] sm:$0xff]  ;;  %v2703_v36 = vld [vmem:[#allocation22_spill] sm:$0xff] }
 0x425   : > { %v671_v7 = vadd.f32 %v666_v27, %v647_v54  ;;  %v438_v9 = vadd.f32 %v1929_v5, %v413_v53  ;;  %v437_v55 = vadd.f32 %v432_v0, %v412_v21  ;;  %v690_v8 = vsel %vm617_vm4, %v1980_v2, %v1872_v58  ;;  %v2692_v2 = vld [vmem:[#allocation27_spill] sm:$0xff]  ;;  %v2704_v47 = vld [vmem:[#allocation34_spill] sm:$0xff] }
 0x426   : > { %v673_v49 = vadd.f32 %v1978_v52, %v649_v39  ;;  %v672_v3 = vadd.f32 %v667_v10, %v648_v48  ;;  %v691_v40 = vsel %vm617_vm4, %v1872_v58, %v2689_v24  ;;  %v715_v14 = vsel %vm714_vm1, %v2691_v35, %v2690_v33  ;;  %v2705_v39 = vld [vmem:[#allocation23_spill] sm:$0xff] }
 0x427   : > { %v462_v57 = vadd.f32 %v1947_v17, %v438_v9  ;;  %v461_v44 = vadd.f32 %v456_v20, %v437_v55  ;;  %v695_v5 = vadd.f32 %v690_v8, %v671_v7  ;;  %v436_v15 = vadd.f32 %v431_v60, %v411_v43  ;;  %v2694_v17 = vld [vmem:[#allocation17_spill] sm:$0xff]  ;;  %v2707_v7 = vld [vmem:[#allocation14_spill] sm:$0xff]  ;;  %v2708_v9 = vld [vmem:[#allocation35_spill] sm:$0xff] }
 0x428   : > { %v697_v37 = vadd.f32 %v2689_v24, %v673_v49  ;;  %v696_v6 = vadd.f32 %v691_v40, %v672_v3  ;;  %v716_v52 = vsel %vm714_vm1, %v2690_v33, %v2692_v2  ;;  %v504_v38 = vsel %vm430_vm3, %v2694_v17, %v2693_v56  ;;  %v2697_v60 = vld [vmem:[#allocation29_spill] sm:$0xff]  ;;  %v2710_v8 = vld [vmem:[#allocation39_spill] sm:$0xff]  ;;  %v2711_v24 = vld [vmem:[#allocation16_spill] sm:$0xff] }
 0x429   : > { %v486_v19 = vadd.f32 %v1959_v42, %v462_v57  ;;  %v485_v45 = vadd.f32 %v480_v32, %v461_v44  ;;  %v720_v58 = vadd.f32 %v715_v14, %v695_v5  ;;  %v739_v31 = vsel %vm714_vm1, %v2696_v1, %v2695_v16  ;;  %v2709_v32 = vld [vmem:[#allocation15_spill] sm:$0xff]  ;;  %v2719_v1 = vld [vmem:[#allocation12_spill] sm:$0xff] }
 0x42a   : > { %v722_v51 = vadd.f32 %v2692_v2, %v697_v37  ;;  %v721_v0 = vadd.f32 %v716_v52, %v696_v6  ;;  %v740_v41 = vsel %vm714_vm1, %v2695_v16, %v2697_v60  ;;  %v763_v28 = vsel %vm714_vm1, %v2699_v59, %v2698_v62  ;;  %v2712_v44 = vld [vmem:[#allocation51_spill] sm:$0xff]  ;;  %v2713_v37 = vld [vmem:[#allocation6_spill] sm:$0xff]  ;;  %v2714_v6 = vld [vmem:[#allocation40_spill] sm:$0xff] }
 0x42b   : > { %v510_v13 = vadd.f32 %v2693_v56, %v486_v19  ;;  %v509_v42 = vadd.f32 %v504_v38, %v485_v45  ;;  %v744_v18 = vadd.f32 %v739_v31, %v720_v58  ;;  %v460_v46 = vadd.f32 %v455_v12, %v436_v15  ;;  %v2715_v52 = vld [vmem:[#allocation13_spill] sm:$0xff]  ;;  %v2720_v31 = vld [vmem:[#allocation36_spill] sm:$0xff] }
 0x42c   : > { %v746_v29 = vadd.f32 %v2697_v60, %v722_v51  ;;  %v745_v4 = vadd.f32 %v740_v41, %v721_v0  ;;  %v764_v22 = vsel %vm714_vm1, %v2698_v62, %v2700_v63  ;;  %v787_v20 = vsel %vm714_vm1, %v2702_v23, %v2701_v61  ;;  %v2716_v19 = vld [vmem:[#allocation41_spill] sm:$0xff] }
 0x42d   : > { %521 = vrot.lane.b32.xlu1 %v510_v13, %s1597_s13  ;;  %519 = vrot.lane.b32.xlu0 %v509_v42, %s1597_s13  ;;  %v768_v30 = vadd.f32 %v763_v28, %v744_v18  ;;  %v479_v12 = vsel %vm430_vm3, %v2703_v36, %v1862_v50  ;;  %v788_v54 = vsel %vm714_vm1, %v2701_v61, %v2704_v47  ;;  %v2706_v50 = vld [vmem:[#allocation21_spill] sm:$0xff]  ;;  %v2721_v0 = vmov 10   ;;  %v2724_v18 = vld [vmem:[#allocation7_spill] sm:$0xff]  ;;  %v2726_v28 = vld [vmem:[#allocation10_spill] sm:$0xff] }
 0x42e   : > { %v770_v25 = vadd.f32 %v2700_v63, %v746_v29  ;;  %v769_v11 = vadd.f32 %v764_v22, %v745_v4  ;;  %v484_v48 = vadd.f32 %v479_v12, %v460_v46  ;;  %v503_v43 = vsel %vm430_vm3, %v2705_v39, %v2694_v17  ;;  %v2717_v17 = vld [vmem:[#allocation38_spill] sm:$0xff]  ;;  %v2718_v38 = vld [vmem:[#allocation9_spill] sm:$0xff]  ;;  %v2296_v22 = vpop.permute.xlu1 %921 }
 0x42f   : > { %v792_v53 = vadd.f32 %v787_v20, %v768_v30  ;;  %v937_v55 = vmul.f32 %v2708_v9, %v2707_v7  ;;  %v959_v49 = vmul.f32 %v2710_v8, %v2709_v32  ;;  %v536_v3 = vmul.f32 %v510_v13, %v510_v13  ;;  %v2723_v13 = vld [vmem:[#allocation4_spill] sm:$0xff] }
 0x430   : > { %v794_v21 = vadd.f32 %v2704_v47, %v770_v25  ;;  %v793_v27 = vadd.f32 %v788_v54, %v769_v11  ;;  %v508_v10 = vadd.f32 %v503_v43, %v484_v48  ;;  %v961_v40 = vmul.f32 %v2710_v8, %v2711_v24 }
 0x431   : > { %v983_v5 = vmul.f32 %v2712_v44, %v1714_v26  ;;  %v985_v35 = vmul.f32 %v2712_v44, %v1726_v34  ;;  %v535_v14 = vmul.f32 %v509_v42, %v509_v42  ;;  %v1009_v15 = vmul.f32 %v2714_v6, %v2713_v37 }
 0x432   : > { %805 = vrot.lane.b32.xlu1 %v794_v21, %s1595_s7  ;;  %803 = vrot.lane.b32.xlu0 %v793_v27, %s1595_s7  ;;  %v818_v57 = vmul.f32 %v794_v21, %v794_v21  ;;  %v534_v33 = vmul.f32 %v508_v10, %v508_v10  ;;  %v816_v2 = vmul.f32 %v792_v53, %v792_v53  ;;  %v2722_v41 = vmov 11   ;;  %v2298_v30 = vpop.permute.xlu1 %1231 }
 0x433   : > { %v1032_v45 = vmul.f32 %v2716_v19, %v2715_v52  ;;  %v817_v58 = vmul.f32 %v793_v27, %v793_v27  ;;  %v1034_v56 = vmul.f32 %v2716_v19, %v2707_v7  ;;  %v936_v16 = vmul.f32 %v2708_v9, %v2718_v38 }
 0x434   : > { %v1057_v51 = vmul.f32 %v2720_v31, %v2719_v1  ;;  %v960_v60 = vmul.f32 %v2710_v8, %v2719_v1  ;;  %v984_v42 = vmul.f32 %v2712_v44, %v2723_v13  ;;  %v1008_v62 = vmul.f32 %v2714_v6, %v2724_v18 }
 0x435   : > { %v2725_v59 = vmov 1   ;;  %v1010_v29 = vmul.f32 %v2714_v6, %v2726_v28  ;;  %v1033_v4 = vmul.f32 %v2716_v19, %v2718_v38  ;;  %v1056_v46 = vmul.f32 %v2720_v31, %v2709_v32 }
 0x436   : > { %517 = vrot.lane.b32.xlu1 %v508_v10, %s1597_s13  ;;  %844 = vperm.xlu0 %1564, %v2706_v50   ;;  %v1058_v63 = vmul.f32 %v2720_v31, %v2711_v24  ;;  %v2300_v61 = vpop.permute.xlu1 %1276 }
 0x43a   : > { %945 = vrot.lane.b32.xlu0 %v937_v55, %s1595_s7  ;;  %801 = vrot.lane.b32.xlu1 %v792_v53, %s1595_s7  ;;  %v2302_v23 = vpop.permute.xlu1 %1298 }
 0x43e   : > { %965 = vrot.lane.b32.xlu0 %v959_v49, %s1595_s7  ;;  %547 = vrot.lane.b32.xlu1 %v536_v3, %s1597_s13  ;;  %v2727_v49 = vld [vmem:[#allocation42_spill] sm:$0xff] }
 0x43f   : > { %v857_v3 = vmul.f32 %v2727_v49, %v2724_v18 }
 0x442   : > { %969 = vrot.lane.b32.xlu0 %v961_v40, %s1595_s7  ;;  %829 = vrot.lane.b32.xlu1 %v818_v57, %s1595_s7  ;;  %v858_v40 = vmul.f32 %v2727_v49, %v2713_v37 }
 0x446   : > { %989 = vrot.lane.b32.xlu0 %v983_v5, %s1598_s14  ;;  %543 = vrot.lane.b32.xlu1 %v534_v33, %s1597_s13  ;;  %v2728_v5 = vld [vmem:[#allocation43_spill] sm:$0xff] }
 0x447   : > { %v867_v33 = vmul.f32 %v2728_v5, %v2715_v52 }
 0x44a   : > { %993 = vrot.lane.b32.xlu0 %v985_v35, %s1598_s14  ;;  %545 = vrot.lane.b32.xlu1 %v535_v14, %s1597_s13  ;;  %v868_v35 = vmul.f32 %v2728_v5, %v2718_v38 }
 0x44e   : > { %1016 = vrot.lane.b32.xlu0 %v1009_v15, %s1598_s14  ;;  %825 = vrot.lane.b32.xlu1 %v816_v2, %s1595_s7  ;;  %v2729_v2 = vld [vmem:[#allocation37_spill] sm:$0xff] }
 0x44f   : > { %v877_v19 = vmul.f32 %v2729_v2, %v2709_v32 }
 0x452   : > { %1038 = vrot.lane.b32.xlu0 %v1032_v45, %s1598_s14  ;;  %827 = vrot.lane.b32.xlu1 %v817_v58, %s1595_s7  ;;  %v878_v45 = vmul.f32 %v2729_v2, %v2719_v1 }
 0x456   : > { %1042 = vrot.lane.b32.xlu0 %v1034_v56, %s1598_s14  ;;  %1343 = vperm.xlu1 %1565, %v2717_v17  }
 0x45a   : > { %1064 = vrot.lane.b32.xlu0 %v1057_v51, %s1598_s14  ;;  %943 = vrot.lane.b32.xlu1 %v936_v16, %s1595_s7 }
 0x45b   : > { %1566 = vset.pattern.permute.xlu1 %v2721_v0  ;;  %v2730_v0 = vld [vmem:[#allocation46_spill] sm:$0xff] }
 0x45e   : > { %1365 = vperm.xlu1 %1566, %v2717_v17  }
 0x462   : > { %967 = vrot.lane.b32.xlu1 %v960_v60, %s1595_s7  ;;  %v2731_v60 = vld [vmem:[#allocation44_spill] sm:$0xff] }
 0x463   : > { %1567 = vset.pattern.permute.xlu1 %v2722_v41 }
 0x466   : > { %1387 = vperm.xlu1 %1567, %v2717_v17  }
 0x46a   : > { %991 = vrot.lane.b32.xlu1 %v984_v42, %s1598_s14  ;;  %v900_v42 = vsel %vm714_vm1, %v2731_v60, %v2730_v0  ;;  %v2737_v60 = vmov 2  }
 0x46b   : > { %1568 = vset.pattern.permute.xlu1 %v2725_v59 }
 0x46e   : > { %1014 = vrot.lane.b32.xlu1 %v1008_v62, %s1598_s14  ;;  %v2732_v62 = vld [vmem:[#allocation45_spill] sm:$0xff] }
 0x472   : > { %1018 = vrot.lane.b32.xlu1 %v1010_v29, %s1598_s14 }
 0x476   : > { %1040 = vrot.lane.b32.xlu1 %v1033_v4, %s1598_s14  ;;  %v2733_v4 = vld [vmem:[#allocation47_spill] sm:$0xff] }
 0x47a   : > { %1062 = vrot.lane.b32.xlu1 %v1056_v46, %s1598_s14  ;;  %v924_v46 = vsel %vm714_vm1, %v2733_v4, %v2296_v22 }
 0x47e   : > { %1066 = vrot.lane.b32.xlu1 %v1058_v63, %s1598_s14 }
 0x49f   : > { %v522_v20 = vpop.permute.xlu1 %521  ;;  %v520_v25 = vpop.permute.xlu0 %519 }
 0x4a0   : > { %v525_v36 = vsel %vm523_vm5, %v520_v25, %v522_v20  ;;  %v2734_v20 = vld [vmem:[#allocation48_spill] sm:$0xff] }
 0x4a1   : > { %v530_v53 = vsel %vm528_vm6, %v525_v36, 0.0 }
 0x4a4   : > { %v806_v11 = vpop.permute.xlu1 %805  ;;  %v804_v12 = vpop.permute.xlu0 %803 }
 0x4a5   : > { %v808_v27 = vsel %vm714_vm1, %v804_v12, %v806_v11 }
 0x4a6   : > { %v812_v10 = vsel %vm528_vm6, %v808_v27, 0.0 }
 0x4a8   : > { %v518_v47 = vpop.permute.xlu1 %517 }
 0x4a9   : > { %v524_v54 = vsel %vm523_vm5, %v518_v47, %v520_v25 }
 0x4aa   : > { %v529_v21 = vsel %vm528_vm6, %v524_v54, 0.0 }
 0x4ab   : > { %v531_v48 = vadd.f32 %v530_v53, %v529_v21 }
 0x4ac   : > { %v802_v39 = vpop.permute.xlu1 %801 }
 0x4ad   : > { %v807_v43 = vsel %vm714_vm1, %v802_v39, %v804_v12  ;;  %532 = vadd.xlane.f32.xlu0 %v531_v48 }
 0x4ae   : > { %v811_v50 = vsel %vm528_vm6, %v807_v43, 0.0 }
 0x4af   : > { %v813_v9 = vadd.f32 %v812_v10, %v811_v50 }
 0x4b0   : > { %v548_v55 = vpop.permute.xlu1 %547 }
 0x4b1   : > { %814 = vadd.xlane.f32.xlu0 %v813_v9  ;;  %v845_v8 = vpop.permute.xlu0 %844 }
 0x4b2   : > { %v847_v57 = vmul.f32 %v845_v8, %v1714_v26  ;;  %v848_v44 = vmul.f32 %v845_v8, %v2723_v13 }
 0x4b4   : > { %v860_v14 = vadd.f32 %v857_v3, %v847_v57  ;;  %v861_v6 = vadd.f32 %v858_v40, %v848_v44  ;;  %v830_v15 = vpop.permute.xlu1 %829  ;;  %v1236_v40 = vmul.f32 %v2298_v30, %v1726_v34  ;;  %v2736_v44 = vld [vmem:[#allocation50_spill] sm:$0xff] }
 0x4b5   : > { %v2344_v43 = vpop.permute.xlu0 %945 }
 0x4b6   : > { %v870_v58 = vadd.f32 %v867_v33, %v860_v14  ;;  %v871_v56 = vadd.f32 %v868_v35, %v861_v6  ;;  %v1258_v33 = vmul.f32 %v2736_v44, %v2713_v37  ;;  %v1279_v6 = vmul.f32 %v2300_v61, %v2715_v52 }
 0x4b8   : > { %v544_v16 = vpop.permute.xlu1 %543  ;;  %v880_v31 = vadd.f32 %v877_v19, %v870_v58  ;;  %v881_v51 = vadd.f32 %v878_v45, %v871_v56  ;;  %v1281_v58 = vmul.f32 %v2300_v61, %v2707_v7 }
 0x4b9   : > { %v966_v3 = vpop.permute.xlu0 %965 }
 0x4ba   : > { %v904_v59 = vadd.f32 %v2732_v62, %v880_v31  ;;  %v905_v29 = vadd.f32 %v900_v42, %v881_v51  ;;  %v1302_v31 = vmul.f32 %v2302_v23, %v2719_v1  ;;  %v1234_v42 = vmul.f32 %v2298_v30, %v1714_v26 }
 0x4bc   : > { %v546_v63 = vpop.permute.xlu1 %545  ;;  %v2334_v25 = vadd.f32 %v2734_v20, %v904_v59  ;;  %v2336_v11 = vadd.f32 %v924_v46, %v905_v29  ;;  %v879_v59 = vmul.f32 %v2729_v2, %v2711_v24 }
 0x4bd   : > { %v549_v36 = vsel %vm523_vm5, %v544_v16, %v546_v63  ;;  %v550_v12 = vsel %vm523_vm5, %v546_v63, %v548_v55  ;;  %v2735_v55 = vmov 3   ;;  %v2359_v35 = vpop.permute.xlu0 %969 }
 0x4be   : > { %v553_v47 = vsel %vm528_vm6, %v549_v36, 0.0  ;;  %v554_v54 = vsel %vm528_vm6, %v550_v12, 0.0  ;;  %v1257_v36 = vmul.f32 %v2736_v44, %v2724_v18 }
 0x4bf   : > { %v555_v53 = vadd.f32 %v554_v54, %v553_v47 }
 0x4c0   : > { %v826_v21 = vpop.permute.xlu1 %825 }
 0x4c1   : > { %556 = vadd.xlane.f32.xlu1 %v555_v53  ;;  %v990_v19 = vpop.permute.xlu0 %989 }
 0x4c4   : > { %v828_v27 = vpop.permute.xlu1 %827 }
 0x4c5   : > { %v831_v48 = vsel %vm714_vm1, %v826_v21, %v828_v27  ;;  %v832_v39 = vsel %vm714_vm1, %v828_v27, %v830_v15  ;;  %v849_v15 = vmul.f32 %v845_v8, %v1726_v34  ;;  %v869_v8 = vmul.f32 %v2728_v5, %v2707_v7  ;;  %v994_v51 = vpop.permute.xlu0 %993  ;;  %v2738_v5 = vld [vmem:[#allocation52_spill] sm:$0xff] }
 0x4c6   : > { %v835_v10 = vsel %vm528_vm6, %v831_v48, 0.0  ;;  %v836_v50 = vsel %vm528_vm6, %v832_v39, 0.0  ;;  %v1323_v29 = vmul.f32 %v2738_v5, %v1714_v26  ;;  %v1325_v20 = vmul.f32 %v2738_v5, %v1726_v34 }
 0x4c7   : > { %v837_v9 = vadd.f32 %v836_v50, %v835_v10  ;;  %1126 = vperm.xlu0 %1564, %v2717_v17   ;;  %v1280_v39 = vmul.f32 %v2300_v61, %v2718_v38 }
 0x4c9   : > { %838 = vadd.xlane.f32.xlu1 %v837_v9  ;;  %v1017_v46 = vpop.permute.xlu0 %1016 }
 0x4cb   : > { %1570 = vset.pattern.permute.xlu0 %v2735_v55 }
 0x4cc   : > { %1205 = vperm.xlu0 %1570, %v2717_v17  }
 0x4cd   : > { %v1039_v47 = vpop.permute.xlu0 %1038 }
 0x4d0   : > { %1244 = vrot.lane.b32.xlu0 %v1236_v40, %s1599_s15 }
 0x4d1   : > { %v2354_v57 = vpop.permute.xlu1 %1343  ;;  %1571 = vset.pattern.permute.xlu0 %v2722_v41  ;;  %v859_v41 = vmul.f32 %v2727_v49, %v2726_v28 }
 0x4d2   : > { %v1347_v26 = vmul.f32 %v2354_v57, %v2713_v37  ;;  %v2739_v37 = vld [vmem:[#allocation49_spill] sm:$0xff] }
 0x4d3   : > { %v862_v56 = vadd.f32 %v859_v41, %v849_v15 }
 0x4d4   : > { %1265 = vrot.lane.b32.xlu0 %v1258_v33, %s1599_s15 }
 0x4d5   : > { %v944_v14 = vpop.permute.xlu1 %943  ;;  %v872_v49 = vadd.f32 %v869_v8, %v862_v56  ;;  %v1303_v8 = vmul.f32 %v2302_v23, %v2711_v24 }
 0x4d6   : > { %v947_v54 = vsel %vm714_vm1, %v2739_v37, %v944_v14  ;;  %v948_v10 = vsel %vm714_vm1, %v944_v14, %v2344_v43 }
 0x4d7   : > { %v882_v4 = vadd.f32 %v879_v59, %v872_v49  ;;  %v952_v48 = vadd.f32 %v947_v54, %v2334_v25  ;;  %v953_v40 = vadd.f32 %v948_v10, %v2336_v11 }
 0x4d8   : > { %1285 = vrot.lane.b32.xlu0 %v1279_v6, %s1599_s15 }
 0x4d9   : > { %v2366_v45 = vpop.permute.xlu1 %1365  ;;  %v906_v2 = vadd.f32 %v2730_v0, %v882_v4  ;;  %v1259_v0 = vmul.f32 %v2736_v44, %v2726_v28  ;;  %v1324_v4 = vmul.f32 %v2738_v5, %v2723_v13 }
 0x4da   : > { %1153 = vperm.xlu1 %1568, %v2717_v17   ;;  %v1368_v34 = vmul.f32 %v2366_v45, %v2715_v52  ;;  %v1370_v52 = vmul.f32 %v2366_v45, %v2707_v7 }
 0x4dc   : > { %1289 = vrot.lane.b32.xlu0 %v1281_v58, %s1599_s15 }
 0x4dd   : > { %v968_v16 = vpop.permute.xlu1 %967 }
 0x4de   : > { %1569 = vset.pattern.permute.xlu1 %v2737_v60  ;;  %v971_v21 = vsel %vm714_vm1, %v966_v3, %v968_v16  ;;  %v972_v3 = vsel %vm714_vm1, %v968_v16, %v2359_v35 }
 0x4df   : > { %1179 = vperm.xlu1 %1569, %v2717_v17   ;;  %v1235_v17 = vmul.f32 %v2298_v30, %v2723_v13  ;;  %v930_v30 = vadd.f32 %v2296_v22, %v906_v2  ;;  %v1043_v22 = vpop.permute.xlu0 %1042  ;;  %v976_v55 = vadd.f32 %v971_v21, %v952_v48  ;;  %v977_v41 = vadd.f32 %v972_v3, %v953_v40  ;;  %v1121_v3 = vld [vmem:[%s1632_s18] sm:$0xff]  ;;  %v2741_v40 = vld [vmem:[#allocation3_spill] sm:$0xff] }
 0x4e0   : > { %1309 = vrot.lane.b32.xlu0 %v1302_v31, %s1599_s15  ;;  %v1369_v13 = vmul.f32 %v2366_v45, %v2718_v38 }
 0x4e1   : > { %v2383_v62 = vpop.permute.xlu1 %1387  ;;  %v954_v27 = vadd.f32 %v2344_v43, %v930_v30  ;;  %v1301_v43 = vmul.f32 %v2302_v23, %v2709_v32  ;;  %v1346_v23 = vmul.f32 %v2354_v57, %v2724_v18 }
 0x4e2   : > { %v1391_v61 = vmul.f32 %v2383_v62, %v2719_v1  ;;  %v1390_v5 = vmul.f32 %v2383_v62, %v2709_v32  ;;  %v1392_v18 = vmul.f32 %v2383_v62, %v2711_v24  ;;  %v1424_v32 = vld [vmem:[%s2559_s2] sm:$0xff] }
 0x4e3   : > { %1240 = vrot.lane.b32.xlu1 %v1234_v42, %s1599_s15  ;;  %v978_v7 = vadd.f32 %v2359_v35, %v954_v27 }
 0x4e4   : > { %1329 = vrot.lane.b32.xlu0 %v1323_v29, %s1600_s16 }
 0x4e5   : > { %v992_v63 = vpop.permute.xlu1 %991  ;;  %v1003_v15 = vadd.f32 %v994_v51, %v978_v7 }
 0x4e6   : > { %v996_v50 = vsel %vm995_vm7, %v990_v19, %v992_v63  ;;  %v997_v33 = vsel %vm995_vm7, %v992_v63, %v994_v51  ;;  %v1065_v19 = vpop.permute.xlu0 %1064 }
 0x4e7   : > { %1242 = vrot.lane.b32.xlu1 %v1235_v17, %s1599_s15  ;;  %v1001_v44 = vadd.f32 %v996_v50, %v976_v55  ;;  %v1002_v1 = vadd.f32 %v997_v33, %v977_v41 }
 0x4e8   : > { %1333 = vrot.lane.b32.xlu0 %v1325_v20, %s1600_s16  ;;  %v1348_v20 = vmul.f32 %v2354_v57, %v2726_v28 }
 0x4e9   : > { %v1015_v12 = vpop.permute.xlu1 %1014 }
 0x4ea   : > { %v1020_v25 = vsel %vm995_vm7, %v1015_v12, %v1017_v46 }
 0x4eb   : > { %1263 = vrot.lane.b32.xlu1 %v1257_v36, %s1599_s15  ;;  %v1025_v35 = vadd.f32 %v1020_v25, %v1001_v44  ;;  %v2740_v25 = vld [vmem:[#allocation5_spill] sm:$0xff]  ;;  %v2742_v44 = vld [vmem:[#allocation2_spill] sm:$0xff] }
 0x4ec   : > { %1354 = vrot.lane.b32.xlu0 %v1347_v26, %s1600_s16  ;;  %v1159_v7 = vrot.slane %v1121_v3, %v2740_v25  ;;  %v2745_v41 = vsub.s32 4, %v2742_v44 }
 0x4ed   : > { %v1019_v53 = vpop.permute.xlu1 %1018 }
 0x4ee   : > { %v1021_v11 = vsel %vm995_vm7, %v1017_v46, %v1019_v53  ;;  %v1027_v56 = vadd.f32 %v1019_v53, %v1003_v15 }
 0x4ef   : > { %1267 = vrot.lane.b32.xlu1 %v1259_v0, %s1599_s15  ;;  %v1026_v60 = vadd.f32 %v1021_v11, %v1002_v1  ;;  %v1439_v0 = vld [vmem:[%s2560_s3] sm:$0xff]  ;;  %v1169_v11 = vrot.slane %v1159_v7, %v2740_v25 }
 0x4f0   : > { %1374 = vrot.lane.b32.xlu0 %v1368_v34, %s1600_s16  ;;  %v1051_v29 = vadd.f32 %v1043_v22, %v1027_v56 }
 0x4f1   : > { %v1041_v9 = vpop.permute.xlu1 %1040 }
 0x4f2   : > { %v1044_v14 = vsel %vm995_vm7, %v1039_v47, %v1041_v9  ;;  %v1045_v31 = vsel %vm995_vm7, %v1041_v9, %v1043_v22 }
 0x4f3   : > { %1287 = vrot.lane.b32.xlu1 %v1280_v39, %s1599_s15  ;;  %v1049_v16 = vadd.f32 %v1044_v14, %v1025_v35  ;;  %v1050_v59 = vadd.f32 %v1045_v31, %v1026_v60  ;;  %v2744_v14 = vld [vmem:[#allocation8_spill] sm:$0xff]  ;;  %v1137_v35 = vrot.slane %v1121_v3, %v2745_v41 }
 0x4f4   : > { %1378 = vrot.lane.b32.xlu0 %v1370_v52, %s1600_s16 }
 0x4f5   : > { %v1063_v6 = vpop.permute.xlu1 %1062 }
 0x4f6   : > { %v1068_v58 = vsel %vm995_vm7, %v1063_v6, %v1065_v19  ;;  %v1185_v6 = vrot.slane %v1121_v3, %v2744_v14 }
 0x4f7   : > { %1307 = vrot.lane.b32.xlu1 %v1301_v43, %s1599_s15  ;;  %v1073_v49 = vadd.f32 %v1068_v58, %v1049_v16  ;;  %v2743_v43 = vsub.s32 5, %v2742_v44  ;;  %v2746_v58 = vsub.s32 6, %v2742_v44  ;;  %v2747_v16 = vld [vmem:[#allocation11_spill] sm:$0xff] }
 0x4f8   : > { %1398 = vrot.lane.b32.xlu0 %v1391_v61, %s1600_s16  ;;  %v1133_v61 = vrot.slane %v1121_v3, %v2741_v40 }
 0x4f9   : > { %v1067_v51 = vpop.permute.xlu1 %1066  ;;  %v1097_v28 = vmul.f32 %v1073_v49, %v1073_v49  ;;  %v1163_v33 = vrot.slane %v1121_v3, %v2743_v43  ;;  %v1189_v1 = vrot.slane %v1121_v3, %v2746_v58 }
 0x4fa   : > { %v1069_v42 = vsel %vm995_vm7, %v1065_v19, %v1067_v51  ;;  %v1075_v17 = vadd.f32 %v1067_v51, %v1051_v29  ;;  %v1143_v56 = vrot.slane %v1133_v61, %v2741_v40  ;;  %v1195_v51 = vrot.slane %v1185_v6, %v2744_v14 }
 0x4fb   : > { %1311 = vrot.lane.b32.xlu1 %v1303_v8, %s1599_s15  ;;  %v1074_v46 = vadd.f32 %v1069_v42, %v1050_v59  ;;  %v1211_v8 = vrot.slane %v1121_v3, %v2747_v16  ;;  %v1173_v31 = vrot.slane %v1163_v33, %v2740_v25  ;;  %v2748_v42 = vsub.s32 7, %v2742_v44 }
 0x4fc   : > { %1082 = vrot.lane.b32.xlu0 %v1073_v49, %s1594_s6  ;;  %v1099_v57 = vmul.f32 %v1075_v17, %v1075_v17  ;;  %v1147_v49 = vrot.slane %v1137_v35, %v2741_v40 }
 0x4fd   : > { %v1098_v63 = vmul.f32 %v1074_v46, %v1074_v46  ;;  %v1215_v59 = vrot.slane %v1121_v3, %v2748_v42 }
 0x4ff   : > { %1331 = vrot.lane.b32.xlu1 %v1324_v4, %s1600_s16  ;;  %v1199_v4 = vrot.slane %v1189_v1, %v2744_v14 }
 0x500   : > { %1086 = vrot.lane.b32.xlu0 %v1075_v17, %s1594_s6 }
 0x503   : > { %1352 = vrot.lane.b32.xlu1 %v1346_v23, %s1600_s16  ;;  %v1221_v23 = vrot.slane %v1211_v8, %v2747_v16 }
 0x504   : > { %1108 = vrot.lane.b32.xlu0 %v1098_v63, %s1594_s6 }
 0x507   : > { %1356 = vrot.lane.b32.xlu1 %v1348_v20, %s1600_s16 }
 0x50b   : > { %1376 = vrot.lane.b32.xlu1 %v1369_v13, %s1600_s16 }
 0x50f   : > { %1396 = vrot.lane.b32.xlu1 %v1390_v5, %s1600_s16 }
 0x513   : > { %1400 = vrot.lane.b32.xlu1 %v1392_v18, %s1600_s16  ;;  %v1225_v18 = vrot.slane %v1215_v59, %v2747_v16 }
 0x517   : > { %1084 = vrot.lane.b32.xlu1 %v1074_v46, %s1594_s6 }
 0x51b   : > { %1106 = vrot.lane.b32.xlu1 %v1097_v28, %s1594_s6 }
 0x51f   : > { %1110 = vrot.lane.b32.xlu1 %v1099_v57, %s1594_s6 }
 0x536   : > { %v533_v38 = vpop.xlane.xlu0 %532 }
 0x53a   : > { %v815_v45 = vpop.xlane.xlu0 %814 }
 0x53b   : > { %v1427_v2 = vrot.slane %v815_v45, 4 }
 0x53d   : > { %v1432_v24 = vsel %vm528_vm6, %v533_v38, %v1427_v2 }
 0x53e   : > { %v1434_v62 = vadd.f32 %v1432_v24, %v1424_v32 }
 0x540   : > { %1437 = vst.msk [vmem:[%s2559_s2] sm:$0xff] %vm1436_vm8, %v1434_v62 }
 0x542   : > { %v1127_v26 = vpop.permute.xlu0 %1126 }
 0x543   : > { %v1148_v17 = vmul.f32 %v1143_v56, %v1127_v26  ;;  %v1149_v5 = vmul.f32 %v1147_v49, %v1127_v26 }
 0x547   : > { %v1206_v36 = vpop.permute.xlu0 %1205 }
 0x548   : > { %v1226_v38 = vmul.f32 %v1221_v23, %v1206_v36  ;;  %v1227_v62 = vmul.f32 %v1225_v18, %v1206_v36 }
 0x54a   : > { %v557_v47 = vpop.xlane.xlu1 %556 }
 0x54b   : > { %v1245_v12 = vpop.permute.xlu0 %1244 }
 0x54f   : > { %v2477_v30 = vpop.permute.xlu0 %1265 }
 0x552   : > { %v839_v34 = vpop.xlane.xlu1 %838 }
 0x553   : > { %v1442_v37 = vrot.slane %v839_v34, 4  ;;  %v1286_v21 = vpop.permute.xlu0 %1285 }
 0x555   : > { %v1447_v54 = vsel %vm528_vm6, %v557_v47, %v1442_v37 }
 0x556   : > { %v1449_v53 = vadd.f32 %v1447_v54, %v1439_v0  ;;  %v1154_v27 = vpop.permute.xlu1 %1153 }
 0x557   : > { %v1290_v48 = vpop.permute.xlu0 %1289  ;;  %v1174_v29 = vmul.f32 %v1169_v11, %v1154_v27  ;;  %v1175_v63 = vmul.f32 %v1173_v31, %v1154_v27 }
 0x558   : > { %1451 = vst.msk [vmem:[%s2560_s3] sm:$0xff] %vm1436_vm8, %v1449_v53 }
 0x559   : > { %v1176_v28 = vadd.f32 %v1174_v29, %v1148_v17  ;;  %v1177_v45 = vadd.f32 %v1175_v63, %v1149_v5 }
 0x55a   : > { %v1180_v22 = vpop.permute.xlu1 %1179 }
 0x55b   : > { %v1310_v39 = vpop.permute.xlu0 %1309  ;;  %v1200_v20 = vmul.f32 %v1195_v51, %v1180_v22  ;;  %v1201_v57 = vmul.f32 %v1199_v4, %v1180_v22 }
 0x55d   : > { %v1202_v32 = vadd.f32 %v1200_v20, %v1176_v28  ;;  %v1203_v47 = vadd.f32 %v1201_v57, %v1177_v45 }
 0x55e   : > { %v1241_v52 = vpop.permute.xlu1 %1240 }
 0x55f   : > { %v1330_v9 = vpop.permute.xlu0 %1329  ;;  %v1228_v0 = vadd.f32 %v1226_v38, %v1202_v32  ;;  %v1229_v53 = vadd.f32 %v1227_v62, %v1203_v47 }
 0x562   : > { %v1243_v10 = vpop.permute.xlu1 %1242 }
 0x563   : > { %v1334_v15 = vpop.permute.xlu0 %1333  ;;  %v1247_v34 = vsel %vm1246_vm9, %v1241_v52, %v1243_v10  ;;  %v1248_v54 = vsel %vm1246_vm9, %v1243_v10, %v1245_v12 }
 0x564   : > { %v1251_v27 = vadd.f32 %v1247_v34, %v1228_v0  ;;  %v1252_v7 = vadd.f32 %v1248_v54, %v1229_v53  ;;  %v1425_v54 = vld [vmem:[%s2559_s2 + $0x8] sm:$0xff] }
 0x566   : > { %v1264_v50 = vpop.permute.xlu1 %1263 }
 0x567   : > { %v1355_v46 = vpop.permute.xlu0 %1354  ;;  %v1269_v26 = vsel %vm1246_vm9, %v1264_v50, %v2477_v30 }
 0x568   : > { %v1273_v36 = vadd.f32 %v1269_v26, %v1251_v27 }
 0x56a   : > { %v1268_v55 = vpop.permute.xlu1 %1267 }
 0x56b   : > { %v1375_v2 = vpop.permute.xlu0 %1374  ;;  %v1270_v3 = vsel %vm1246_vm9, %v2477_v30, %v1268_v55 }
 0x56c   : > { %v1274_v12 = vadd.f32 %v1270_v3, %v1252_v7 }
 0x56e   : > { %v1288_v19 = vpop.permute.xlu1 %1287 }
 0x56f   : > { %v1379_v22 = vpop.permute.xlu0 %1378  ;;  %v1291_v25 = vsel %vm1246_vm9, %v1286_v21, %v1288_v19  ;;  %v1292_v52 = vsel %vm1246_vm9, %v1288_v19, %v1290_v48 }
 0x570   : > { %v1295_v10 = vadd.f32 %v1291_v25, %v1273_v36  ;;  %v1296_v43 = vadd.f32 %v1292_v52, %v1274_v12  ;;  %v1440_v25 = vld [vmem:[%s2560_s3 + $0x8] sm:$0xff] }
 0x572   : > { %v1308_v60 = vpop.permute.xlu1 %1307 }
 0x573   : > { %v1313_v61 = vsel %vm1246_vm9, %v1308_v60, %v1310_v39  ;;  %v1399_v14 = vpop.permute.xlu0 %1398 }
 0x574   : > { %v1317_v33 = vadd.f32 %v1313_v61, %v1295_v10 }
 0x576   : > { %v1312_v13 = vpop.permute.xlu1 %1311 }
 0x577   : > { %v1314_v50 = vsel %vm1246_vm9, %v1310_v39, %v1312_v13  ;;  %v1083_v1 = vpop.permute.xlu0 %1082 }
 0x578   : > { %v1318_v6 = vadd.f32 %v1314_v50, %v1296_v43 }
 0x57a   : > { %v1332_v24 = vpop.permute.xlu1 %1331 }
 0x57b   : > { %v1336_v44 = vsel %vm1335_vm10, %v1330_v9, %v1332_v24  ;;  %v1337_v21 = vsel %vm1335_vm10, %v1332_v24, %v1334_v15  ;;  %v1087_v49 = vpop.permute.xlu0 %1086 }
 0x57c   : > { %v1340_v41 = vadd.f32 %v1336_v44, %v1317_v33  ;;  %v1341_v35 = vadd.f32 %v1337_v21, %v1318_v6 }
 0x57e   : > { %v1353_v37 = vpop.permute.xlu1 %1352 }
 0x57f   : > { %v1358_v55 = vsel %vm1335_vm10, %v1353_v37, %v1355_v46  ;;  %v1109_v57 = vpop.permute.xlu0 %1108 }
 0x580   : > { %v1362_v11 = vadd.f32 %v1358_v55, %v1340_v41 }
 0x582   : > { %v1357_v40 = vpop.permute.xlu1 %1356 }
 0x583   : > { %v1359_v48 = vsel %vm1335_vm10, %v1355_v46, %v1357_v40 }
 0x584   : > { %v1363_v56 = vadd.f32 %v1359_v48, %v1341_v35 }
 0x586   : > { %v1377_v30 = vpop.permute.xlu1 %1376 }
 0x587   : > { %v1380_v19 = vsel %vm1335_vm10, %v1375_v2, %v1377_v30  ;;  %v1381_v39 = vsel %vm1335_vm10, %v1377_v30, %v1379_v22 }
 0x588   : > { %v1384_v16 = vadd.f32 %v1380_v19, %v1362_v11  ;;  %v1385_v8 = vadd.f32 %v1381_v39, %v1363_v56 }
 0x58a   : > { %v1397_v58 = vpop.permute.xlu1 %1396 }
 0x58b   : > { %v1402_v9 = vsel %vm1335_vm10, %v1397_v58, %v1399_v14 }
 0x58c   : > { %v1406_v15 = vadd.f32 %v1402_v9, %v1384_v16 }
 0x58e   : > { %v1401_v31 = vpop.permute.xlu1 %1400  ;;  %v1410_v42 = vsel %vm528_vm6, %v1406_v15, 0.0  ;;  %v1415_v63 = vmul.f32 %v1406_v15, %v1406_v15 }
 0x58f   : > { %v1403_v51 = vsel %vm1335_vm10, %v1399_v14, %v1401_v31 }
 0x590   : > { %v1407_v60 = vadd.f32 %v1403_v51, %v1385_v8  ;;  %v1419_v38 = vsel %vm528_vm6, %v1415_v63, 0.0 }
 0x592   : > { %v1411_v59 = vsel %vm528_vm6, %v1407_v60, 0.0  ;;  %v1416_v29 = vmul.f32 %v1407_v60, %v1407_v60  ;;  %v1085_v4 = vpop.permute.xlu1 %1084 }
 0x593   : > { %v1088_v46 = vsel %vm617_vm4, %v1083_v1, %v1085_v4  ;;  %v1089_v17 = vsel %vm617_vm4, %v1085_v4, %v1087_v49  ;;  %v1412_v23 = vadd.f32 %v1411_v59, %v1410_v42 }
 0x594   : > { %v1092_v20 = vsel %vm528_vm6, %v1088_v46, 0.0  ;;  %v1093_v13 = vsel %vm528_vm6, %v1089_v17, 0.0  ;;  %v1420_v28 = vsel %vm528_vm6, %v1416_v29, 0.0 }
 0x595   : > { %v1094_v5 = vadd.f32 %v1093_v13, %v1092_v20  ;;  %1413 = vadd.xlane.f32.xlu1 %v1412_v23  ;;  %v1421_v32 = vadd.f32 %v1420_v28, %v1419_v38 }
 0x596   : > { %v1107_v18 = vpop.permute.xlu1 %1106 }
 0x597   : > { %1095 = vadd.xlane.f32.xlu0 %v1094_v5  ;;  %v1112_v45 = vsel %vm617_vm4, %v1107_v18, %v1109_v57 }
 0x598   : > { %v1116_v62 = vsel %vm528_vm6, %v1112_v45, 0.0 }
 0x59a   : > { %v1111_v2 = vpop.permute.xlu1 %1110 }
 0x59b   : > { %v1113_v24 = vsel %vm617_vm4, %v1109_v57, %v1111_v2  ;;  %1422 = vadd.xlane.f32.xlu0 %v1421_v32 }
 0x59c   : > { %v1117_v47 = vsel %vm528_vm6, %v1113_v24, 0.0 }
 0x59d   : > { %v1118_v34 = vadd.f32 %v1117_v47, %v1116_v62 }
 0x59f   : > { %1119 = vadd.xlane.f32.xlu0 %v1118_v34 }
 0x61e   : > { %v1414_v0 = vpop.xlane.xlu1 %1413 }
 0x61f   : > { %v1430_v37 = vrot.slane %v1414_v0, 4 }
 0x620   : > { %v1096_v26 = vpop.xlane.xlu0 %1095 }
 0x621   : > { %v1433_v53 = vsel %vm528_vm6, %v1096_v26, %v1430_v37 }
 0x622   : > { %v1435_v27 = vadd.f32 %v1433_v53, %v1425_v54 }
 0x624   : > { %1438 = vst.msk [vmem:[%s2559_s2 + $0x8] sm:$0xff] %vm1436_vm8, %v1435_v27  ;;  %v1423_v22 = vpop.xlane.xlu0 %1422 }
 0x625   : > { %v1445_v3 = vrot.slane %v1423_v22, 4 }
 0x628   : > { %v1120_v7 = vpop.xlane.xlu0 %1119 }
 0x629   : > { %v1448_v36 = vsel %vm528_vm6, %v1120_v7, %v1445_v3 }
 0x62a   : > { %v1450_v40 = vadd.f32 %v1448_v36, %v1440_v25 }
 0x62c   : > { %1452 = vst.msk [vmem:[%s2560_s3 + $0x8] sm:$0xff] %vm1436_vm8, %v1450_v40 }
 0x62d PF: > { %s14_s12 = sadd.s32 1, %s1578_s12  }
 0x62e   : > { %p11_p5 = scmp.ge.s32.totalorder %s14_s12, 4  }
 0x630   :  { %13 = sbr.rel (!%p11_p5) target bundleno = 1 (0x1), region = 69 }

// kernel: aspp_block.3
= control target key start
LH: loop header
LB: loop body
LE: loop exit
PB: predicated region body
PF: predicated region fallthrough
CT: control target
= control target key end

     0   :  { %9 = vsyncpa [#allocation3], 0  ;;  %s2895_s0 = inlined_call_operand.vmem [shape: f32[2,4,292], index: 0, kind: input, shape index: {}]   ;;  %s2896_s1 = inlined_call_operand.vmem [shape: f32[4,4,12], index: 1, kind: input, shape index: {}]   ;;  %s2897_s2 = inlined_call_operand.vmem [shape: f32[16,1], index: 2, kind: input, shape index: {}]   ;;  %s2898_s3 = inlined_call_operand.vmem [shape: f32[16,1], index: 3, kind: input, shape index: {}]   ;;  %s2899_s4 = inlined_call_operand.hbm [shape: f32[2,16,256], index: 4, kind: output, shape index: {}]  }
   0x1   :  { %11 = vsyncpa [#allocation3 + $0x1], 0  ;;  %s2016_s15 = smov 0   ;;  %s2018_s16 = smov 0  }
   0x2   :  { %s2020_s17 = smov 0   ;;  %s2022_s18 = smov 0  }
   0x3 LB: > { %s2037_s19 = sadd.s32 4294967295, %s1966_s18   ;;  %s1780_s20 = sadd.s32 4294967294, %s1966_s18   ;;  %s1966_s18 = sphi %s2022_s18, %s2996_s18   ;;  %s1962_s17 = sphi %s2020_s17, %s2995_s17   ;;  %s1958_s16 = sphi %s2018_s16, %s2994_s16   ;;  %s1954_s15 = sphi %s2016_s15, %s2993_s15  }
   0x4   : > { %s2041_s21 = sadd.s32 1, %s1966_s18   ;;  %s113_s22 = sadd.s32 1, %s1962_s17 }
   0x5   : > { %s110_s23 = ssub.s32 %s1966_s18, %s2041_s21  ;;  %p123_p0 = scmp.ne.s32.totalorder %s1962_s17, %s1958_s16 }
   0x6   : > { %p111_p1 = scmp.eq.s32.totalorder %s110_s23, 0  ;;  %p124_p2 = scmp.eq.s32.totalorder %s2037_s19, 1 }
   0x7   : > { %p129_p3 = scmp.ne.s32.totalorder %s1958_s16, %s1954_s15  ;;  %p130_p4 = scmp.eq.s32.totalorder %s1780_s20, 1 }
   0x8   : > { %s2052_s24 = scalar_select %p111_p1, %s1962_s17, %s113_s22  }
   0x9   : > { %p2054_p5 = por %p124_p2, %p123_p0  ;;  %p2058_p6 = por %p130_p4, %p129_p3 }
   0xa   : > { %p1783_p7 = scmp.ge.s32.totalorder %s1966_s18, 1  ;;  %p165_p8 = scmp.lt.s32.totalorder %s1966_s18, 3 }
   0xc   : > { %p166_p9 = pnand %p1783_p7, %p165_p8 }
   0xe   : > { %169 = sbr.rel (%p166_p9) target bundleno = 1108 (0x454), region = 36 }
  0x13   : > { %v2067_v0 = vld [vmem:[%s2896_s1] sm:$0xf]  ;;  %v2910_v1 = vmov 2   ;;  %v2920_v2 = vmov 4   ;;  %v2074_v3 = vld [vmem:[%s2896_s1 + $0x4] sm:$0xf]  ;;  %v206_v15 = vlaneseq }
  0x14   : > { %1857 = vset.pattern.permute.xlu1 %v2910_v1  ;;  %1870 = vset.pattern.permute.xlu0 %v2920_v2  ;;  %v2902_v4 = vmov 3   ;;  %v2901_v5 = vmov 1   ;;  %v2916_v6 = vmov 5   ;;  %v2918_v7 = vmov 6   ;;  %v544_v13 = vld [vmem:[%s2897_s2] sm:$0xf] }
  0x15   : > { %277 = vperm.xlu1 %1857, %v2067_v0   ;;  %737 = vperm.xlu0 %1870, %v2074_v3   ;;  %v2912_v8 = vmov 7   ;;  %v2908_v9 = vmov 8   ;;  %v2914_v10 = vmov 9   ;;  %v2906_v11 = vmov 10   ;;  %p191_p10 = scmp.lt.s32.totalorder %s2037_s19, 1  ;;  %s1980_s12 = smov 127  }
  0x16   : > { %v2904_v12 = vmov 11   ;;  %v2922_v14 = vmov 0   ;;  %v2121_v16 = vshrl.u32 %v206_v15, 7  ;;  %s1981_s13 = smov 126   ;;  %s1982_s14 = smov 122   ;;  %vm752_vm0 = vcmask 998400  }
  0x17   : > { %s192_s7 = scalar_select %p191_p10, %s2037_s19, 1  ;;  %vm849_vm1 = vcmask 949248   ;;  %vm366_vm2 = vcmask 1039360   ;;  %vm463_vm3 = vcmask 1031168   ;;  %vm574_vm4 = vcmask 908288  }
  0x18   : > { %2940 = vst [vmem:[#allocation5_spill] sm:$0xff] %v2121_v16  ;;  %v2124_v17 = vsub.s32 0, %v2121_v16  ;;  %v212_v18 = vsub.s32 4, %v2121_v16  ;;  %v249_v23 = vsub.s32 5, %v2121_v16  ;;  %v2141_v26 = vsub.s32 1, %v2121_v16  ;;  %s1983_s20 = smov 116  }
  0x19   : > { %1858 = vset.pattern.permute.xlu1 %v2902_v4  ;;  %1871 = vset.pattern.permute.xlu0 %v2901_v5  ;;  %s1795_s8 = smul.u32 12, %s192_s7  ;;  %v2900_v31 = vsub.s32 6, %v2121_v16  ;;  %v323_v43 = vsub.s32 7, %v2121_v16  ;;  %v2172_v45 = vsub.s32 2, %v2121_v16  ;;  %v2187_v53 = vsub.s32 3, %v2121_v16  ;;  %s1984_s9 = smov 104  }
  0x1a   : > { %314 = vperm.xlu1 %1858, %v2067_v0   ;;  %240 = vperm.xlu0 %1871, %v2067_v0   ;;  %s1985_s10 = smov 111   ;;  %s188_s5 = sand.u32 1, %s1958_s16   ;;  %vm1236_vm5 = vcmask 850944   ;;  %vm1489_vm6 = vcmask 900096   ;;  %vm1605_vm7 = vcmask 752640  }
  0x1b   : > { %s2129_s11 = scalar_lea.vmem %s2895_s0, %s1795_s8  ;;  %s1784_s6 = sshll.u32 %s188_s5, 5 }
  0x1c   : > { %v196_v20 = vld [vmem:[%s2129_s11] sm:$0xff]  ;;  %v197_v25 = vld [vmem:[%s2129_s11 + $0x8] sm:$0xf]  ;;  %s2791_s7 = scalar_lea.vmem [#allocation2], %s1784_s6  ;;  %s1988_s22 = smov [#allocation2]  }
  0x1d   : > { %v213_v21 = vrot.slane %v196_v20, %v212_v18  ;;  %v209_v22 = vrot.slane %v196_v20, %v2124_v17  ;;  %v217_v29 = vrot.slane %v197_v25, %v2124_v17  ;;  %v250_v30 = vrot.slane %v196_v20, %v249_v23  ;;  %s1718_s8 = sshll.u32 %s2791_s7, 4  ;;  %s1910_s23 = sshll.u32 %s1988_s22, 4  ;;  %s2849_s8 = int_to_ptr.vmem [resolvable:$true] %s1718_s8  ;;  %s1911_s23 = int_to_ptr.vmem [resolvable:$false] %s1910_s23 }
  0x1e   : > { %1859 = vset.pattern.permute.xlu1 %v2920_v2  ;;  %626 = vperm.xlu0 %1871, %v2074_v3   ;;  %v246_v36 = vrot.slane %v196_v20, %v2141_v26  ;;  %v287_v38 = vrot.slane %v196_v20, %v2900_v31  ;;  %v254_v42 = vrot.slane %v197_v25, %v2141_v26  ;;  %p1913_p0 = scmp.lt.s32.totalorder %s2849_s8, %s1911_s23 }
  0x1f   : > { %351 = vperm.xlu1 %1859, %v2067_v0   ;;  %v2144_v27 = vrot.slane %v213_v21, %v2124_v17  ;;  %v2147_v28 = vrot.slane %v209_v22, %v2124_v17  ;;  %v2154_v35 = vrot.slane %v217_v29, %v2124_v17  ;;  %v2158_v37 = vrot.slane %v250_v30, %v2141_v26 }
  0x20   : > { %v2166_v41 = vrot.slane %v246_v36, %v2141_v26  ;;  %v2177_v46 = vrot.slane %v287_v38, %v2172_v45  ;;  %v2181_v48 = vrot.slane %v254_v42, %v2141_v26  ;;  %v324_v49 = vrot.slane %v196_v20, %v323_v43 }
  0x21   : > { %v283_v51 = vrot.slane %v196_v20, %v2172_v45  ;;  %v291_v56 = vrot.slane %v197_v25, %v2172_v45  ;;  %v320_v62 = vrot.slane %v196_v20, %v2187_v53  ;;  %v328_v18 = vrot.slane %v197_v25, %v2187_v53 }
  0x22   : > { %v2192_v55 = vrot.slane %v324_v49, %v2187_v53 }
  0x23   : > { %1860 = vset.pattern.permute.xlu1 %v2916_v6  ;;  %v2196_v57 = vrot.slane %v283_v51, %v2172_v45  ;;  %v2203_v61 = vrot.slane %v291_v56, %v2172_v45  ;;  %v2211_v21 = vrot.slane %v320_v62, %v2187_v53  ;;  %v2218_v29 = vrot.slane %v328_v18, %v2187_v53  ;;  %v582_v56 = vld [vmem:[%s2129_s11 + $0x8] sm:$0xf] }
  0x24   : > { %376 = vperm.xlu1 %1860, %v2067_v0  }
  0x28   : > { %1861 = vset.pattern.permute.xlu1 %v2918_v7 }
  0x29   : > { %400 = vperm.xlu1 %1861, %v2067_v0  }
  0x2d   : > { %1862 = vset.pattern.permute.xlu1 %v2912_v8 }
  0x2e   : > { %424 = vperm.xlu1 %1862, %v2067_v0  }
  0x32   : > { %1863 = vset.pattern.permute.xlu1 %v2908_v9 }
  0x33   : > { %448 = vperm.xlu1 %1863, %v2067_v0  }
  0x37   : > { %1864 = vset.pattern.permute.xlu1 %v2914_v10 }
  0x38   : > { %473 = vperm.xlu1 %1864, %v2067_v0  }
  0x3c   : > { %1865 = vset.pattern.permute.xlu1 %v2906_v11 }
  0x3d   : > { %497 = vperm.xlu1 %1865, %v2067_v0  }
  0x41   : > { %1866 = vset.pattern.permute.xlu1 %v2904_v12 }
  0x42   : > { %521 = vperm.xlu1 %1866, %v2067_v0  }
  0x46   : > { %1867 = vset.pattern.permute.xlu1 %v2922_v14 }
  0x47   : > { %548 = vperm.xlu1 %1867, %v544_v13  }
  0x4b   : > { %587 = vperm.xlu1 %1867, %v2074_v3  }
  0x4f   : > { %1868 = vset.pattern.permute.xlu1 %v2910_v1 }
  0x50   : > { %663 = vperm.xlu1 %1868, %v2074_v3  }
  0x54   : > { %1869 = vset.pattern.permute.xlu1 %v2902_v4 }
  0x55   : > { %700 = vperm.xlu1 %1869, %v2074_v3  }
  0x59   : > { %1872 = vset.pattern.permute.xlu1 %v2916_v6 }
  0x5a   : > { %762 = vperm.xlu1 %1872, %v2074_v3  }
  0x5e   : > { %1873 = vset.pattern.permute.xlu1 %v2918_v7 }
  0x5f   : > { %786 = vperm.xlu1 %1873, %v2074_v3  }
  0x63   : > { %1874 = vset.pattern.permute.xlu1 %v2912_v8 }
  0x64   : > { %810 = vperm.xlu1 %1874, %v2074_v3  }
  0x68   : > { %1875 = vset.pattern.permute.xlu1 %v2908_v9 }
  0x69   : > { %834 = vperm.xlu1 %1875, %v2074_v3  }
  0x6d   : > { %1876 = vset.pattern.permute.xlu1 %v2914_v10 }
  0x6e   : > { %859 = vperm.xlu1 %1876, %v2074_v3  }
  0x72   : > { %1877 = vset.pattern.permute.xlu1 %v2906_v11 }
  0x90   : > { %v2132_v19 = vpop.permute.xlu1 %277  ;;  %v738_v38 = vpop.permute.xlu0 %737 }
  0x95   : > { %v2137_v24 = vpop.permute.xlu1 %314 }
  0x9a   : > { %v352_v32 = vpop.permute.xlu1 %351 }
  0x9b   : > { %v355_v33 = vmul.f32 %v352_v32, %v2144_v27  ;;  %v354_v34 = vmul.f32 %v352_v32, %v2147_v28  ;;  %v356_v40 = vmul.f32 %v352_v32, %v2154_v35 }
  0x9d   : > { %362 = vrot.lane.b32.xlu1 %v355_v33, %s1980_s12  ;;  %360 = vrot.lane.b32.xlu0 %v354_v34, %s1980_s12 }
  0x9f   : > { %v377_v39 = vpop.permute.xlu1 %376 }
  0xa0   : > { %v380_v44 = vmul.f32 %v377_v39, %v2158_v37  ;;  %v379_v47 = vmul.f32 %v377_v39, %v2166_v41  ;;  %v381_v54 = vmul.f32 %v377_v39, %v2181_v48 }
  0xa1   : > { %364 = vrot.lane.b32.xlu0 %v356_v40, %s1980_s12  ;;  %v740_v40 = vmul.f32 %v738_v38, %v2147_v28 }
  0xa2   : > { %387 = vrot.lane.b32.xlu1 %v380_v44, %s1980_s12  ;;  %v741_v44 = vmul.f32 %v738_v38, %v2144_v27 }
  0xa4   : > { %v401_v50 = vpop.permute.xlu1 %400 }
  0xa5   : > { %385 = vrot.lane.b32.xlu0 %v379_v47, %s1980_s12  ;;  %v404_v52 = vmul.f32 %v401_v50, %v2177_v46  ;;  %v403_v60 = vmul.f32 %v401_v50, %v2196_v57  ;;  %v405_v15 = vmul.f32 %v401_v50, %v2203_v61 }
  0xa7   : > { %411 = vrot.lane.b32.xlu1 %v404_v52, %s1980_s12 }
  0xa9   : > { %v425_v58 = vpop.permute.xlu1 %424  ;;  %389 = vrot.lane.b32.xlu0 %v381_v54, %s1980_s12 }
  0xaa   : > { %v428_v59 = vmul.f32 %v425_v58, %v2192_v55  ;;  %v427_v20 = vmul.f32 %v425_v58, %v2211_v21  ;;  %v429_v25 = vmul.f32 %v425_v58, %v2218_v29 }
  0xac   : > { %435 = vrot.lane.b32.xlu1 %v428_v59, %s1980_s12  ;;  %v603_v59 = vrot.slane %v582_v56, %v2124_v17 }
  0xad   : > { %409 = vrot.lane.b32.xlu0 %v403_v60, %s1980_s12 }
  0xae   : > { %v449_v63 = vpop.permute.xlu1 %448 }
  0xaf   : > { %v452_v13 = vmul.f32 %v449_v63, %v2144_v27  ;;  %v451_v33 = vmul.f32 %v449_v63, %v2147_v28  ;;  %v453_v39 = vmul.f32 %v449_v63, %v2154_v35 }
  0xb1   : > { %459 = vrot.lane.b32.xlu1 %v452_v13, %s1981_s13  ;;  %413 = vrot.lane.b32.xlu0 %v405_v15, %s1980_s12  ;;  %v2260_v13 = vrot.slane %v603_v59, %v2124_v17 }
  0xb3   : > { %v474_v22 = vpop.permute.xlu1 %473 }
  0xb4   : > { %v477_v23 = vmul.f32 %v474_v22, %v2158_v37  ;;  %v476_v43 = vmul.f32 %v474_v22, %v2166_v41  ;;  %v478_v49 = vmul.f32 %v474_v22, %v2181_v48  ;;  %v742_v22 = vmul.f32 %v738_v38, %v2260_v13 }
  0xb5   : > { %433 = vrot.lane.b32.xlu0 %v427_v20, %s1980_s12  ;;  %v640_v20 = vrot.slane %v582_v56, %v2141_v26 }
  0xb6   : > { %484 = vrot.lane.b32.xlu1 %v477_v23, %s1981_s13 }
  0xb8   : > { %v498_v30 = vpop.permute.xlu1 %497 }
  0xb9   : > { %437 = vrot.lane.b32.xlu0 %v429_v25, %s1980_s12  ;;  %v501_v32 = vmul.f32 %v498_v30, %v2177_v46  ;;  %v500_v51 = vmul.f32 %v498_v30, %v2196_v57  ;;  %v502_v52 = vmul.f32 %v498_v30, %v2203_v61 }
  0xbb   : > { %508 = vrot.lane.b32.xlu1 %v501_v32, %s1981_s13  ;;  %v2271_v32 = vrot.slane %v640_v20, %v2141_v26 }
  0xbd   : > { %v522_v34 = vpop.permute.xlu1 %521  ;;  %457 = vrot.lane.b32.xlu0 %v451_v33, %s1981_s13 }
  0xbe   : > { %v525_v36 = vmul.f32 %v522_v34, %v2192_v55  ;;  %v524_v58 = vmul.f32 %v522_v34, %v2211_v21  ;;  %v526_v63 = vmul.f32 %v522_v34, %v2218_v29 }
  0xc0   : > { %532 = vrot.lane.b32.xlu1 %v525_v36, %s1981_s13  ;;  %v677_v36 = vrot.slane %v582_v56, %v2172_v45 }
  0xc1   : > { %461 = vrot.lane.b32.xlu0 %v453_v39, %s1981_s13 }
  0xc2   : > { %v2233_v42 = vpop.permute.xlu1 %548 }
  0xc3   : > { %2941 = vst [vmem:[#allocation6_spill] sm:$0xff] %v2233_v42 }
  0xc4   : > { %746 = vrot.lane.b32.xlu1 %v740_v40, %s1982_s14  ;;  %v2282_v40 = vrot.slane %v677_v36, %v2172_v45 }
  0xc5   : > { %482 = vrot.lane.b32.xlu0 %v476_v43, %s1981_s13 }
  0xc6   : > { %v2239_v47 = vpop.permute.xlu1 %587 }
  0xc7   : > { %v621_v42 = vmul.f32 %v2260_v13, %v2239_v47 }
  0xc8   : > { %748 = vrot.lane.b32.xlu1 %v741_v44, %s1982_s14 }
  0xc9   : > { %486 = vrot.lane.b32.xlu0 %v478_v49, %s1981_s13 }
  0xcb   : > { %v2244_v50 = vpop.permute.xlu1 %663 }
  0xcd   : > { %506 = vrot.lane.b32.xlu0 %v500_v51, %s1981_s13  ;;  %v714_v51 = vrot.slane %v582_v56, %v2187_v53 }
  0xd0   : > { %v2249_v54 = vpop.permute.xlu1 %700 }
  0xd1   : > { %510 = vrot.lane.b32.xlu0 %v502_v52, %s1981_s13 }
  0xd5   : > { %v763_v60 = vpop.permute.xlu1 %762  ;;  %530 = vrot.lane.b32.xlu0 %v524_v58, %s1981_s13  ;;  %v2293_v58 = vrot.slane %v714_v51, %v2187_v53 }
  0xd6   : > { %v766_v62 = vmul.f32 %v763_v60, %v2158_v37  ;;  %v765_v25 = vmul.f32 %v763_v60, %v2166_v41  ;;  %v767_v33 = vmul.f32 %v763_v60, %v2271_v32 }
  0xd8   : > { %773 = vrot.lane.b32.xlu1 %v766_v62, %s1982_s14 }
  0xd9   : > { %534 = vrot.lane.b32.xlu0 %v526_v63, %s1981_s13  ;;  %s1906_s13 = scalar_lea.vmem %s2849_s8, 512 }
  0xda   : > { %v787_v15 = vpop.permute.xlu1 %786  ;;  %p1907_p11 = scmp.ne.s32.totalorder %s2849_s8, %s1906_s13 }
  0xdb   : > { %v790_v18 = vmul.f32 %v787_v15, %v2177_v46  ;;  %v789_v39 = vmul.f32 %v787_v15, %v2196_v57  ;;  %v791_v49 = vmul.f32 %v787_v15, %v2282_v40  ;;  %v2306_v15 = vpop.permute.xlu0 %240 }
  0xdc   : > { %p1908_p12 = pnand %p1907_p11, %p2054_p5 }
  0xdd   : > { %797 = vrot.lane.b32.xlu1 %v790_v18, %s1982_s14  ;;  %750 = vrot.lane.b32.xlu0 %v742_v22, %s1982_s14 }
  0xde   : > { %p1909_p13 = pneg %p1908_p12 }
  0xdf   : > { %v811_v23 = vpop.permute.xlu1 %810  ;;  %v627_v18 = vpop.permute.xlu0 %626 }
  0xe0   : > { %v814_v30 = vmul.f32 %v811_v23, %v2192_v55  ;;  %v813_v52 = vmul.f32 %v811_v23, %v2211_v21  ;;  %v815_v59 = vmul.f32 %v811_v23, %v2293_v58  ;;  %v658_v16 = vmul.f32 %v2271_v32, %v627_v18 }
  0xe1   : > { %771 = vrot.lane.b32.xlu0 %v765_v25, %s1982_s14 }
  0xe2   : > { %821 = vrot.lane.b32.xlu1 %v814_v30, %s1982_s14 }
  0xe4   : > { %v835_v34 = vpop.permute.xlu1 %834 }
  0xe5   : > { %775 = vrot.lane.b32.xlu0 %v767_v33, %s1982_s14  ;;  %v838_v38 = vmul.f32 %v835_v34, %v2144_v27  ;;  %v837_v60 = vmul.f32 %v835_v34, %v2147_v28  ;;  %v839_v56 = vmul.f32 %v835_v34, %v2260_v13  ;;  %v732_v13 = vmul.f32 %v2293_v58, %v2249_v54 }
  0xe7   : > { %845 = vrot.lane.b32.xlu1 %v838_v38, %s1983_s20 }
  0xe9   : > { %v860_v43 = vpop.permute.xlu1 %859  ;;  %795 = vrot.lane.b32.xlu0 %v789_v39, %s1982_s14 }
  0xea   : > { %v863_v44 = vmul.f32 %v860_v43, %v2158_v37  ;;  %v862_v62 = vmul.f32 %v860_v43, %v2166_v41  ;;  %v864_v63 = vmul.f32 %v860_v43, %v2271_v32  ;;  %v694_v32 = vmul.f32 %v2244_v50, %v2177_v46 }
  0xec   : > { %870 = vrot.lane.b32.xlu1 %v863_v44, %s1983_s20 }
  0xed   : > { %799 = vrot.lane.b32.xlu0 %v791_v49, %s1982_s14 }
  0xf0   : > { %883 = vperm.xlu1 %1877, %v2074_v3  }
  0xf1   : > { %819 = vrot.lane.b32.xlu0 %v813_v52, %s1982_s14 }
  0xf4   : > { %1878 = vset.pattern.permute.xlu1 %v2904_v12 }
  0xf5   : > { %823 = vrot.lane.b32.xlu0 %v815_v59, %s1982_s14 }
  0xf9   : > { %843 = vrot.lane.b32.xlu0 %v837_v60, %s1983_s20 }
  0xfd   : > { %847 = vrot.lane.b32.xlu0 %v839_v56, %s1983_s20 }
 0x101   : > { %868 = vrot.lane.b32.xlu0 %v862_v62, %s1983_s20 }
 0x105   : > { %872 = vrot.lane.b32.xlu0 %v864_v63, %s1983_s20 }
 0x10f   : > { %v2309_v22 = vpop.permute.xlu0 %360  ;;  %v2313_v23 = vpop.permute.xlu1 %362 }
 0x113   : > { %v2311_v20 = vpop.permute.xlu0 %364 }
 0x114   : > { %v2317_v30 = vpop.permute.xlu1 %387 }
 0x117   : > { %v2315_v25 = vpop.permute.xlu0 %385 }
 0x119   : > { %v2323_v36 = vpop.permute.xlu1 %411 }
 0x11a   : > { %2943 = vst [vmem:[#allocation8_spill] sm:$0xff] %v2323_v36 }
 0x11b   : > { %v2319_v33 = vpop.permute.xlu0 %389 }
 0x11e   : > { %v2327_v39 = vpop.permute.xlu1 %435 }
 0x11f   : > { %v2321_v34 = vpop.permute.xlu0 %409  ;;  %2945 = vst [vmem:[#allocation10_spill] sm:$0xff] %v2327_v39 }
 0x120   : > { %2942 = vst [vmem:[#allocation7_spill] sm:$0xff] %v2321_v34 }
 0x123   : > { %v2325_v38 = vpop.permute.xlu0 %413  ;;  %v2333_v49 = vpop.permute.xlu1 %459 }
 0x124   : > { %2944 = vst [vmem:[#allocation9_spill] sm:$0xff] %v2325_v38  ;;  %2948 = vst [vmem:[#allocation13_spill] sm:$0xff] %v2333_v49 }
 0x127   : > { %v2329_v43 = vpop.permute.xlu0 %433 }
 0x128   : > { %2946 = vst [vmem:[#allocation11_spill] sm:$0xff] %v2329_v43  ;;  %v2337_v52 = vpop.permute.xlu1 %484 }
 0x129   : > { %2950 = vst [vmem:[#allocation15_spill] sm:$0xff] %v2337_v52 }
 0x12b   : > { %v2331_v44 = vpop.permute.xlu0 %437 }
 0x12c   : > { %2947 = vst [vmem:[#allocation12_spill] sm:$0xff] %v2331_v44 }
 0x12d   : > { %v2343_v56 = vpop.permute.xlu1 %508 }
 0x12e   : > { %2953 = vst [vmem:[#allocation18_spill] sm:$0xff] %v2343_v56  ;;  %v619_v56 = vmul.f32 %v2239_v47, %v2147_v28 }
 0x12f   : > { %v2335_v51 = vpop.permute.xlu0 %457 }
 0x130   : > { %2949 = vst [vmem:[#allocation14_spill] sm:$0xff] %v2335_v51  ;;  %v731_v51 = vmul.f32 %v2249_v54, %v2192_v55 }
 0x132   : > { %v2347_v63 = vpop.permute.xlu1 %532 }
 0x133   : > { %v2339_v59 = vpop.permute.xlu0 %461  ;;  %2955 = vst [vmem:[#allocation20_spill] sm:$0xff] %v2347_v63  ;;  %v657_v63 = vmul.f32 %v627_v18, %v2158_v37 }
 0x134   : > { %2951 = vst [vmem:[#allocation16_spill] sm:$0xff] %v2339_v59  ;;  %v693_v59 = vmul.f32 %v2244_v50, %v2196_v57 }
 0x136   : > { %v747_v4 = vpop.permute.xlu1 %746 }
 0x137   : > { %v2341_v60 = vpop.permute.xlu0 %482 }
 0x138   : > { %2952 = vst [vmem:[#allocation17_spill] sm:$0xff] %v2341_v60  ;;  %v661_v60 = vadd.f32 %v658_v16, %v621_v42 }
 0x13a   : > { %v749_v11 = vpop.permute.xlu1 %748 }
 0x13b   : > { %v2345_v62 = vpop.permute.xlu0 %486 }
 0x13c   : > { %2954 = vst [vmem:[#allocation19_spill] sm:$0xff] %v2345_v62 }
 0x13f   : > { %v2349_v31 = vpop.permute.xlu0 %506 }
 0x140   : > { %2956 = vst [vmem:[#allocation21_spill] sm:$0xff] %v2349_v31  ;;  %v656_v31 = vmul.f32 %v627_v18, %v2166_v41 }
 0x142   : > { %v659_v44 = vadd.f32 %v656_v31, %v619_v56 }
 0x143   : > { %v2351_v5 = vpop.permute.xlu0 %510 }
 0x144   : > { %2957 = vst [vmem:[#allocation22_spill] sm:$0xff] %v2351_v5  ;;  %v696_v42 = vadd.f32 %v693_v59, %v659_v44 }
 0x147   : > { %v2353_v12 = vpop.permute.xlu0 %530 }
 0x148   : > { %2958 = vst [vmem:[#allocation23_spill] sm:$0xff] %v2353_v12  ;;  %v620_v12 = vmul.f32 %v2239_v47, %v2144_v27  ;;  %v730_v47 = vmul.f32 %v2249_v54, %v2211_v21 }
 0x14a   : > { %v774_v1 = vpop.permute.xlu1 %773  ;;  %v660_v52 = vadd.f32 %v657_v63, %v620_v12 }
 0x14b   : > { %v2355_v9 = vpop.permute.xlu0 %534 }
 0x14c   : > { %2959 = vst [vmem:[#allocation24_spill] sm:$0xff] %v2355_v9  ;;  %v695_v9 = vmul.f32 %v2282_v40, %v2244_v50  ;;  %v697_v43 = vadd.f32 %v694_v32, %v660_v52  ;;  %v753_v50 = vsel %vm752_vm0, %v747_v4, %v749_v11 }
 0x14e   : > { %v698_v18 = vadd.f32 %v695_v9, %v661_v60  ;;  %v734_v38 = vadd.f32 %v731_v51, %v697_v43  ;;  %v733_v9 = vadd.f32 %v730_v47, %v696_v42 }
 0x14f   : > { %v751_v8 = vpop.permute.xlu0 %750  ;;  %v798_v6 = vpop.permute.xlu1 %797 }
 0x150   : > { %v735_v39 = vadd.f32 %v732_v13, %v698_v18  ;;  %v754_v16 = vsel %vm752_vm0, %v749_v11, %v751_v8  ;;  %v758_v56 = vadd.f32 %v753_v50, %v733_v9 }
 0x151   : > { %v759_v31 = vadd.f32 %v754_v16, %v734_v38 }
 0x152   : > { %v760_v34 = vadd.f32 %v751_v8, %v735_v39 }
 0x153   : > { %v772_v10 = vpop.permute.xlu0 %771 }
 0x154   : > { %v822_v2 = vpop.permute.xlu1 %821  ;;  %v777_v52 = vsel %vm752_vm0, %v772_v10, %v774_v1 }
 0x155   : > { %v782_v11 = vadd.f32 %v777_v52, %v758_v56 }
 0x157   : > { %v776_v7 = vpop.permute.xlu0 %775 }
 0x158   : > { %v778_v36 = vsel %vm752_vm0, %v774_v1, %v776_v7  ;;  %v784_v60 = vadd.f32 %v776_v7, %v760_v34 }
 0x159   : > { %v846_v62 = vpop.permute.xlu1 %845  ;;  %v783_v32 = vadd.f32 %v778_v36, %v759_v31 }
 0x15b   : > { %v796_v14 = vpop.permute.xlu0 %795 }
 0x15c   : > { %v801_v44 = vsel %vm752_vm0, %v796_v14, %v798_v6 }
 0x15e   : > { %v2379_v12 = vpop.permute.xlu1 %870 }
 0x15f   : > { %v800_v5 = vpop.permute.xlu0 %799 }
 0x160   : > { %v802_v54 = vsel %vm752_vm0, %v798_v6, %v800_v5  ;;  %v808_v59 = vadd.f32 %v800_v5, %v784_v60  ;;  %v806_v6 = vadd.f32 %v801_v44, %v782_v11  ;;  %v2961_v44 = vmov 4  }
 0x161   : > { %v807_v38 = vadd.f32 %v802_v54, %v783_v32  ;;  %v930_v54 = vld [vmem:[%s2897_s2 + $0x4] sm:$0xf]  ;;  %v1787_v32 = vld [vmem:[%s2896_s1 + $0x8] sm:$0xf]  ;;  %v2969_v11 = vmov 11  }
 0x163   : > { %v820_v49 = vpop.permute.xlu0 %819 }
 0x164   : > { %v825_v1 = vsel %vm752_vm0, %v820_v49, %v822_v2 }
 0x165   : > { %v830_v18 = vadd.f32 %v825_v1, %v806_v6 }
 0x167   : > { %v824_v63 = vpop.permute.xlu0 %823 }
 0x168   : > { %v826_v13 = vsel %vm752_vm0, %v822_v2, %v824_v63  ;;  %v832_v7 = vadd.f32 %v824_v63, %v808_v59  ;;  %v2960_v63 = vmov 0   ;;  %v2964_v59 = vmov 9  }
 0x169   : > { %v831_v10 = vadd.f32 %v826_v13, %v807_v38  ;;  %v2966_v13 = vmov 2   ;;  %v2970_v38 = vmov 3  }
 0x16b   : > { %v884_v43 = vpop.permute.xlu1 %883  ;;  %v844_v51 = vpop.permute.xlu0 %843 }
 0x16c   : > { %v887_v4 = vmul.f32 %v884_v43, %v2177_v46  ;;  %v886_v8 = vmul.f32 %v884_v43, %v2196_v57  ;;  %v850_v5 = vsel %vm849_vm1, %v844_v51, %v846_v62  ;;  %v888_v39 = vmul.f32 %v884_v43, %v2282_v40 }
 0x16d   : > { %v855_v2 = vadd.f32 %v850_v5, %v830_v18  ;;  %v2962_v43 = vmov 6   ;;  %v2963_v51 = vmov 5  }
 0x16e   : > { %894 = vrot.lane.b32.xlu1 %v887_v4, %s1983_s20  ;;  %892 = vrot.lane.b32.xlu0 %v886_v8, %s1983_s20  ;;  %v2967_v4 = vmov 8   ;;  %v2968_v8 = vmov 10  }
 0x16f   : > { %v848_v14 = vpop.permute.xlu0 %847 }
 0x170   : > { %v851_v34 = vsel %vm849_vm1, %v846_v62, %v848_v14  ;;  %v857_v36 = vadd.f32 %v848_v14, %v832_v7 }
 0x171   : > { %v856_v47 = vadd.f32 %v851_v34, %v831_v10 }
 0x172   : > { %907 = vperm.xlu1 %1878, %v2074_v3   ;;  %896 = vrot.lane.b32.xlu0 %v888_v39, %s1983_s20 }
 0x173   : > { %v869_v49 = vpop.permute.xlu0 %868 }
 0x174   : > { %v874_v16 = vsel %vm849_vm1, %v869_v49, %v2379_v12 }
 0x175   : > { %v879_v42 = vadd.f32 %v874_v16, %v855_v2 }
 0x176   : > { %1879 = vset.pattern.permute.xlu1 %v2960_v63 }
 0x177   : > { %v873_v50 = vpop.permute.xlu0 %872 }
 0x178   : > { %v875_v7 = vsel %vm849_vm1, %v2379_v12, %v873_v50  ;;  %v881_v14 = vadd.f32 %v873_v50, %v857_v36 }
 0x179   : > { %v880_v39 = vadd.f32 %v875_v7, %v856_v47 }
 0x1e0   : > { %v895_v9 = vpop.permute.xlu1 %894  ;;  %v893_v62 = vpop.permute.xlu0 %892 }
 0x1e1   : > { %v898_v31 = vsel %vm849_vm1, %v893_v62, %v895_v9 }
 0x1e2   : > { %v903_v40 = vadd.f32 %v898_v31, %v879_v42 }
 0x1e4   : > { %v897_v1 = vpop.permute.xlu0 %896 }
 0x1e5   : > { %v899_v5 = vsel %vm849_vm1, %v895_v9, %v897_v1  ;;  %v905_v2 = vadd.f32 %v897_v1, %v881_v14 }
 0x1e6   : > { %v904_v49 = vadd.f32 %v899_v5, %v880_v39 }
 0x1ed   : > { %v908_v52 = vpop.permute.xlu1 %907 }
 0x1ee   : > { %v911_v60 = vmul.f32 %v908_v52, %v2192_v55  ;;  %v910_v3 = vmul.f32 %v908_v52, %v2211_v21  ;;  %v912_v56 = vmul.f32 %v908_v52, %v2293_v58  ;;  %v2965_v58 = vmov 7   ;;  %v970_v52 = vld [vmem:[%s2129_s11 + $0x8] sm:$0xf] }
 0x1ef   : > { %v1028_v12 = vrot.slane %v970_v52, %v2141_v26 }
 0x1f0   : > { %918 = vrot.lane.b32.xlu1 %v911_v60, %s1983_s20  ;;  %916 = vrot.lane.b32.xlu0 %v910_v3, %s1983_s20  ;;  %v991_v60 = vrot.slane %v970_v52, %v2124_v17 }
 0x1f2   : > { %v2440_v47 = vrot.slane %v991_v60, %v2124_v17 }
 0x1f4   : > { %934 = vperm.xlu1 %1879, %v930_v54   ;;  %920 = vrot.lane.b32.xlu0 %v912_v56, %s1983_s20 }
 0x1f8   : > { %975 = vperm.xlu1 %1879, %v1787_v32   ;;  %1014 = vperm.xlu0 %1871, %v1787_v32  }
 0x1fc   : > { %1880 = vset.pattern.permute.xlu1 %v2961_v44  ;;  %1882 = vset.pattern.permute.xlu0 %v2962_v43 }
 0x1fd   : > { %1125 = vperm.xlu1 %1880, %v1787_v32   ;;  %1173 = vperm.xlu0 %1882, %v1787_v32  }
 0x201   : > { %1881 = vset.pattern.permute.xlu1 %v2963_v51  ;;  %1885 = vset.pattern.permute.xlu0 %v2964_v59 }
 0x202   : > { %1149 = vperm.xlu1 %1881, %v1787_v32   ;;  %1246 = vperm.xlu0 %1885, %v1787_v32  }
 0x206   : > { %1883 = vset.pattern.permute.xlu1 %v2965_v58  ;;  %1888 = vset.pattern.permute.xlu0 %v2966_v13 }
 0x207   : > { %1197 = vperm.xlu1 %1883, %v1787_v32   ;;  %1051 = vperm.xlu0 %1888, %v1787_v32  }
 0x20b   : > { %1884 = vset.pattern.permute.xlu1 %v2967_v4  ;;  %1890 = vset.pattern.permute.xlu0 %v2961_v44 }
 0x20c   : > { %1221 = vperm.xlu1 %1884, %v1787_v32  }
 0x210   : > { %1886 = vset.pattern.permute.xlu1 %v2968_v8 }
 0x211   : > { %1270 = vperm.xlu1 %1886, %v1787_v32  }
 0x215   : > { %1887 = vset.pattern.permute.xlu1 %v2969_v11 }
 0x216   : > { %1294 = vperm.xlu1 %1887, %v1787_v32  }
 0x21a   : > { %1889 = vset.pattern.permute.xlu1 %v2970_v38 }
 0x21b   : > { %1088 = vperm.xlu1 %1889, %v1787_v32  }
 0x21f   : > { %1891 = vset.pattern.permute.xlu1 %v2963_v51 }
 0x262   : > { %v919_v6 = vpop.permute.xlu1 %918  ;;  %v917_v10 = vpop.permute.xlu0 %916 }
 0x263   : > { %v922_v34 = vsel %vm849_vm1, %v917_v10, %v919_v6 }
 0x264   : > { %v927_v18 = vadd.f32 %v922_v34, %v903_v40  ;;  %v2443_v40 = vrot.slane %v1028_v12, %v2141_v26 }
 0x266   : > { %v921_v16 = vpop.permute.xlu0 %920 }
 0x267   : > { %v923_v42 = vsel %vm849_vm1, %v919_v6, %v921_v16  ;;  %v929_v62 = vadd.f32 %v921_v16, %v905_v2 }
 0x268   : > { %v928_v31 = vadd.f32 %v923_v42, %v904_v49  ;;  %v1065_v49 = vrot.slane %v970_v52, %v2172_v45 }
 0x26a   : > { %v1080_v60 = vrot.slane %v1065_v49, %v2172_v45 }
 0x26f   : > { %v935_v3 = vpop.permute.xlu1 %934 }
 0x270   : > { %v2433_v36 = vmul.f32 %v935_v3, %v927_v18  ;;  %v2435_v50 = vmul.f32 %v935_v3, %v928_v31  ;;  %v2437_v9 = vmul.f32 %v935_v3, %v929_v62 }
 0x273   : > { %v976_v54 = vpop.permute.xlu1 %975  ;;  %v1015_v56 = vpop.permute.xlu0 %1014 }
 0x274   : > { %v1007_v32 = vmul.f32 %v976_v54, %v2147_v28  ;;  %v1008_v44 = vmul.f32 %v976_v54, %v2144_v27  ;;  %v1009_v51 = vmul.f32 %v2440_v47, %v976_v54  ;;  %v1044_v1 = vmul.f32 %v1015_v56, %v2166_v41 }
 0x275   : > { %v1045_v7 = vmul.f32 %v1015_v56, %v2158_v37  ;;  %v1046_v6 = vmul.f32 %v2443_v40, %v1015_v56 }
 0x276   : > { %v2451_v10 = vadd.f32 %v1044_v1, %v1007_v32 }
 0x277   : > { %v2453_v14 = vadd.f32 %v1045_v7, %v1008_v44  ;;  %v1049_v5 = vadd.f32 %v1046_v6, %v1009_v51 }
 0x278   : > { %v1126_v34 = vpop.permute.xlu1 %1125  ;;  %v1174_v39 = vpop.permute.xlu0 %1173 }
 0x279   : > { %v1128_v18 = vmul.f32 %v1126_v34, %v2147_v28  ;;  %v1129_v2 = vmul.f32 %v1126_v34, %v2144_v27  ;;  %v1130_v16 = vmul.f32 %v1126_v34, %v2440_v47  ;;  %v1176_v32 = vmul.f32 %v1174_v39, %v2196_v57  ;;  %v2481_v34 = vld [vmem:[%s2896_s1 + $0xc] sm:$0xf] }
 0x27a   : > { %v1177_v51 = vmul.f32 %v1174_v39, %v2177_v46  ;;  %v1178_v6 = vmul.f32 %v1174_v39, %v1080_v60 }
 0x27b   : > { %1134 = vrot.lane.b32.xlu1 %v1128_v18, %s1983_s20  ;;  %1136 = vrot.lane.b32.xlu0 %v1129_v2, %s1983_s20 }
 0x27d   : > { %v1150_v42 = vpop.permute.xlu1 %1149  ;;  %v2461_v62 = vpop.permute.xlu0 %1246 }
 0x27e   : > { %v1152_v31 = vmul.f32 %v1150_v42, %v2166_v41  ;;  %v1153_v12 = vmul.f32 %v1150_v42, %v2158_v37  ;;  %v1154_v3 = vmul.f32 %v1150_v42, %v2443_v40 }
 0x27f   : > { %1138 = vrot.lane.b32.xlu1 %v1130_v16, %s1983_s20 }
 0x280   : > { %1158 = vrot.lane.b32.xlu0 %v1152_v31, %s1983_s20 }
 0x282   : > { %v2469_v54 = vpop.permute.xlu0 %1051  ;;  %v1198_v56 = vpop.permute.xlu1 %1197 }
 0x283   : > { %v1083_v44 = vmul.f32 %v1080_v60, %v2469_v54  ;;  %1160 = vrot.lane.b32.xlu1 %v1153_v12, %s1983_s20  ;;  %v1201_v42 = vmul.f32 %v1198_v56, %v2192_v55  ;;  %v1249_v12 = vmul.f32 %v2461_v62, %v2166_v41 }
 0x284   : > { %1162 = vrot.lane.b32.xlu0 %v1154_v3, %s1983_s20  ;;  %v1251_v3 = vmul.f32 %v2461_v62, %v2443_v40  ;;  %v1082_v40 = vmul.f32 %v2469_v54, %v2177_v46 }
 0x285   : > { %v1086_v1 = vadd.f32 %v1083_v44, %v1049_v5  ;;  %v1102_v5 = vrot.slane %v970_v52, %v2187_v53 }
 0x287   : > { %1182 = vrot.lane.b32.xlu1 %v1176_v32, %s1983_s20  ;;  %v1222_v7 = vpop.permute.xlu1 %1221  ;;  %v2494_v49 = vrot.slane %v1102_v5, %v2187_v53  ;;  %v1081_v32 = vmul.f32 %v2469_v54, %v2196_v57  ;;  %v1085_v5 = vadd.f32 %v1082_v40, %v2453_v14 }
 0x288   : > { %1184 = vrot.lane.b32.xlu0 %v1177_v51, %s1983_s20  ;;  %v1225_v31 = vmul.f32 %v1222_v7, %v2144_v27 }
 0x28b   : > { %1186 = vrot.lane.b32.xlu1 %v1178_v6, %s1983_s20 }
 0x28c   : > { %1464 = vperm.xlu0 %1890, %v2481_v34   ;;  %v1271_v18 = vpop.permute.xlu1 %1270 }
 0x28d   : > { %v2485_v2 = vmul.f32 %v1271_v18, %v1080_v60  ;;  %v1226_v60 = vmul.f32 %v1222_v7, %v2440_v47  ;;  %v1273_v47 = vmul.f32 %v1271_v18, %v2196_v57 }
 0x28f   : > { %1497 = vperm.xlu1 %1891, %v2481_v34  }
 0x290   : > { %1893 = vset.pattern.permute.xlu0 %v2965_v58 }
 0x291   : > { %1559 = vperm.xlu0 %1893, %v2481_v34   ;;  %v2491_v39 = vpop.permute.xlu1 %1294 }
 0x293   : > { %1892 = vset.pattern.permute.xlu1 %v2962_v43  ;;  %v545_v43 = vld [vmem:[%s2898_s3] sm:$0xf] }
 0x294   : > { %1528 = vperm.xlu1 %1892, %v2481_v34  }
 0x295   : > { %1896 = vset.pattern.permute.xlu0 %v2968_v8  ;;  %v1200_v8 = vmul.f32 %v1198_v56, %v2211_v21 }
 0x296   : > { %v1089_v16 = vpop.permute.xlu1 %1088  ;;  %1635 = vperm.xlu0 %1896, %v2481_v34  }
 0x297   : > { %v1120_v52 = vmul.f32 %v2494_v49, %v1089_v16  ;;  %v1118_v44 = vmul.f32 %v1089_v16, %v2211_v21  ;;  %v1119_v51 = vmul.f32 %v1089_v16, %v2192_v55 }
 0x298   : > { %1894 = vset.pattern.permute.xlu1 %v2967_v4  ;;  %v931_v4 = vld [vmem:[%s2898_s3 + $0x4] sm:$0xf] }
 0x299   : > { %1590 = vperm.xlu1 %1894, %v2481_v34   ;;  %v1123_v58 = vadd.f32 %v1120_v52, %v1086_v1 }
 0x29a   : > { %1897 = vset.pattern.permute.xlu0 %v2960_v63 }
 0x29b   : > { %201 = vperm.xlu0 %1897, %v2067_v0   ;;  %v1202_v0 = vmul.f32 %v1198_v56, %v2494_v49  ;;  %v1274_v56 = vmul.f32 %v1271_v18, %v2177_v46 }
 0x29d   : > { %1895 = vset.pattern.permute.xlu1 %v2964_v59  ;;  %v1224_v59 = vmul.f32 %v1222_v7, %v2147_v28 }
 0x29e   : > { %1613 = vperm.xlu1 %1895, %v2481_v34  }
 0x29f   : > { %556 = vperm.xlu0 %1897, %v545_v43  }
 0x2a2   : > { %1206 = vrot.lane.b32.xlu1 %v1200_v8, %s1983_s20  ;;  %v1122_v8 = vadd.f32 %v1119_v51, %v1085_v5  ;;  %v270_v5 = vmul.f32 %v2166_v41, %v2306_v15 }
 0x2a3   : > { %942 = vperm.xlu0 %1897, %v931_v4   ;;  %1898 = vset.pattern.permute.xlu1 %v2969_v11  ;;  %v1250_v11 = vmul.f32 %v2461_v62, %v2158_v37  ;;  %v1084_v62 = vadd.f32 %v1081_v32, %v2451_v10 }
 0x2a5   : > { %v1121_v7 = vadd.f32 %v1118_v44, %v1084_v62 }
 0x2a6   : > { %1208 = vrot.lane.b32.xlu1 %v1201_v42, %s1983_s20 }
 0x2a7   : > { %1210 = vrot.lane.b32.xlu0 %v1202_v0, %s1983_s20 }
 0x2aa   : > { %1657 = vperm.xlu1 %1898, %v2481_v34  }
 0x2ab   : > { %1230 = vrot.lane.b32.xlu0 %v1224_v59, %s1984_s9 }
 0x2ae   : > { %1232 = vrot.lane.b32.xlu1 %v1225_v31, %s1984_s9 }
 0x2af   : > { %1234 = vrot.lane.b32.xlu0 %v1226_v60, %s1984_s9  ;;  %1899 = vset.pattern.permute.xlu1 %v2960_v63 }
 0x2b2   : > { %1255 = vrot.lane.b32.xlu1 %v1249_v12, %s1984_s9 }
 0x2b3   : > { %1257 = vrot.lane.b32.xlu0 %v1250_v11, %s1984_s9 }
 0x2b6   : > { %1259 = vrot.lane.b32.xlu1 %v1251_v3, %s1984_s9 }
 0x2b7   : > { %1279 = vrot.lane.b32.xlu0 %v1273_v47, %s1984_s9 }
 0x2ba   : > { %1281 = vrot.lane.b32.xlu1 %v1274_v56, %s1984_s9 }
 0x2ed   : > { %v1135_v1 = vpop.permute.xlu1 %1134  ;;  %v1137_v6 = vpop.permute.xlu0 %1136 }
 0x2ee   : > { %v1140_v18 = vsel %vm849_vm1, %v1135_v1, %v1137_v6 }
 0x2ef   : > { %v1145_v52 = vadd.f32 %v1140_v18, %v1121_v7 }
 0x2f1   : > { %v1139_v43 = vpop.permute.xlu1 %1138 }
 0x2f2   : > { %v1141_v4 = vsel %vm849_vm1, %v1137_v6, %v1139_v43  ;;  %v1147_v42 = vadd.f32 %v1139_v43, %v1123_v58  ;;  %v1159_v0 = vpop.permute.xlu0 %1158 }
 0x2f3   : > { %v1146_v59 = vadd.f32 %v1141_v4, %v1122_v8  ;;  %v272_v8 = vmul.f32 %v2181_v48, %v2306_v15  ;;  %v344_v48 = vmul.f32 %v2211_v21, %v2137_v24 }
 0x2f5   : > { %v1161_v54 = vpop.permute.xlu1 %1160 }
 0x2f6   : > { %v1164_v10 = vsel %vm849_vm1, %v1159_v0, %v1161_v54  ;;  %v1163_v31 = vpop.permute.xlu0 %1162 }
 0x2f7   : > { %v1169_v16 = vadd.f32 %v1164_v10, %v1145_v52  ;;  %v1165_v60 = vsel %vm849_vm1, %v1161_v54, %v1163_v31  ;;  %v1171_v12 = vadd.f32 %v1163_v31, %v1147_v42  ;;  %v271_v52 = vmul.f32 %v2158_v37, %v2306_v15 }
 0x2f8   : > { %v1170_v11 = vadd.f32 %v1165_v60, %v1146_v59  ;;  %v307_v59 = vmul.f32 %v2196_v57, %v2132_v19  ;;  %v308_v54 = vmul.f32 %v2177_v46, %v2132_v19  ;;  %v309_v10 = vmul.f32 %v2203_v61, %v2132_v19 }
 0x2f9   : > { %v1183_v3 = vpop.permute.xlu1 %1182  ;;  %v346_v46 = vmul.f32 %v2218_v29, %v2137_v24  ;;  %v391_v29 = vsel %vm366_vm2, %v2315_v25, %v2317_v30 }
 0x2fa   : > { %v1185_v47 = vpop.permute.xlu0 %1184 }
 0x2fb   : > { %v1188_v14 = vsel %vm849_vm1, %v1183_v3, %v1185_v47 }
 0x2fc   : > { %v1193_v56 = vadd.f32 %v1188_v14, %v1169_v16 }
 0x2fd   : > { %v1187_v32 = vpop.permute.xlu1 %1186 }
 0x2fe   : > { %v1189_v44 = vsel %vm849_vm1, %v1185_v47, %v1187_v32  ;;  %v2555_v58 = vadd.f32 %v1187_v32, %v1171_v12  ;;  %v367_v32 = vsel %vm366_vm2, %v2309_v22, %v2313_v23 }
 0x2ff   : > { %v1194_v40 = vadd.f32 %v1189_v44, %v1170_v11  ;;  %v368_v44 = vsel %vm366_vm2, %v2313_v23, %v2311_v20  ;;  %v2971_v23 = vld [vmem:[#allocation8_spill] sm:$0xff] }
 0x307   : > { %v2557_v62 = vpop.permute.xlu0 %1464 }
 0x30a   : > { %v2559_v51 = vpop.permute.xlu1 %1497 }
 0x30c   : > { %v2561_v1 = vpop.permute.xlu0 %1559 }
 0x30f   : > { %v2563_v7 = vpop.permute.xlu1 %1528 }
 0x311   : > { %v2565_v6 = vpop.permute.xlu0 %1635 }
 0x314   : > { %v2567_v18 = vpop.permute.xlu1 %1590 }
 0x316   : > { %v202_v43 = vpop.permute.xlu0 %201 }
 0x317   : > { %v233_v4 = vmul.f32 %v2147_v28, %v202_v43  ;;  %v234_v42 = vmul.f32 %v2144_v27, %v202_v43  ;;  %v235_v0 = vmul.f32 %v2154_v35, %v202_v43  ;;  %v345_v35 = vmul.f32 %v2192_v55, %v2137_v24 }
 0x319   : > { %v273_v31 = vadd.f32 %v270_v5, %v233_v4  ;;  %v274_v16 = vadd.f32 %v271_v52, %v234_v42  ;;  %v275_v60 = vadd.f32 %v272_v8, %v235_v0  ;;  %v2584_v12 = vpop.permute.xlu1 %1613  ;;  %v392_v8 = vsel %vm366_vm2, %v2317_v30, %v2319_v33 }
 0x31a   : > { %v2590_v15 = vpop.permute.xlu0 %556 }
 0x31b   : > { %v310_v57 = vadd.f32 %v307_v59, %v273_v31  ;;  %v311_v11 = vadd.f32 %v308_v54, %v274_v16  ;;  %v312_v19 = vadd.f32 %v309_v10, %v275_v60  ;;  %v2972_v59 = vld [vmem:[#allocation7_spill] sm:$0xff]  ;;  %v2973_v10 = vld [vmem:[#allocation9_spill] sm:$0xff] }
 0x31c   : > { %v415_v54 = vsel %vm366_vm2, %v2972_v59, %v2971_v23 }
 0x31d   : > { %v347_v61 = vadd.f32 %v344_v48, %v310_v57  ;;  %v348_v3 = vadd.f32 %v345_v35, %v311_v11  ;;  %v349_v47 = vadd.f32 %v346_v46, %v312_v19  ;;  %v1207_v14 = vpop.permute.xlu1 %1206  ;;  %v2974_v48 = vld [vmem:[#allocation10_spill] sm:$0xff]  ;;  %v2976_v46 = vld [vmem:[#allocation12_spill] sm:$0xff] }
 0x31e   : > { %v2600_v5 = vpop.permute.xlu0 %942  ;;  %v440_v57 = vsel %vm366_vm2, %v2974_v48, %v2976_v46 }
 0x31f   : > { %v372_v52 = vadd.f32 %v367_v32, %v347_v61  ;;  %v373_v43 = vadd.f32 %v368_v44, %v348_v3  ;;  %v374_v24 = vadd.f32 %v2311_v20, %v349_v47  ;;  %v416_v20 = vsel %vm366_vm2, %v2971_v23, %v2973_v10  ;;  %v2977_v32 = vld [vmem:[#allocation13_spill] sm:$0xff]  ;;  %v2978_v44 = vld [vmem:[#allocation14_spill] sm:$0xff] }
 0x321   : > { %v396_v4 = vadd.f32 %v391_v29, %v372_v52  ;;  %v397_v22 = vadd.f32 %v392_v8, %v373_v43  ;;  %v398_v42 = vadd.f32 %v2319_v33, %v374_v24  ;;  %v1209_v0 = vpop.permute.xlu1 %1208  ;;  %v2975_v33 = vld [vmem:[#allocation11_spill] sm:$0xff]  ;;  %v464_v52 = vsel %vm463_vm3, %v2978_v44, %v2977_v32  ;;  %v2979_v43 = vld [vmem:[#allocation16_spill] sm:$0xff]  ;;  %v2989_v44 = vld [vmem:[#allocation6_spill] sm:$0xff] }
 0x322   : > { %v1212_v31 = vsel %vm849_vm1, %v1207_v14, %v1209_v0  ;;  %v2617_v25 = vpop.permute.xlu0 %1210  ;;  %v439_v35 = vsel %vm366_vm2, %v2975_v33, %v2974_v48  ;;  %v465_v24 = vsel %vm463_vm3, %v2977_v32, %v2979_v43 }
 0x323   : > { %v420_v16 = vadd.f32 %v415_v54, %v396_v4  ;;  %v421_v30 = vadd.f32 %v416_v20, %v397_v22  ;;  %v422_v60 = vadd.f32 %v2973_v10, %v398_v42  ;;  %v2626_v11 = vadd.f32 %v1212_v31, %v1193_v56  ;;  %v2980_v4 = vld [vmem:[#allocation15_spill] sm:$0xff]  ;;  %v2981_v22 = vld [vmem:[#allocation17_spill] sm:$0xff]  ;;  %v2983_v10 = vld [vmem:[#allocation18_spill] sm:$0xff] }
 0x324   : > { %v1213_v19 = vsel %vm849_vm1, %v1209_v0, %v2617_v25  ;;  %v488_v42 = vsel %vm463_vm3, %v2981_v22, %v2980_v4  ;;  %v2982_v0 = vld [vmem:[#allocation19_spill] sm:$0xff]  ;;  %v2984_v20 = vld [vmem:[#allocation21_spill] sm:$0xff] }
 0x325   : > { %v444_v61 = vadd.f32 %v439_v35, %v420_v16  ;;  %v445_v3 = vadd.f32 %v440_v57, %v421_v30  ;;  %v446_v47 = vadd.f32 %v2976_v46, %v422_v60  ;;  %v2631_v14 = vadd.f32 %v1213_v19, %v1194_v40  ;;  %v2985_v16 = vld [vmem:[#allocation22_spill] sm:$0xff]  ;;  %v2986_v35 = vld [vmem:[#allocation20_spill] sm:$0xff]  ;;  %v2987_v46 = vld [vmem:[#allocation23_spill] sm:$0xff] }
 0x326   : > { %v489_v40 = vsel %vm463_vm3, %v2980_v4, %v2982_v0  ;;  %v512_v31 = vsel %vm463_vm3, %v2984_v20, %v2983_v10  ;;  %v513_v30 = vsel %vm463_vm3, %v2983_v10, %v2985_v16  ;;  %v536_v57 = vsel %vm463_vm3, %v2987_v46, %v2986_v35  ;;  %v2988_v19 = vld [vmem:[#allocation24_spill] sm:$0xff] }
 0x327   : > { %v469_v29 = vadd.f32 %v464_v52, %v444_v61  ;;  %v470_v56 = vadd.f32 %v465_v24, %v445_v3  ;;  %v471_v8 = vadd.f32 %v2979_v43, %v446_v47  ;;  %v537_v61 = vsel %vm463_vm3, %v2986_v35, %v2988_v19 }
 0x328   : > { %v1297_v10 = vmul.f32 %v2491_v39, %v2211_v21  ;;  %v1510_v35 = vmul.f32 %v2559_v51, %v2158_v37 }
 0x329   : > { %v493_v23 = vadd.f32 %v488_v42, %v469_v29  ;;  %v494_v59 = vadd.f32 %v489_v40, %v470_v56  ;;  %v495_v54 = vadd.f32 %v2982_v0, %v471_v8  ;;  %v947_v29 = vadd.f32 %v2600_v5, %v2437_v9  ;;  %v1317_v9 = vld [vmem:[%s2897_s2 + $0x8] sm:$0xf] }
 0x32b   : > { %v517_v60 = vadd.f32 %v512_v31, %v493_v23  ;;  %v518_v48 = vadd.f32 %v513_v30, %v494_v59  ;;  %v519_v33 = vadd.f32 %v2985_v16, %v495_v54  ;;  %v950_v0 = vmax.f32 %v947_v29, 0.0 }
 0x32c   : > { %v945_v23 = vadd.f32 %v2600_v5, %v2433_v36  ;;  %v1299_v31 = vmul.f32 %v2491_v39, %v2494_v49  ;;  %v1318_v49 = vld [vmem:[%s2898_s3 + $0x8] sm:$0xf] }
 0x32d   : > { %v541_v3 = vadd.f32 %v536_v57, %v517_v60  ;;  %v542_v47 = vadd.f32 %v537_v61, %v518_v48  ;;  %v543_v32 = vadd.f32 %v2988_v19, %v519_v33  ;;  %v956_v59 = vrot.slane %v950_v0, 4  ;;  %v1905_v60 = vld [vmem:[%s2129_s11] sm:$0xff] }
 0x32e   : > { %v948_v54 = vmax.f32 %v945_v23, 0.0  ;;  %v1418_v48 = vrot.slane %v1905_v60, %v2172_v45  ;;  %v2990_v33 = vmov 1   ;;  %v1477_v19 = vmul.f32 %v2557_v62, %v2147_v28 }
 0x32f   : > { %v551_v52 = vmul.f32 %v2989_v44, %v541_v3  ;;  %v552_v43 = vmul.f32 %v2989_v44, %v542_v47  ;;  %v553_v24 = vmul.f32 %v2989_v44, %v543_v32  ;;  %v1509_v47 = vmul.f32 %v2559_v51, %v2166_v41  ;;  %v2991_v44 = vld [vmem:[#allocation5_spill] sm:$0xff] }
 0x330   : > { %v954_v20 = vrot.slane %v948_v54, 4  ;;  %v1572_v32 = vmul.f32 %v2561_v1, %v2192_v55 }
 0x331   : > { %v559_v56 = vadd.f32 %v2590_v15, %v551_v52  ;;  %v561_v8 = vadd.f32 %v2590_v15, %v553_v24  ;;  %v560_v4 = vadd.f32 %v2590_v15, %v552_v43  ;;  %v946_v15 = vadd.f32 %v2600_v5, %v2435_v50  ;;  %v1354_v5 = vld [vmem:[%s2129_s11 + $0x8] sm:$0xf]  ;;  %s1987_s11 = smov 92  }
 0x332   : > { %v1298_v50 = vmul.f32 %v2491_v39, %v2192_v55  ;;  %v1503_v3 = vrot.slane %v1354_v5, %v2141_v26  ;;  %v2992_v52 = vsub.s32 6, %v2991_v44 }
 0x333   : > { %v562_v22 = vmax.f32 %v559_v56, 0.0  ;;  %v564_v42 = vmax.f32 %v561_v8, 0.0  ;;  %v563_v40 = vmax.f32 %v560_v4, 0.0  ;;  %v949_v36 = vmax.f32 %v946_v15, 0.0 }
 0x334   : > { %v1422_v43 = vrot.slane %v1905_v60, %v2992_v52  ;;  %v1565_v56 = vrot.slane %v1354_v5, %v2187_v53  ;;  %v1571_v8 = vmul.f32 %v2561_v1, %v2211_v21 }
 0x335   : > { %572 = vrot.lane.b32.xlu0 %v564_v42, %s1985_s10  ;;  %568 = vrot.lane.b32.xlu1 %v562_v22, %s1985_s10  ;;  %v955_v16 = vrot.slane %v949_v36, 4  ;;  %v1594_v22 = vmul.f32 %v2567_v18, %v2144_v27  ;;  %v1658_v42 = vpop.permute.xlu1 %1657 }
 0x336   : > { %v1660_v0 = vmul.f32 %v1658_v42, %v2211_v21 }
 0x339   : > { %570 = vrot.lane.b32.xlu1 %v563_v40, %s1985_s10  ;;  %961 = vrot.lane.b32.xlu0 %v956_v59, %s1983_s20  ;;  %v1616_v40 = vmul.f32 %v2584_v12, %v2166_v41  ;;  %v1678_v59 = vld [vmem:[%s2897_s2 + $0xc] sm:$0xf]  ;;  %v1233_v15 = vpop.permute.xlu1 %1232 }
 0x33d   : > { %1321 = vperm.xlu1 %1899, %v1317_v9   ;;  %1283 = vrot.lane.b32.xlu0 %v2485_v2, %s1984_s9  ;;  %v1471_v2 = vrot.slane %v1354_v5, %v2124_v17  ;;  %v1661_v9 = vmul.f32 %v1658_v42, %v2192_v55  ;;  %v1256_v54 = vpop.permute.xlu1 %1255 }
 0x33f   : > { %v1476_v30 = vrot.slane %v1471_v2, %v2124_v17  ;;  %v2709_v17 = vrot.slane %v1418_v48, %v2172_v45 }
 0x341   : > { %1303 = vrot.lane.b32.xlu0 %v1297_v10, %s1984_s9  ;;  %957 = vrot.lane.b32.xlu1 %v954_v20, %s1983_s20  ;;  %v1479_v39 = vmul.f32 %v1476_v30, %v2557_v62  ;;  %v1540_v46 = vmul.f32 %v2563_v7, %v2709_v17  ;;  %v1595_v24 = vmul.f32 %v2567_v18, %v1476_v30  ;;  %v1260_v36 = vpop.permute.xlu1 %1259 }
 0x345   : > { %1307 = vrot.lane.b32.xlu0 %v1299_v31, %s1984_s9  ;;  %959 = vrot.lane.b32.xlu1 %v955_v16, %s1983_s20  ;;  %s1986_s20 = smov 110   ;;  %v1282_v31 = vpop.permute.xlu1 %1281 }
 0x349   : > { %1359 = vperm.xlu0 %1897, %v2481_v34   ;;  %1305 = vrot.lane.b32.xlu1 %v1298_v50, %s1984_s9 }
 0x34d   : > { %1902 = vset.pattern.permute.xlu0 %v2970_v38  ;;  %1329 = vperm.xlu1 %1899, %v1318_v49   ;;  %v1534_v38 = vrot.slane %v1354_v5, %v2172_v45 }
 0x34e   : > { %1438 = vperm.xlu0 %1902, %v2481_v34  }
 0x34f   : > { %v1539_v57 = vrot.slane %v1534_v38, %v2172_v45 }
 0x351   : > { %1900 = vset.pattern.permute.xlu1 %v2990_v33  ;;  %v1542_v61 = vmul.f32 %v1539_v57, %v2563_v7 }
 0x352   : > { %1487 = vrot.lane.b32.xlu0 %v1479_v39, %s1986_s20  ;;  %1386 = vperm.xlu1 %1900, %v2481_v34  }
 0x353   : > { %1904 = vset.pattern.permute.xlu0 %v2960_v63 }
 0x356   : > { %1517 = vrot.lane.b32.xlu0 %v1510_v35, %s1986_s20  ;;  %1901 = vset.pattern.permute.xlu1 %v2966_v13  ;;  %v1478_v13 = vmul.f32 %v2557_v62, %v2144_v27 }
 0x357   : > { %1412 = vperm.xlu1 %1901, %v2481_v34   ;;  %v1508_v34 = vrot.slane %v1503_v3, %v2141_v26  ;;  %v2742_v26 = vrot.slane %v1422_v43, %v2172_v45  ;;  %v1570_v45 = vrot.slane %v1565_v56, %v2187_v53  ;;  %v1640_v53 = vmul.f32 %v2565_v6, %v1539_v57 }
 0x358   : > { %v1219_v57 = vadd.f32 %v2617_v25, %v2555_v58 }
 0x359   : > { %v1511_v62 = vmul.f32 %v1508_v34, %v2559_v51  ;;  %v1541_v29 = vmul.f32 %v2563_v7, %v2742_v26  ;;  %v1617_v51 = vmul.f32 %v2584_v12, %v2158_v37  ;;  %v1638_v7 = vmul.f32 %v2565_v6, %v2709_v17 }
 0x35a   : > { %1546 = vrot.lane.b32.xlu0 %v1540_v46, %s1986_s20  ;;  %v1573_v4 = vmul.f32 %v1570_v45, %v2561_v1  ;;  %v1662_v1 = vmul.f32 %v1658_v42, %v1570_v45  ;;  %v1618_v23 = vmul.f32 %v2584_v12, %v1508_v34  ;;  %v1679_v12 = vld [vmem:[%s2898_s3 + $0xc] sm:$0xf] }
 0x35b   : > { %1483 = vrot.lane.b32.xlu1 %v1477_v19, %s1986_s20 }
 0x35c   : > { %1903 = vset.pattern.permute.xlu1 %v2960_v63  ;;  %v1593_v63 = vmul.f32 %v2567_v18, %v2147_v28  ;;  %v1639_v18 = vmul.f32 %v2565_v6, %v2742_v26  ;;  %v1231_v6 = vpop.permute.xlu0 %1230 }
 0x35d   : > { %v1237_v38 = vsel %vm1236_vm5, %v1231_v6, %v1233_v15 }
 0x35e   : > { %1550 = vrot.lane.b32.xlu0 %v1542_v61, %s1986_s20  ;;  %v1242_v3 = vadd.f32 %v1237_v38, %v2626_v11 }
 0x35f   : > { %1485 = vrot.lane.b32.xlu1 %v1478_v13, %s1986_s20 }
 0x360   : > { %v1235_v10 = vpop.permute.xlu0 %1234 }
 0x361   : > { %v1238_v46 = vsel %vm1236_vm5, %v1233_v15, %v1235_v10  ;;  %v1244_v34 = vadd.f32 %v1235_v10, %v1219_v57 }
 0x362   : > { %1579 = vrot.lane.b32.xlu0 %v1572_v32, %s1986_s20  ;;  %v1243_v13 = vadd.f32 %v1238_v46, %v2631_v14 }
 0x363   : > { %1515 = vrot.lane.b32.xlu1 %v1509_v47, %s1986_s20 }
 0x364   : > { %v1258_v20 = vpop.permute.xlu0 %1257 }
 0x365   : > { %v1261_v19 = vsel %vm1236_vm5, %v1256_v54, %v1258_v20  ;;  %v1262_v61 = vsel %vm1236_vm5, %v1258_v20, %v1260_v36 }
 0x366   : > { %1599 = vrot.lane.b32.xlu0 %v1593_v63, %s1987_s11  ;;  %v1266_v25 = vadd.f32 %v1261_v19, %v1242_v3  ;;  %v1267_v63 = vadd.f32 %v1262_v61, %v1243_v13 }
 0x367   : > { %1519 = vrot.lane.b32.xlu1 %v1511_v62, %s1986_s20  ;;  %v1268_v62 = vadd.f32 %v1260_v36, %v1244_v34 }
 0x368   : > { %v1280_v16 = vpop.permute.xlu0 %1279 }
 0x369   : > { %v1285_v44 = vsel %vm1236_vm5, %v1280_v16, %v1282_v31 }
 0x36a   : > { %1603 = vrot.lane.b32.xlu0 %v1595_v24, %s1987_s11  ;;  %v1290_v24 = vadd.f32 %v1285_v44, %v1266_v25 }
 0x36b   : > { %1548 = vrot.lane.b32.xlu1 %v1541_v29, %s1986_s20 }
 0x36e   : > { %1624 = vrot.lane.b32.xlu0 %v1617_v51, %s1987_s11 }
 0x36f   : > { %1577 = vrot.lane.b32.xlu1 %v1571_v8, %s1986_s20 }
 0x372   : > { %1644 = vrot.lane.b32.xlu0 %v1638_v7, %s1987_s11 }
 0x373   : > { %1581 = vrot.lane.b32.xlu1 %v1573_v4, %s1986_s20  ;;  %s1912_s20 = scalar_lea.vmem %s1911_s23, 1024 }
 0x374   : > { %p1914_p1 = scmp.lt.s32.totalorder %s1912_s20, %s1906_s13 }
 0x376   : > { %1648 = vrot.lane.b32.xlu0 %v1640_v53, %s1987_s11  ;;  %p1915_p2 = por %p1914_p1, %p1913_p0 }
 0x377   : > { %1601 = vrot.lane.b32.xlu1 %v1594_v22, %s1987_s11 }
 0x378   : > { %p1916_p3 = pnand %p1915_p2, %p1909_p13 }
 0x37a   : > { %1666 = vrot.lane.b32.xlu0 %v1660_v0, %s1987_s11 }
 0x37b   : > { %1622 = vrot.lane.b32.xlu1 %v1616_v40, %s1987_s11 }
 0x37e   : > { %1670 = vrot.lane.b32.xlu0 %v1662_v1, %s1987_s11 }
 0x37f   : > { %1626 = vrot.lane.b32.xlu1 %v1618_v23, %s1987_s11 }
 0x383   : > { %1646 = vrot.lane.b32.xlu1 %v1639_v18, %s1987_s11 }
 0x387   : > { %1682 = vperm.xlu1 %1903, %v1678_v59  }
 0x38b   : > { %1668 = vrot.lane.b32.xlu1 %v1661_v9, %s1987_s11 }
 0x38f   : > { %1689 = vperm.xlu1 %1903, %v1679_v12  }
 0x3a7   : > { %v569_v50 = vpop.permute.xlu1 %568  ;;  %v573_v5 = vpop.permute.xlu0 %572 }
 0x3ab   : > { %v571_v2 = vpop.permute.xlu1 %570  ;;  %v962_v39 = vpop.permute.xlu0 %961 }
 0x3ac   : > { %v575_v49 = vsel %vm574_vm4, %v569_v50, %v571_v2  ;;  %v576_v30 = vsel %vm574_vm4, %v571_v2, %v573_v5 }
 0x3ad   : > { %579 = vst [vmem:[%s2791_s7] sm:$0xf] %v575_v49  ;;  %580 = vst [vmem:[%s2791_s7 + $0x8] sm:$0xf] %v576_v30 }
 0x3af   : > { %v1284_v60 = vpop.permute.xlu0 %1283 }
 0x3b0   : > { %v1286_v52 = vsel %vm1236_vm5, %v1282_v31, %v1284_v60  ;;  %v1292_v29 = vadd.f32 %v1284_v60, %v1268_v62 }
 0x3b1   : > { %v1291_v11 = vadd.f32 %v1286_v52, %v1267_v63 }
 0x3b3   : > { %v1304_v33 = vpop.permute.xlu0 %1303 }
 0x3b7   : > { %v1308_v47 = vpop.permute.xlu0 %1307 }
 0x3b8   : > { %v1322_v48 = vpop.permute.xlu1 %1321  ;;  %v1316_v8 = vadd.f32 %v1308_v47, %v1292_v29 }
 0x3ba   : > { %v1326_v40 = vmul.f32 %v1322_v48, %v1316_v8 }
 0x3bc   : > { %v958_v35 = vpop.permute.xlu1 %957 }
 0x3c0   : > { %v960_v32 = vpop.permute.xlu1 %959 }
 0x3c1   : > { %v963_v43 = vsel %vm849_vm1, %v958_v35, %v960_v32  ;;  %v964_v58 = vsel %vm849_vm1, %v960_v32, %v962_v39 }
 0x3c2   : > { %967 = vst [vmem:[%s2791_s7] sm:$0xf0] %v963_v43  ;;  %968 = vst [vmem:[%s2791_s7 + $0x8] sm:$0xf0] %v964_v58 }
 0x3c4   : > { %v1306_v14 = vpop.permute.xlu1 %1305  ;;  %v1360_v56 = vpop.permute.xlu0 %1359 }
 0x3c5   : > { %v1309_v51 = vsel %vm1236_vm5, %v1304_v33, %v1306_v14  ;;  %v1310_v45 = vsel %vm1236_vm5, %v1306_v14, %v1308_v47  ;;  %v1381_v46 = vmul.f32 %v1360_v56, %v2147_v28  ;;  %v1382_v57 = vmul.f32 %v1360_v56, %v2144_v27 }
 0x3c6   : > { %v1314_v7 = vadd.f32 %v1309_v51, %v1290_v24  ;;  %v1315_v4 = vadd.f32 %v1310_v45, %v1291_v11 }
 0x3c8   : > { %v1324_v22 = vmul.f32 %v1322_v48, %v1314_v7  ;;  %v1325_v53 = vmul.f32 %v1322_v48, %v1315_v4  ;;  %v1330_v42 = vpop.permute.xlu1 %1329 }
 0x3c9   : > { %v1439_v0 = vpop.permute.xlu0 %1438  ;;  %v1334_v18 = vadd.f32 %v1330_v42, %v1326_v40 }
 0x3ca   : > { %v1332_v1 = vadd.f32 %v1330_v42, %v1324_v22  ;;  %v1333_v23 = vadd.f32 %v1330_v42, %v1325_v53  ;;  %v1459_v47 = vmul.f32 %v1439_v0, %v2211_v21 }
 0x3cb   : > { %v1337_v6 = vmax.f32 %v1334_v18, 0.0 }
 0x3cc   : > { %v1335_v59 = vmax.f32 %v1332_v1, 0.0  ;;  %v1336_v9 = vmax.f32 %v1333_v23, 0.0 }
 0x3cd   : > { %v1387_v12 = vpop.permute.xlu1 %1386  ;;  %v1488_v15 = vpop.permute.xlu0 %1487 }
 0x3ce   : > { %1341 = vrot.lane.b32.xlu0 %v1335_v59, %s1982_s14  ;;  %1343 = vrot.lane.b32.xlu1 %v1336_v9, %s1982_s14  ;;  %v1407_v48 = vmul.f32 %v1387_v12, %v2166_v41  ;;  %v1408_v33 = vmul.f32 %v1387_v12, %v2158_v37  ;;  %v1460_v41 = vmul.f32 %v1439_v0, %v2192_v55 }
 0x3d0   : > { %v1409_v3 = vadd.f32 %v1407_v48, %v1381_v46  ;;  %v1410_v13 = vadd.f32 %v1408_v33, %v1382_v57 }
 0x3d1   : > { %v1518_v54 = vpop.permute.xlu0 %1517 }
 0x3d2   : > { %v1413_v10 = vpop.permute.xlu1 %1412  ;;  %1345 = vrot.lane.b32.xlu0 %v1337_v6, %s1982_s14  ;;  %s1794_s14 = sshll.u32 %s2037_s19, 9  ;;  %s2855_s19 = scalar_lea.sflag [#allocation3], %s188_s5 }
 0x3d3   : > { %v1433_v19 = vmul.f32 %v2709_v17, %v1413_v10  ;;  %v1434_v61 = vmul.f32 %v2742_v26, %v1413_v10  ;;  %s2847_s12 = scalar_lea.hbm %s2899_s4, %s1794_s14 }
 0x3d5   : > { %v1547_v36 = vpop.permute.xlu0 %1546  ;;  %v1435_v32 = vadd.f32 %v1433_v19, %v1409_v3  ;;  %v1436_v37 = vadd.f32 %v1434_v61, %v1410_v13 }
 0x3d6   : > { %v1484_v20 = vpop.permute.xlu1 %1483 }
 0x3d7   : > { %v1461_v43 = vadd.f32 %v1459_v47, %v1435_v32  ;;  %v1462_v17 = vadd.f32 %v1460_v41, %v1436_v37 }
 0x3d9   : > { %v1551_v31 = vpop.permute.xlu0 %1550 }
 0x3da   : > { %v1486_v16 = vpop.permute.xlu1 %1485 }
 0x3db   : > { %v1490_v28 = vsel %vm1489_vm6, %v1484_v20, %v1486_v16  ;;  %v1491_v27 = vsel %vm1489_vm6, %v1486_v16, %v1488_v15 }
 0x3dc   : > { %v1494_v25 = vadd.f32 %v1490_v28, %v1461_v43  ;;  %v1495_v63 = vadd.f32 %v1491_v27, %v1462_v17 }
 0x3dd   : > { %v1580_v50 = vpop.permute.xlu0 %1579 }
 0x3de   : > { %v1516_v5 = vpop.permute.xlu1 %1515 }
 0x3df   : > { %v1521_v26 = vsel %vm1489_vm6, %v1516_v5, %v1518_v54 }
 0x3e0   : > { %v1525_v11 = vadd.f32 %v1521_v26, %v1494_v25 }
 0x3e1   : > { %v1600_v2 = vpop.permute.xlu0 %1599 }
 0x3e2   : > { %v1520_v49 = vpop.permute.xlu1 %1519 }
 0x3e3   : > { %v1522_v58 = vsel %vm1489_vm6, %v1518_v54, %v1520_v49 }
 0x3e4   : > { %v1526_v29 = vadd.f32 %v1522_v58, %v1495_v63 }
 0x3e5   : > { %v1604_v39 = vpop.permute.xlu0 %1603 }
 0x3e6   : > { %v1549_v30 = vpop.permute.xlu1 %1548 }
 0x3e7   : > { %v1552_v55 = vsel %vm1489_vm6, %v1547_v36, %v1549_v30  ;;  %v1553_v24 = vsel %vm1489_vm6, %v1549_v30, %v1551_v31 }
 0x3e8   : > { %v1556_v51 = vadd.f32 %v1552_v55, %v1525_v11  ;;  %v1557_v45 = vadd.f32 %v1553_v24, %v1526_v29 }
 0x3e9   : > { %v1625_v35 = vpop.permute.xlu0 %1624 }
 0x3ea   : > { %v1578_v60 = vpop.permute.xlu1 %1577 }
 0x3eb   : > { %v1583_v14 = vsel %vm1489_vm6, %v1578_v60, %v1580_v50 }
 0x3ec   : > { %v1587_v53 = vadd.f32 %v1583_v14, %v1556_v51 }
 0x3ed   : > { %v1645_v44 = vpop.permute.xlu0 %1644 }
 0x3ee   : > { %v1582_v38 = vpop.permute.xlu1 %1581 }
 0x3ef   : > { %v1584_v56 = vsel %vm1489_vm6, %v1580_v50, %v1582_v38 }
 0x3f0   : > { %v1588_v42 = vadd.f32 %v1584_v56, %v1557_v45 }
 0x3f1   : > { %v1649_v62 = vpop.permute.xlu0 %1648 }
 0x3f2   : > { %v1602_v34 = vpop.permute.xlu1 %1601 }
 0x3f3   : > { %v1606_v4 = vsel %vm1605_vm7, %v1600_v2, %v1602_v34  ;;  %v1607_v22 = vsel %vm1605_vm7, %v1602_v34, %v1604_v39 }
 0x3f4   : > { %v1610_v1 = vadd.f32 %v1606_v4, %v1587_v53  ;;  %v1611_v23 = vadd.f32 %v1607_v22, %v1588_v42 }
 0x3f5   : > { %v1667_v7 = vpop.permute.xlu0 %1666 }
 0x3f6   : > { %v1623_v52 = vpop.permute.xlu1 %1622 }
 0x3f7   : > { %v1628_v0 = vsel %vm1605_vm7, %v1623_v52, %v1625_v35 }
 0x3f8   : > { %v1632_v12 = vadd.f32 %v1628_v0, %v1610_v1 }
 0x3f9   : > { %v1671_v6 = vpop.permute.xlu0 %1670 }
 0x3fa   : > { %v1627_v21 = vpop.permute.xlu1 %1626 }
 0x3fb   : > { %v1629_v40 = vsel %vm1605_vm7, %v1625_v35, %v1627_v21 }
 0x3fc   : > { %v1633_v15 = vadd.f32 %v1629_v40, %v1611_v23 }
 0x3fe   : > { %v1647_v8 = vpop.permute.xlu1 %1646 }
 0x3ff   : > { %v1650_v59 = vsel %vm1605_vm7, %v1645_v44, %v1647_v8  ;;  %v1651_v9 = vsel %vm1605_vm7, %v1647_v8, %v1649_v62 }
 0x400   : > { %v1654_v54 = vadd.f32 %v1650_v59, %v1632_v12  ;;  %v1655_v10 = vadd.f32 %v1651_v9, %v1633_v15 }
 0x402   : > { %v1683_v18 = vpop.permute.xlu1 %1682 }
 0x406   : > { %v1669_v36 = vpop.permute.xlu1 %1668 }
 0x407   : > { %v1672_v20 = vsel %vm1605_vm7, %v1667_v7, %v1669_v36  ;;  %v1673_v31 = vsel %vm1605_vm7, %v1669_v36, %v1671_v6 }
 0x408   : > { %v1676_v16 = vadd.f32 %v1672_v20, %v1654_v54  ;;  %v1677_v50 = vadd.f32 %v1673_v31, %v1655_v10 }
 0x40a   : > { %v1690_v5 = vpop.permute.xlu1 %1689  ;;  %v1685_v2 = vmul.f32 %v1683_v18, %v1676_v16  ;;  %v1686_v49 = vmul.f32 %v1683_v18, %v1677_v50 }
 0x40c   : > { %v1692_v30 = vadd.f32 %v1690_v5, %v1685_v2  ;;  %v1693_v39 = vadd.f32 %v1690_v5, %v1686_v49 }
 0x40e   : > { %v1694_v60 = vmax.f32 %v1692_v30, 0.0  ;;  %v1695_v48 = vmax.f32 %v1693_v39, 0.0 }
 0x410   : > { %v1698_v33 = vrot.slane %v1694_v60, 4  ;;  %v1699_v35 = vrot.slane %v1695_v48, 4 }
 0x412   : > { %1702 = vst [vmem:[%s2791_s7 + $0x10] sm:$0xf0] %v1698_v33  ;;  %1703 = vst [vmem:[%s2791_s7 + $0x18] sm:$0xf0] %v1699_v35 }
 0x440   : > { %v1344_v38 = vpop.permute.xlu1 %1343  ;;  %v1342_v46 = vpop.permute.xlu0 %1341 }
 0x441   : > { %v1347_v57 = vsel %vm752_vm0, %v1342_v46, %v1344_v38 }
 0x442   : > { %1351 = vst [vmem:[%s2791_s7 + $0x10] sm:$0xf] %v1347_v57 }
 0x444   : > { %v1346_v19 = vpop.permute.xlu0 %1345 }
 0x445   : > { %v1348_v61 = vsel %vm752_vm0, %v1344_v38, %v1346_v19 }
 0x446   : > { %1352 = vst [vmem:[%s2791_s7 + $0x18] sm:$0xf] %v1348_v61 }
 0x447   : > { %1919 = shalt.err (!%p1916_p3)
}
 0x448   : > { %s1920_s11 = scalar_lea.hbm %s2847_s12, 512  ;;  %s1924_s29 = scalar_lea.hbm %s2899_s4, 1024 }
 0x449   : > { %p1921_p4 = scmp.ne.s32.totalorder %s2847_s12, %s1920_s11  ;;  %p1925_p9 = scmp.lt.s32.totalorder %s2847_s12, %s2899_s4 }
 0x44a   : > { %p1926_p10 = scmp.lt.s32.totalorder %s1924_s29, %s1920_s11 }
 0x44b   : > { %p1922_p7 = pnand %p1921_p4, %p2054_p5 }
 0x44c   : > { %p1927_p11 = por %p1926_p10, %p1925_p9 }
 0x44d   : > { %p1923_p8 = pneg %p1922_p7 }
 0x44f   : > { %p1928_p12 = pnand %p1927_p11, %p1923_p8 }
 0x451   : > { %1931 = shalt.err (!%p1928_p12)
}
 0x452   : > { %s1989_s6 = smov 256   ;;  %s1990_s7 = smov 16  }
 0x453   : > { %1796 = dma.vmem_to_hbm [thread:$0]  (%p2054_p5), %s2849_s8, 512, %s2847_s12, %s2855_s19, %s1989_s6, %s1989_s6, %s1990_s7  }
 0x454 PF: > { %p1802_p13 = scmp.ge.s32.totalorder %s1966_s18, 2  ;;  %s1733_s14 = sand.u32 1, %s1954_s15  }
 0x455   : > { %s1734_s9 = scalar_lea.sflag [#allocation3], %s1733_s14 }
 0x456   : > { %p1799_p0 = pnand %p1802_p13, %p2058_p6 }
 0x458   : > { %p1800_p1 = pneg %p1799_p0 }
 0x45a   : > { %1949 = dma.done.wait (%p1800_p1), %s1734_s9, 512  }
 0x45b   : > { %1951 = vsyncadd (%p1800_p1), %s1734_s9, 4294966784  ;;  %p14_p2 = scmp.ge.s32.totalorder %s2041_s21, 4   ;;  %s2993_s15 = smov %s1958_s16 }
 0x45c   : > { %s2994_s16 = smov %s1962_s17  ;;  %s2995_s17 = smov %s2052_s24 }
 0x45d   : > { %s2996_s18 = smov %s2041_s21  ;;  %16 = sbr.rel (!%p14_p2) target bundleno = 3 (0x3), region = 74 }
 0x462   :  { %1739 = vsyncpa [#allocation3], 1 }
 0x463   :  { %1741 = vsyncpa [#allocation3 + $0x1], 1 }

</bundles_post_ra>
